<compile_context>
chip_gen: v7x
topology: tpu7x:2x2x1
jax: 0.10.0
libtpu: 0.0.40
codegen_flags: <defaults>
</compile_context>

<pallas_src>
import functools

import jax
import jax.numpy as jnp
from jax.experimental import pallas as pl
from jax.experimental.pallas import tpu as pltpu  # noqa: F401  (TPU backend)

# ---- module hyper-parameters (AAE defaults) -------------------------------
NUM_INPUTS = 2
NUM_HIDDENS = 16
NUM_RESIDUAL_HIDDENS = 32
NUM_RESIDUAL_LAYERS = 2
WEIGHT_RECON = 1.0
WEIGHT_MATCHING = 0.005
W_A, W_T, W_N, MARGIN = 1.1, 0.1, -0.5, 0.5
BN_EPS = 1e-5


def _f32(x):
    return x.astype(jnp.float32)


def _bf16(x):
    return x.astype(jnp.bfloat16)


# ============================ Pallas kernels ================================
# All kernels use CT layout: activations / outputs are (C, M) with M = N*H*W
# in the lane axis.  Matmul is W(Cout,K) @ patches(K,M) -> lane-dense output.

def _conv_kernel(p_ref, w_ref, b_ref, o_ref, *, relu_in, relu_out):
    p = p_ref[...]
    if relu_in:
        p = jnp.maximum(p, 0.0)
    acc = jnp.dot(w_ref[...], p, preferred_element_type=jnp.float32)
    acc = acc + b_ref[...]
    if relu_out:
        acc = jnp.maximum(acc, 0.0)
    o_ref[...] = acc


def _conv_bn_kernel(p_ref, w_ref, b_ref, g_ref, bt_ref, o_ref, *,
                    relu_in, relu_out, eps):
    p = p_ref[...]
    if relu_in:
        p = jnp.maximum(p, 0.0)
    acc = jnp.dot(w_ref[...], p, preferred_element_type=jnp.float32)
    acc = acc + b_ref[...]
    # training-mode BatchNorm2d: biased batch stats per channel (lane reduce)
    mean = jnp.mean(acc, axis=1, keepdims=True)
    var = jnp.mean(jnp.square(acc - mean), axis=1, keepdims=True)
    y = (acc - mean) * jax.lax.rsqrt(var + eps) * g_ref[...] + bt_ref[...]
    if relu_out:
        y = jnp.maximum(y, 0.0)
    o_ref[...] = y


def _conv_bn_add_kernel(p_ref, w_ref, b_ref, g_ref, bt_ref, skip_ref, o_ref, *,
                        relu_in, eps):
    p = p_ref[...]
    if relu_in:
        p = jnp.maximum(p, 0.0)
    acc = jnp.dot(w_ref[...], p, preferred_element_type=jnp.float32)
    acc = acc + b_ref[...]
    mean = jnp.mean(acc, axis=1, keepdims=True)
    var = jnp.mean(jnp.square(acc - mean), axis=1, keepdims=True)
    y = (acc - mean) * jax.lax.rsqrt(var + eps) * g_ref[...] + bt_ref[...]
    o_ref[...] = y + skip_ref[...]          # fused residual add


def _conv_loss_kernel(p_ref, w_ref, b_ref, x_ref, m_ref, iv_ref,
                      dec_ref, loss_ref):
    acc = jnp.dot(w_ref[...], p_ref[...], preferred_element_type=jnp.float32)
    acc = acc + b_ref[...]
    dec_ref[...] = acc
    # fused reconstruction-loss partial sum: ((dec - x) * mask)^2 / channel_var
    d = (acc - x_ref[...]) * m_ref[...]
    val = d * d * iv_ref[...]
    s = jnp.sum(val, axis=1, keepdims=True)
    loss_ref[...] = jnp.sum(s, axis=0, keepdims=True)


# ============================ layer helpers =================================
def _im2col_ct(x_ct, kh, kw, stride, pad):
    """x_ct: (C, N, H, W) -> transposed patches (kh*kw*C, N*OH*OW).

    K ordering is (kh, kw, cin); M ordering is (n, oh, ow)."""
    C, N, H, W = x_ct.shape
    if pad:
        x_ct = jnp.pad(x_ct, ((0, 0), (0, 0), (pad, pad), (pad, pad)))
    OH = (H + 2 * pad - kh) // stride + 1
    OW = (W + 2 * pad - kw) // stride + 1
    cols = []
    for i in range(kh):
        for j in range(kw):
            cols.append(x_ct[:, :, i:i + stride * OH:stride,
                             j:j + stride * OW:stride])
    pat = jnp.stack(cols, axis=0)                    # (kh*kw, C, N, OH, OW)
    return pat.reshape(kh * kw * C, N * OH * OW), (N, OH, OW)


def conv_ct(x_ct, w, b, *, stride=1, pad=0, relu_in=False, relu_out=False,
            bn=None, skip=None):
    """Fused Conv2d(+bias)[+BN][+ReLU][+residual add] in CT layout.

    x_ct: (Cin, N, H, W); w: PyTorch layout (Cout, Cin, KH, KW); b: (Cout,)
    bn: optional (gamma, beta); skip: optional (Cout, N, OH, OW) tensor added
    to the BN output (residual connection)."""
    Cout, Cin, KH, KW = w.shape
    patches, (N, OH, OW) = _im2col_ct(x_ct, KH, KW, stride, pad)
    wf = jnp.transpose(w, (0, 2, 3, 1)).reshape(Cout, KH * KW * Cin)
    M = N * OH * OW
    args = [_bf16(patches), _bf16(wf), _f32(b).reshape(Cout, 1)]
    if bn is None:
        kernel = functools.partial(_conv_kernel, relu_in=relu_in,
                                   relu_out=relu_out)
    elif skip is None:
        g, bt = bn
        args += [_f32(g).reshape(Cout, 1), _f32(bt).reshape(Cout, 1)]
        kernel = functools.partial(_conv_bn_kernel, relu_in=relu_in,
                                   relu_out=relu_out, eps=BN_EPS)
    else:
        g, bt = bn
        args += [_f32(g).reshape(Cout, 1), _f32(bt).reshape(Cout, 1),
                 _f32(skip).reshape(Cout, M)]
        kernel = functools.partial(_conv_bn_add_kernel, relu_in=relu_in,
                                   eps=BN_EPS)
    out = pl.pallas_call(
        kernel, out_shape=jax.ShapeDtypeStruct((Cout, M), jnp.float32))(*args)
    return out.reshape(Cout, N, OH, OW)


def _convT_ps_weight(w):
    """ConvTranspose2d(K=4, s=2, p=1) weight (Cin, Cout, 4, 4) -> pixel-shuffle
    weight (4*Cout, 9*Cin); rows = (parity_r, parity_c, cout), cols = (a,b,cin)
    over a 3x3 stride-1 window of the (pad=1) un-dilated input."""
    Cin, Cout, _, _ = w.shape
    wf = jnp.zeros((2, 2, Cout, 3, 3, Cin), jnp.float32)
    for r in range(2):
        for c in range(2):
            for a in range(3):
                for bb in range(3):
                    i, j = r + 3 - 2 * a, c + 3 - 2 * bb
                    if 0 <= i < 4 and 0 <= j < 4:
                        wf = wf.at[r, c, :, a, bb, :].set(
                            jnp.transpose(_f32(w[:, :, i, j])))
    return wf.reshape(4 * Cout, 9 * Cin)


def conv_transpose_ct(x_ct, w, b, *, relu_out=False):
    """ConvTranspose2d(4x4, stride=2, pad=1) via stride^2 sub-kernel
    decomposition: one stride-1 matmul producing 4*Cout parity planes, then a
    depth-to-space interleave (XLA glue).  No zero-dilated buffers."""
    Cin, Cout, KH, KW = w.shape
    patches, (N, H, W) = _im2col_ct(x_ct, 3, 3, 1, 1)
    wf = _convT_ps_weight(w)
    bf = jnp.tile(_f32(b), 4).reshape(4 * Cout, 1)
    kernel = functools.partial(_conv_kernel, relu_in=False, relu_out=relu_out)
    out = pl.pallas_call(
        kernel,
        out_shape=jax.ShapeDtypeStruct((4 * Cout, N * H * W), jnp.float32),
    )(_bf16(patches), _bf16(wf), bf)
    out = out.reshape(2, 2, Cout, N, H, W)
    out = jnp.transpose(out, (2, 3, 4, 0, 5, 1))     # (Cout, N, H, r, W, c)
    return out.reshape(Cout, N, 2 * H, 2 * W)


def conv_loss_ct(x_ct, w, b, target_ct, mask_ct, inv_var):
    """Final 1x1 conv with the reconstruction-loss reduction fused in."""
    Cout, Cin, KH, KW = w.shape                      # 1x1 conv
    patches, (N, H, W) = _im2col_ct(x_ct, 1, 1, 1, 0)
    wf = jnp.transpose(w, (0, 2, 3, 1)).reshape(Cout, Cin)
    M = N * H * W
    dec, loss_sum = pl.pallas_call(
        _conv_loss_kernel,
        out_shape=(jax.ShapeDtypeStruct((Cout, M), jnp.float32),
                   jax.ShapeDtypeStruct((1, 1), jnp.float32)),
    )(_bf16(patches), _bf16(wf), _f32(b).reshape(Cout, 1),
      _f32(target_ct).reshape(Cout, M), _f32(mask_ct).reshape(Cout, M),
      _f32(inv_var).reshape(Cout, 1))
    return dec.reshape(Cout, N, H, W), loss_sum[0, 0]


# ============================ parameter init ================================
def init_params(key):
    nh, nrh, ni = NUM_HIDDENS, NUM_RESIDUAL_HIDDENS, NUM_INPUTS
    keys = iter(jax.random.split(key, 64))

    def w(shape, scale=0.05):
        return scale * jax.random.normal(next(keys), shape, jnp.float32)

    p = {}
    # encoder
    p['enc_c1_w'] = w((nh // 2, ni, 1, 1));  p['enc_c1_b'] = w((nh // 2,), 0.01)
    p['enc_c2_w'] = w((nh // 2, nh // 2, 4, 4)); p['enc_c2_b'] = w((nh // 2,), 0.01)
    p['enc_bn2_g'] = jnp.ones((nh // 2,));   p['enc_bn2_b'] = jnp.zeros((nh // 2,))
    p['enc_c3_w'] = w((nh, nh // 2, 4, 4));  p['enc_c3_b'] = w((nh,), 0.01)
    p['enc_bn3_g'] = jnp.ones((nh,));        p['enc_bn3_b'] = jnp.zeros((nh,))
    p['enc_c4_w'] = w((nh, nh, 4, 4));       p['enc_c4_b'] = w((nh,), 0.01)
    p['enc_bn4_g'] = jnp.ones((nh,));        p['enc_bn4_b'] = jnp.zeros((nh,))
    p['enc_c5_w'] = w((nh, nh, 3, 3));       p['enc_c5_b'] = w((nh,), 0.01)
    p['enc_bn5_g'] = jnp.ones((nh,));        p['enc_bn5_b'] = jnp.zeros((nh,))
    # residual block
    for i in range(NUM_RESIDUAL_LAYERS):
        p[f'res{i}_c1_w'] = w((nrh, nh, 3, 3)); p[f'res{i}_c1_b'] = w((nrh,), 0.01)
        p[f'res{i}_bn1_g'] = jnp.ones((nrh,));  p[f'res{i}_bn1_b'] = jnp.zeros((nrh,))
        p[f'res{i}_c2_w'] = w((nh, nrh, 1, 1)); p[f'res{i}_c2_b'] = w((nh,), 0.01)
        p[f'res{i}_bn2_g'] = jnp.ones((nh,));   p[f'res{i}_bn2_b'] = jnp.zeros((nh,))
    # decoder (ConvTranspose2d weights are (Cin, Cout, KH, KW))
    p['dec_t1_w'] = w((nh, nh // 2, 4, 4));      p['dec_t1_b'] = w((nh // 2,), 0.01)
    p['dec_t2_w'] = w((nh // 2, nh // 4, 4, 4)); p['dec_t2_b'] = w((nh // 4,), 0.01)
    p['dec_t3_w'] = w((nh // 4, nh // 4, 4, 4)); p['dec_t3_b'] = w((nh // 4,), 0.01)
    p['dec_c4_w'] = w((ni, nh // 4, 1, 1));      p['dec_c4_b'] = w((ni,), 0.01)
    p['channel_var'] = jnp.array([1.0, 1.0], jnp.float32)
    return p


# ============================ AAE forward ===================================
def aae_forward(params, inputs_nchw, time_matching_mat=None, batch_mask=None):
    p = params
    # NCHW -> CT layout (C, N, H, W)
    x_ct = jnp.transpose(_f32(inputs_nchw), (1, 0, 2, 3))

    # -------- encoder (conv + BN + ReLU fused per layer) --------
    h = conv_ct(x_ct, p['enc_c1_w'], p['enc_c1_b'], stride=1, pad=0)
    h = conv_ct(h, p['enc_c2_w'], p['enc_c2_b'], stride=2, pad=1,
                bn=(p['enc_bn2_g'], p['enc_bn2_b']), relu_out=True)
    h = conv_ct(h, p['enc_c3_w'], p['enc_c3_b'], stride=2, pad=1,
                bn=(p['enc_bn3_g'], p['enc_bn3_b']), relu_out=True)
    h = conv_ct(h, p['enc_c4_w'], p['enc_c4_b'], stride=2, pad=1,
                bn=(p['enc_bn4_g'], p['enc_bn4_b']), relu_out=True)
    h = conv_ct(h, p['enc_c5_w'], p['enc_c5_b'], stride=1, pad=1,
                bn=(p['enc_bn5_g'], p['enc_bn5_b']), relu_out=False)
    for i in range(NUM_RESIDUAL_LAYERS):
        # h + BN(Conv1x1(ReLU(BN(Conv3x3(ReLU(h))))))  -- 2 fused calls
        r = conv_ct(h, p[f'res{i}_c1_w'], p[f'res{i}_c1_b'], stride=1, pad=1,
                    relu_in=True,
                    bn=(p[f'res{i}_bn1_g'], p[f'res{i}_bn1_b']), relu_out=True)
        h = conv_ct(r, p[f'res{i}_c2_w'], p[f'res{i}_c2_b'], stride=1, pad=0,
                    bn=(p[f'res{i}_bn2_g'], p[f'res{i}_bn2_b']), skip=h)
    z_ct = h                                         # (num_hiddens, N, H/8, W/8)

    # -------- decoder (pixel-shuffle transposed convs, ReLU fused) --------
    d = conv_transpose_ct(z_ct, p['dec_t1_w'], p['dec_t1_b'], relu_out=True)
    d = conv_transpose_ct(d, p['dec_t2_w'], p['dec_t2_b'], relu_out=True)
    d = conv_transpose_ct(d, p['dec_t3_w'], p['dec_t3_b'], relu_out=True)

    # -------- final 1x1 conv with fused reconstruction loss --------
    if batch_mask is None:
        mask_ct = jnp.ones_like(x_ct)
    else:
        mask_ct = jnp.transpose(_f32(batch_mask), (1, 0, 2, 3))
    inv_var = 1.0 / p['channel_var']
    dec_ct, loss_sum = conv_loss_ct(d, p['dec_c4_w'], p['dec_c4_b'],
                                    x_ct, mask_ct, inv_var)
    C, N, H, W = x_ct.shape
    recon_loss = loss_sum / (N * C * H * W)          # torch.mean over all elems
    total_loss = WEIGHT_RECON * recon_loss

    time_matching_loss = 0.0
    if time_matching_mat is not None:
        # plain-JAX glue (not the hot path); matches PyTorch semantics
        z_nchw = jnp.transpose(z_ct, (1, 0, 2, 3))
        z_ = z_nchw.reshape(z_nchw.shape[0], -1)
        sim_mat = jnp.mean((z_[None, :, :] - z_[:, None, :]) ** 2, axis=2)
        tmm = _f32(time_matching_mat)
        weights = jnp.where(tmm == 2, W_A,
                            jnp.where(tmm == 1, W_T,
                                      jnp.where(tmm == 0, W_N, tmm)))
        tml = sim_mat * weights
        tml = jnp.where(tmm == 0, jnp.maximum(tml + MARGIN, 0.0), tml)
        time_matching_loss = jnp.mean(tml)
        total_loss = total_loss + WEIGHT_MATCHING * time_matching_loss

    decoded = jnp.transpose(dec_ct, (1, 0, 2, 3))    # back to NCHW
    return decoded, {
        'recon_loss': recon_loss,
        'time_matching_loss': time_matching_loss,
        'total_loss': total_loss,
        'perplexity': jnp.zeros(()),
    }
    # TODO(synk): enc_d / adversarial_loss (Dropout, randn prior) are not part
    # of forward() and are intentionally not implemented here.


# ============================ demo / smoke test =============================
if __name__ == "__main__":
    root = jax.random.PRNGKey(0)
    pkey, xkey = jax.random.split(root)
    params = init_params(pkey)

    # NCHW input, like the PyTorch module: batch=2, channels=num_inputs=2, 32x32
    inputs = jax.random.normal(xkey, (2, NUM_INPUTS, 32, 32), jnp.float32)

    fwd = jax.jit(aae_forward)
    decoded, losses = fwd(params, inputs)
    jax.block_until_ready((decoded, losses))

    assert decoded.shape == inputs.shape
    assert losses['total_loss'].shape == ()
    print("KERNEL_OK")
</pallas_src>

<mosaic_0001>
module attributes {stable_mosaic.version = 11 : i64} {
  func.func @_conv_kernel(%arg0: memref<2x2048xbf16, #tpu.memory_space<vmem>>, %arg1: memref<8x2xbf16, #tpu.memory_space<vmem>>, %arg2: memref<8x1xf32, #tpu.memory_space<vmem>>, %arg3: memref<8x2048xf32, #tpu.memory_space<vmem>>) attributes {dimension_semantics = [], scalar_prefetch = 0 : i64, scratch_operands = 0 : i64, tpu.core_type = #tpu.core_type<tc>} {
    %c0 = arith.constant 0 : index
    %c0_0 = arith.constant 0 : index
    %0 = vector.load %arg0[%c0, %c0_0] : memref<2x2048xbf16, #tpu.memory_space<vmem>>, vector<2x2048xbf16>
    %c0_1 = arith.constant 0 : index
    %c0_2 = arith.constant 0 : index
    %1 = vector.load %arg1[%c0_1, %c0_2] : memref<8x2xbf16, #tpu.memory_space<vmem>>, vector<8x2xbf16>
    %cst = arith.constant dense<0.000000e+00> : vector<8x2048xf32>
    %2 = tpu.matmul %1, %0, %cst {dimension_numbers = #tpu.dot_dimension_numbers<[1], [0], [0], [1], [0, 0, 1, 1], [], []>} : vector<8x2xbf16>, vector<2x2048xbf16>, vector<8x2048xf32> -> vector<8x2048xf32>
    %c0_3 = arith.constant 0 : index
    %c0_4 = arith.constant 0 : index
    %3 = vector.load %arg2[%c0_3, %c0_4] : memref<8x1xf32, #tpu.memory_space<vmem>>, vector<8x1xf32>
    %4 = vector.broadcast %3 : vector<8x1xf32> to vector<8x2048xf32>
    %5 = arith.addf %2, %4 : vector<8x2048xf32>
    %c0_5 = arith.constant 0 : index
    %c0_6 = arith.constant 0 : index
    %6 = vector.load %arg3[%c0_5, %c0_6] : memref<8x2048xf32, #tpu.memory_space<vmem>>, vector<8x2048xf32>
    tpu.vector_store %arg3[%c0_5, %c0_6], %5 {strides = array<i32>} : memref<8x2048xf32, #tpu.memory_space<vmem>>, vector<8x2048xf32>,
    return
  }
}

module attributes {stable_mosaic.version = 11 : i64} {
  func.func @_conv_bn_kernel(%arg0: memref<128x512xbf16, #tpu.memory_space<vmem>>, %arg1: memref<8x128xbf16, #tpu.memory_space<vmem>>, %arg2: memref<8x1xf32, #tpu.memory_space<vmem>>, %arg3: memref<8x1xf32, #tpu.memory_space<vmem>>, %arg4: memref<8x1xf32, #tpu.memory_space<vmem>>, %arg5: memref<8x512xf32, #tpu.memory_space<vmem>>) attributes {dimension_semantics = [], scalar_prefetch = 0 : i64, scratch_operands = 0 : i64, tpu.core_type = #tpu.core_type<tc>} {
    %c0 = arith.constant 0 : index
    %c0_0 = arith.constant 0 : index
    %0 = vector.load %arg0[%c0, %c0_0] : memref<128x512xbf16, #tpu.memory_space<vmem>>, vector<128x512xbf16>
    %c0_1 = arith.constant 0 : index
    %c0_2 = arith.constant 0 : index
    %1 = vector.load %arg1[%c0_1, %c0_2] : memref<8x128xbf16, #tpu.memory_space<vmem>>, vector<8x128xbf16>
    %cst = arith.constant dense<0.000000e+00> : vector<8x512xf32>
    %2 = tpu.matmul %1, %0, %cst {dimension_numbers = #tpu.dot_dimension_numbers<[1], [0], [0], [1], [0, 0, 1, 1], [], []>} : vector<8x128xbf16>, vector<128x512xbf16>, vector<8x512xf32> -> vector<8x512xf32>
    %c0_3 = arith.constant 0 : index
    %c0_4 = arith.constant 0 : index
    %3 = vector.load %arg2[%c0_3, %c0_4] : memref<8x1xf32, #tpu.memory_space<vmem>>, vector<8x1xf32>
    %4 = vector.broadcast %3 : vector<8x1xf32> to vector<8x512xf32>
    %5 = arith.addf %2, %4 : vector<8x512xf32>
    %cst_5 = arith.constant dense<0.000000e+00> : vector<8xf32>
    %6 = vector.multi_reduction <add>, %5, %cst_5 [1] : vector<8x512xf32> to vector<8xf32>
    %7 = vector.shape_cast %6 : vector<8xf32> to vector<8x1xf32>
    %cst_6 = arith.constant 5.120000e+02 : f32
    %8 = vector.broadcast %cst_6 : f32 to vector<8x1xf32>
    %9 = arith.divf %7, %8 : vector<8x1xf32>
    %10 = vector.broadcast %9 : vector<8x1xf32> to vector<8x512xf32>
    %11 = arith.subf %5, %10 : vector<8x512xf32>
    %12 = arith.mulf %11, %11 : vector<8x512xf32>
    %cst_7 = arith.constant dense<0.000000e+00> : vector<8xf32>
    %13 = vector.multi_reduction <add>, %12, %cst_7 [1] : vector<8x512xf32> to vector<8xf32>
    %14 = vector.shape_cast %13 : vector<8xf32> to vector<8x1xf32>
    %cst_8 = arith.constant 5.120000e+02 : f32
    %15 = vector.broadcast %cst_8 : f32 to vector<8x1xf32>
    %16 = arith.divf %14, %15 : vector<8x1xf32>
    %17 = vector.broadcast %9 : vector<8x1xf32> to vector<8x512xf32>
    %18 = arith.subf %5, %17 : vector<8x512xf32>
    %cst_9 = arith.constant 9.99999974E-6 : f32
    %19 = vector.broadcast %cst_9 : f32 to vector<8x1xf32>
    %20 = arith.addf %16, %19 : vector<8x1xf32>
    %21 = math.rsqrt %20 : vector<8x1xf32>
    %22 = vector.broadcast %21 : vector<8x1xf32> to vector<8x512xf32>
    %23 = arith.mulf %18, %22 : vector<8x512xf32>
    %c0_10 = arith.constant 0 : index
    %c0_11 = arith.constant 0 : index
    %24 = vector.load %arg3[%c0_10, %c0_11] : memref<8x1xf32, #tpu.memory_space<vmem>>, vector<8x1xf32>
    %25 = vector.broadcast %24 : vector<8x1xf32> to vector<8x512xf32>
    %26 = arith.mulf %23, %25 : vector<8x512xf32>
    %c0_12 = arith.constant 0 : index
    %c0_13 = arith.constant 0 : index
    %27 = vector.load %arg4[%c0_12, %c0_13] : memref<8x1xf32, #tpu.memory_space<vmem>>, vector<8x1xf32>
    %28 = vector.broadcast %27 : vector<8x1xf32> to vector<8x512xf32>
    %29 = arith.addf %26, %28 : vector<8x512xf32>
    %cst_14 = arith.constant 0.000000e+00 : f32
    %30 = vector.broadcast %cst_14 : f32 to vector<8x512xf32>
    %31 = arith.maximumf %29, %30 : vector<8x512xf32>
    %c0_15 = arith.constant 0 : index
    %c0_16 = arith.constant 0 : index
    %32 = vector.load %arg5[%c0_15, %c0_16] : memref<8x512xf32, #tpu.memory_space<vmem>>, vector<8x512xf32>
    tpu.vector_store %arg5[%c0_15, %c0_16], %31 {strides = array<i32>} : memref<8x512xf32, #tpu.memory_space<vmem>>, vector<8x512xf32>,
    return
  }
}

module attributes {stable_mosaic.version = 11 : i64} {
  func.func @_conv_bn_kernel(%arg0: memref<128x128xbf16, #tpu.memory_space<vmem>>, %arg1: memref<16x128xbf16, #tpu.memory_space<vmem>>, %arg2: memref<16x1xf32, #tpu.memory_space<vmem>>, %arg3: memref<16x1xf32, #tpu.memory_space<vmem>>, %arg4: memref<16x1xf32, #tpu.memory_space<vmem>>, %arg5: memref<16x128xf32, #tpu.memory_space<vmem>>) attributes {dimension_semantics = [], scalar_prefetch = 0 : i64, scratch_operands = 0 : i64, tpu.core_type = #tpu.core_type<tc>} {
    %c0 = arith.constant 0 : index
    %c0_0 = arith.constant 0 : index
    %0 = vector.load %arg0[%c0, %c0_0] : memref<128x128xbf16, #tpu.memory_space<vmem>>, vector<128x128xbf16>
    %c0_1 = arith.constant 0 : index
    %c0_2 = arith.constant 0 : index
    %1 = vector.load %arg1[%c0_1, %c0_2] : memref<16x128xbf16, #tpu.memory_space<vmem>>, vector<16x128xbf16>
    %cst = arith.constant dense<0.000000e+00> : vector<16x128xf32>
    %2 = tpu.matmul %1, %0, %cst {dimension_numbers = #tpu.dot_dimension_numbers<[1], [0], [0], [1], [0, 0, 1, 1], [], []>} : vector<16x128xbf16>, vector<128x128xbf16>, vector<16x128xf32> -> vector<16x128xf32>
    %c0_3 = arith.constant 0 : index
    %c0_4 = arith.constant 0 : index
    %3 = vector.load %arg2[%c0_3, %c0_4] : memref<16x1xf32, #tpu.memory_space<vmem>>, vector<16x1xf32>
    %4 = vector.broadcast %3 : vector<16x1xf32> to vector<16x128xf32>
    %5 = arith.addf %2, %4 : vector<16x128xf32>
    %cst_5 = arith.constant dense<0.000000e+00> : vector<16xf32>
    %6 = vector.multi_reduction <add>, %5, %cst_5 [1] : vector<16x128xf32> to vector<16xf32>
    %7 = vector.shape_cast %6 : vector<16xf32> to vector<16x1xf32>
    %cst_6 = arith.constant 1.280000e+02 : f32
    %8 = vector.broadcast %cst_6 : f32 to vector<16x1xf32>
    %9 = arith.divf %7, %8 : vector<16x1xf32>
    %10 = vector.broadcast %9 : vector<16x1xf32> to vector<16x128xf32>
    %11 = arith.subf %5, %10 : vector<16x128xf32>
    %12 = arith.mulf %11, %11 : vector<16x128xf32>
    %cst_7 = arith.constant dense<0.000000e+00> : vector<16xf32>
    %13 = vector.multi_reduction <add>, %12, %cst_7 [1] : vector<16x128xf32> to vector<16xf32>
    %14 = vector.shape_cast %13 : vector<16xf32> to vector<16x1xf32>
    %cst_8 = arith.constant 1.280000e+02 : f32
    %15 = vector.broadcast %cst_8 : f32 to vector<16x1xf32>
    %16 = arith.divf %14, %15 : vector<16x1xf32>
    %17 = vector.broadcast %9 : vector<16x1xf32> to vector<16x128xf32>
    %18 = arith.subf %5, %17 : vector<16x128xf32>
    %cst_9 = arith.constant 9.99999974E-6 : f32
    %19 = vector.broadcast %cst_9 : f32 to vector<16x1xf32>
    %20 = arith.addf %16, %19 : vector<16x1xf32>
    %21 = math.rsqrt %20 : vector<16x1xf32>
    %22 = vector.broadcast %21 : vector<16x1xf32> to vector<16x128xf32>
    %23 = arith.mulf %18, %22 : vector<16x128xf32>
    %c0_10 = arith.constant 0 : index
    %c0_11 = arith.constant 0 : index
    %24 = vector.load %arg3[%c0_10, %c0_11] : memref<16x1xf32, #tpu.memory_space<vmem>>, vector<16x1xf32>
    %25 = vector.broadcast %24 : vector<16x1xf32> to vector<16x128xf32>
    %26 = arith.mulf %23, %25 : vector<16x128xf32>
    %c0_12 = arith.constant 0 : index
    %c0_13 = arith.constant 0 : index
    %27 = vector.load %arg4[%c0_12, %c0_13] : memref<16x1xf32, #tpu.memory_space<vmem>>, vector<16x1xf32>
    %28 = vector.broadcast %27 : vector<16x1xf32> to vector<16x128xf32>
    %29 = arith.addf %26, %28 : vector<16x128xf32>
    %cst_14 = arith.constant 0.000000e+00 : f32
    %30 = vector.broadcast %cst_14 : f32 to vector<16x128xf32>
    %31 = arith.maximumf %29, %30 : vector<16x128xf32>
    %c0_15 = arith.constant 0 : index
    %c0_16 = arith.constant 0 : index
    %32 = vector.load %arg5[%c0_15, %c0_16] : memref<16x128xf32, #tpu.memory_space<vmem>>, vector<16x128xf32>
    tpu.vector_store %arg5[%c0_15, %c0_16], %31 {strides = array<i32>} : memref<16x128xf32, #tpu.memory_space<vmem>>, vector<16x128xf32>,
    return
  }
}

module attributes {stable_mosaic.version = 11 : i64} {
  func.func @_conv_bn_kernel(%arg0: memref<256x32xbf16, #tpu.memory_space<vmem>>, %arg1: memref<16x256xbf16, #tpu.memory_space<vmem>>, %arg2: memref<16x1xf32, #tpu.memory_space<vmem>>, %arg3: memref<16x1xf32, #tpu.memory_space<vmem>>, %arg4: memref<16x1xf32, #tpu.memory_space<vmem>>, %arg5: memref<16x32xf32, #tpu.memory_space<vmem>>) attributes {dimension_semantics = [], scalar_prefetch = 0 : i64, scratch_operands = 0 : i64, tpu.core_type = #tpu.core_type<tc>} {
    %c0 = arith.constant 0 : index
    %c0_0 = arith.constant 0 : index
    %0 = vector.load %arg0[%c0, %c0_0] : memref<256x32xbf16, #tpu.memory_space<vmem>>, vector<256x32xbf16>
    %c0_1 = arith.constant 0 : index
    %c0_2 = arith.constant 0 : index
    %1 = vector.load %arg1[%c0_1, %c0_2] : memref<16x256xbf16, #tpu.memory_space<vmem>>, vector<16x256xbf16>
    %cst = arith.constant dense<0.000000e+00> : vector<16x32xf32>
    %2 = tpu.matmul %1, %0, %cst {dimension_numbers = #tpu.dot_dimension_numbers<[1], [0], [0], [1], [0, 0, 1, 1], [], []>} : vector<16x256xbf16>, vector<256x32xbf16>, vector<16x32xf32> -> vector<16x32xf32>
    %c0_3 = arith.constant 0 : index
    %c0_4 = arith.constant 0 : index
    %3 = vector.load %arg2[%c0_3, %c0_4] : memref<16x1xf32, #tpu.memory_space<vmem>>, vector<16x1xf32>
    %4 = vector.broadcast %3 : vector<16x1xf32> to vector<16x32xf32>
    %5 = arith.addf %2, %4 : vector<16x32xf32>
    %cst_5 = arith.constant dense<0.000000e+00> : vector<16xf32>
    %6 = vector.multi_reduction <add>, %5, %cst_5 [1] : vector<16x32xf32> to vector<16xf32>
    %7 = vector.shape_cast %6 : vector<16xf32> to vector<16x1xf32>
    %cst_6 = arith.constant 3.200000e+01 : f32
    %8 = vector.broadcast %cst_6 : f32 to vector<16x1xf32>
    %9 = arith.divf %7, %8 : vector<16x1xf32>
    %10 = vector.broadcast %9 : vector<16x1xf32> to vector<16x32xf32>
    %11 = arith.subf %5, %10 : vector<16x32xf32>
    %12 = arith.mulf %11, %11 : vector<16x32xf32>
    %cst_7 = arith.constant dense<0.000000e+00> : vector<16xf32>
    %13 = vector.multi_reduction <add>, %12, %cst_7 [1] : vector<16x32xf32> to vector<16xf32>
    %14 = vector.shape_cast %13 : vector<16xf32> to vector<16x1xf32>
    %cst_8 = arith.constant 3.200000e+01 : f32
    %15 = vector.broadcast %cst_8 : f32 to vector<16x1xf32>
    %16 = arith.divf %14, %15 : vector<16x1xf32>
    %17 = vector.broadcast %9 : vector<16x1xf32> to vector<16x32xf32>
    %18 = arith.subf %5, %17 : vector<16x32xf32>
    %cst_9 = arith.constant 9.99999974E-6 : f32
    %19 = vector.broadcast %cst_9 : f32 to vector<16x1xf32>
    %20 = arith.addf %16, %19 : vector<16x1xf32>
    %21 = math.rsqrt %20 : vector<16x1xf32>
    %22 = vector.broadcast %21 : vector<16x1xf32> to vector<16x32xf32>
    %23 = arith.mulf %18, %22 : vector<16x32xf32>
    %c0_10 = arith.constant 0 : index
    %c0_11 = arith.constant 0 : index
    %24 = vector.load %arg3[%c0_10, %c0_11] : memref<16x1xf32, #tpu.memory_space<vmem>>, vector<16x1xf32>
    %25 = vector.broadcast %24 : vector<16x1xf32> to vector<16x32xf32>
    %26 = arith.mulf %23, %25 : vector<16x32xf32>
    %c0_12 = arith.constant 0 : index
    %c0_13 = arith.constant 0 : index
    %27 = vector.load %arg4[%c0_12, %c0_13] : memref<16x1xf32, #tpu.memory_space<vmem>>, vector<16x1xf32>
    %28 = vector.broadcast %27 : vector<16x1xf32> to vector<16x32xf32>
    %29 = arith.addf %26, %28 : vector<16x32xf32>
    %cst_14 = arith.constant 0.000000e+00 : f32
    %30 = vector.broadcast %cst_14 : f32 to vector<16x32xf32>
    %31 = arith.maximumf %29, %30 : vector<16x32xf32>
    %c0_15 = arith.constant 0 : index
    %c0_16 = arith.constant 0 : index
    %32 = vector.load %arg5[%c0_15, %c0_16] : memref<16x32xf32, #tpu.memory_space<vmem>>, vector<16x32xf32>
    tpu.vector_store %arg5[%c0_15, %c0_16], %31 {strides = array<i32>} : memref<16x32xf32, #tpu.memory_space<vmem>>, vector<16x32xf32>,
    return
  }
}

module attributes {stable_mosaic.version = 11 : i64} {
  func.func @_conv_bn_kernel(%arg0: memref<144x32xbf16, #tpu.memory_space<vmem>>, %arg1: memref<16x144xbf16, #tpu.memory_space<vmem>>, %arg2: memref<16x1xf32, #tpu.memory_space<vmem>>, %arg3: memref<16x1xf32, #tpu.memory_space<vmem>>, %arg4: memref<16x1xf32, #tpu.memory_space<vmem>>, %arg5: memref<16x32xf32, #tpu.memory_space<vmem>>) attributes {dimension_semantics = [], scalar_prefetch = 0 : i64, scratch_operands = 0 : i64, tpu.core_type = #tpu.core_type<tc>} {
    %c0 = arith.constant 0 : index
    %c0_0 = arith.constant 0 : index
    %0 = vector.load %arg0[%c0, %c0_0] : memref<144x32xbf16, #tpu.memory_space<vmem>>, vector<144x32xbf16>
    %c0_1 = arith.constant 0 : index
    %c0_2 = arith.constant 0 : index
    %1 = vector.load %arg1[%c0_1, %c0_2] : memref<16x144xbf16, #tpu.memory_space<vmem>>, vector<16x144xbf16>
    %cst = arith.constant dense<0.000000e+00> : vector<16x32xf32>
    %2 = tpu.matmul %1, %0, %cst {dimension_numbers = #tpu.dot_dimension_numbers<[1], [0], [0], [1], [0, 0, 1, 1], [], []>} : vector<16x144xbf16>, vector<144x32xbf16>, vector<16x32xf32> -> vector<16x32xf32>
    %c0_3 = arith.constant 0 : index
    %c0_4 = arith.constant 0 : index
    %3 = vector.load %arg2[%c0_3, %c0_4] : memref<16x1xf32, #tpu.memory_space<vmem>>, vector<16x1xf32>
    %4 = vector.broadcast %3 : vector<16x1xf32> to vector<16x32xf32>
    %5 = arith.addf %2, %4 : vector<16x32xf32>
    %cst_5 = arith.constant dense<0.000000e+00> : vector<16xf32>
    %6 = vector.multi_reduction <add>, %5, %cst_5 [1] : vector<16x32xf32> to vector<16xf32>
    %7 = vector.shape_cast %6 : vector<16xf32> to vector<16x1xf32>
    %cst_6 = arith.constant 3.200000e+01 : f32
    %8 = vector.broadcast %cst_6 : f32 to vector<16x1xf32>
    %9 = arith.divf %7, %8 : vector<16x1xf32>
    %10 = vector.broadcast %9 : vector<16x1xf32> to vector<16x32xf32>
    %11 = arith.subf %5, %10 : vector<16x32xf32>
    %12 = arith.mulf %11, %11 : vector<16x32xf32>
    %cst_7 = arith.constant dense<0.000000e+00> : vector<16xf32>
    %13 = vector.multi_reduction <add>, %12, %cst_7 [1] : vector<16x32xf32> to vector<16xf32>
    %14 = vector.shape_cast %13 : vector<16xf32> to vector<16x1xf32>
    %cst_8 = arith.constant 3.200000e+01 : f32
    %15 = vector.broadcast %cst_8 : f32 to vector<16x1xf32>
    %16 = arith.divf %14, %15 : vector<16x1xf32>
    %17 = vector.broadcast %9 : vector<16x1xf32> to vector<16x32xf32>
    %18 = arith.subf %5, %17 : vector<16x32xf32>
    %cst_9 = arith.constant 9.99999974E-6 : f32
    %19 = vector.broadcast %cst_9 : f32 to vector<16x1xf32>
    %20 = arith.addf %16, %19 : vector<16x1xf32>
    %21 = math.rsqrt %20 : vector<16x1xf32>
    %22 = vector.broadcast %21 : vector<16x1xf32> to vector<16x32xf32>
    %23 = arith.mulf %18, %22 : vector<16x32xf32>
    %c0_10 = arith.constant 0 : index
    %c0_11 = arith.constant 0 : index
    %24 = vector.load %arg3[%c0_10, %c0_11] : memref<16x1xf32, #tpu.memory_space<vmem>>, vector<16x1xf32>
    %25 = vector.broadcast %24 : vector<16x1xf32> to vector<16x32xf32>
    %26 = arith.mulf %23, %25 : vector<16x32xf32>
    %c0_12 = arith.constant 0 : index
    %c0_13 = arith.constant 0 : index
    %27 = vector.load %arg4[%c0_12, %c0_13] : memref<16x1xf32, #tpu.memory_space<vmem>>, vector<16x1xf32>
    %28 = vector.broadcast %27 : vector<16x1xf32> to vector<16x32xf32>
    %29 = arith.addf %26, %28 : vector<16x32xf32>
    %c0_14 = arith.constant 0 : index
    %c0_15 = arith.constant 0 : index
    %30 = vector.load %arg5[%c0_14, %c0_15] : memref<16x32xf32, #tpu.memory_space<vmem>>, vector<16x32xf32>
    tpu.vector_store %arg5[%c0_14, %c0_15], %29 {strides = array<i32>} : memref<16x32xf32, #tpu.memory_space<vmem>>, vector<16x32xf32>,
    return
  }
}

module attributes {stable_mosaic.version = 11 : i64} {
  func.func @_conv_bn_add_kernel(%arg0: memref<32x32xbf16, #tpu.memory_space<vmem>>, %arg1: memref<16x32xbf16, #tpu.memory_space<vmem>>, %arg2: memref<16x1xf32, #tpu.memory_space<vmem>>, %arg3: memref<16x1xf32, #tpu.memory_space<vmem>>, %arg4: memref<16x1xf32, #tpu.memory_space<vmem>>, %arg5: memref<16x32xf32, #tpu.memory_space<vmem>>, %arg6: memref<16x32xf32, #tpu.memory_space<vmem>>) attributes {dimension_semantics = [], scalar_prefetch = 0 : i64, scratch_operands = 0 : i64, tpu.core_type = #tpu.core_type<tc>} {
    %c0 = arith.constant 0 : index
    %c0_0 = arith.constant 0 : index
    %0 = vector.load %arg0[%c0, %c0_0] : memref<32x32xbf16, #tpu.memory_space<vmem>>, vector<32x32xbf16>
    %c0_1 = arith.constant 0 : index
    %c0_2 = arith.constant 0 : index
    %1 = vector.load %arg1[%c0_1, %c0_2] : memref<16x32xbf16, #tpu.memory_space<vmem>>, vector<16x32xbf16>
    %cst = arith.constant dense<0.000000e+00> : vector<16x32xf32>
    %2 = tpu.matmul %1, %0, %cst {dimension_numbers = #tpu.dot_dimension_numbers<[1], [0], [0], [1], [0, 0, 1, 1], [], []>} : vector<16x32xbf16>, vector<32x32xbf16>, vector<16x32xf32> -> vector<16x32xf32>
    %c0_3 = arith.constant 0 : index
    %c0_4 = arith.constant 0 : index
    %3 = vector.load %arg2[%c0_3, %c0_4] : memref<16x1xf32, #tpu.memory_space<vmem>>, vector<16x1xf32>
    %4 = vector.broadcast %3 : vector<16x1xf32> to vector<16x32xf32>
    %5 = arith.addf %2, %4 : vector<16x32xf32>
    %cst_5 = arith.constant dense<0.000000e+00> : vector<16xf32>
    %6 = vector.multi_reduction <add>, %5, %cst_5 [1] : vector<16x32xf32> to vector<16xf32>
    %7 = vector.shape_cast %6 : vector<16xf32> to vector<16x1xf32>
    %cst_6 = arith.constant 3.200000e+01 : f32
    %8 = vector.broadcast %cst_6 : f32 to vector<16x1xf32>
    %9 = arith.divf %7, %8 : vector<16x1xf32>
    %10 = vector.broadcast %9 : vector<16x1xf32> to vector<16x32xf32>
    %11 = arith.subf %5, %10 : vector<16x32xf32>
    %12 = arith.mulf %11, %11 : vector<16x32xf32>
    %cst_7 = arith.constant dense<0.000000e+00> : vector<16xf32>
    %13 = vector.multi_reduction <add>, %12, %cst_7 [1] : vector<16x32xf32> to vector<16xf32>
    %14 = vector.shape_cast %13 : vector<16xf32> to vector<16x1xf32>
    %cst_8 = arith.constant 3.200000e+01 : f32
    %15 = vector.broadcast %cst_8 : f32 to vector<16x1xf32>
    %16 = arith.divf %14, %15 : vector<16x1xf32>
    %17 = vector.broadcast %9 : vector<16x1xf32> to vector<16x32xf32>
    %18 = arith.subf %5, %17 : vector<16x32xf32>
    %cst_9 = arith.constant 9.99999974E-6 : f32
    %19 = vector.broadcast %cst_9 : f32 to vector<16x1xf32>
    %20 = arith.addf %16, %19 : vector<16x1xf32>
    %21 = math.rsqrt %20 : vector<16x1xf32>
    %22 = vector.broadcast %21 : vector<16x1xf32> to vector<16x32xf32>
    %23 = arith.mulf %18, %22 : vector<16x32xf32>
    %c0_10 = arith.constant 0 : index
    %c0_11 = arith.constant 0 : index
    %24 = vector.load %arg3[%c0_10, %c0_11] : memref<16x1xf32, #tpu.memory_space<vmem>>, vector<16x1xf32>
    %25 = vector.broadcast %24 : vector<16x1xf32> to vector<16x32xf32>
    %26 = arith.mulf %23, %25 : vector<16x32xf32>
    %c0_12 = arith.constant 0 : index
    %c0_13 = arith.constant 0 : index
    %27 = vector.load %arg4[%c0_12, %c0_13] : memref<16x1xf32, #tpu.memory_space<vmem>>, vector<16x1xf32>
    %28 = vector.broadcast %27 : vector<16x1xf32> to vector<16x32xf32>
    %29 = arith.addf %26, %28 : vector<16x32xf32>
    %c0_14 = arith.constant 0 : index
    %c0_15 = arith.constant 0 : index
    %30 = vector.load %arg5[%c0_14, %c0_15] : memref<16x32xf32, #tpu.memory_space<vmem>>, vector<16x32xf32>
    %31 = arith.addf %29, %30 : vector<16x32xf32>
    %c0_16 = arith.constant 0 : index
    %c0_17 = arith.constant 0 : index
    %32 = vector.load %arg6[%c0_16, %c0_17] : memref<16x32xf32, #tpu.memory_space<vmem>>, vector<16x32xf32>
    tpu.vector_store %arg6[%c0_16, %c0_17], %31 {strides = array<i32>} : memref<16x32xf32, #tpu.memory_space<vmem>>, vector<16x32xf32>,
    return
  }
}

module attributes {stable_mosaic.version = 11 : i64} {
  func.func @_conv_bn_kernel(%arg0: memref<144x32xbf16, #tpu.memory_space<vmem>>, %arg1: memref<32x144xbf16, #tpu.memory_space<vmem>>, %arg2: memref<32x1xf32, #tpu.memory_space<vmem>>, %arg3: memref<32x1xf32, #tpu.memory_space<vmem>>, %arg4: memref<32x1xf32, #tpu.memory_space<vmem>>, %arg5: memref<32x32xf32, #tpu.memory_space<vmem>>) attributes {dimension_semantics = [], scalar_prefetch = 0 : i64, scratch_operands = 0 : i64, tpu.core_type = #tpu.core_type<tc>} {
    %c0 = arith.constant 0 : index
    %c0_0 = arith.constant 0 : index
    %0 = vector.load %arg0[%c0, %c0_0] : memref<144x32xbf16, #tpu.memory_space<vmem>>, vector<144x32xbf16>
    %cst = arith.constant 0.000000e+00 : bf16
    %1 = vector.broadcast %cst : bf16 to vector<144x32xbf16>
    %2 = arith.maximumf %0, %1 : vector<144x32xbf16>
    %c0_1 = arith.constant 0 : index
    %c0_2 = arith.constant 0 : index
    %3 = vector.load %arg1[%c0_1, %c0_2] : memref<32x144xbf16, #tpu.memory_space<vmem>>, vector<32x144xbf16>
    %cst_3 = arith.constant dense<0.000000e+00> : vector<32x32xf32>
    %4 = tpu.matmul %3, %2, %cst_3 {dimension_numbers = #tpu.dot_dimension_numbers<[1], [0], [0], [1], [0, 0, 1, 1], [], []>} : vector<32x144xbf16>, vector<144x32xbf16>, vector<32x32xf32> -> vector<32x32xf32>
    %c0_4 = arith.constant 0 : index
    %c0_5 = arith.constant 0 : index
    %5 = vector.load %arg2[%c0_4, %c0_5] : memref<32x1xf32, #tpu.memory_space<vmem>>, vector<32x1xf32>
    %6 = vector.broadcast %5 : vector<32x1xf32> to vector<32x32xf32>
    %7 = arith.addf %4, %6 : vector<32x32xf32>
    %cst_6 = arith.constant dense<0.000000e+00> : vector<32xf32>
    %8 = vector.multi_reduction <add>, %7, %cst_6 [1] : vector<32x32xf32> to vector<32xf32>
    %9 = vector.shape_cast %8 : vector<32xf32> to vector<32x1xf32>
    %cst_7 = arith.constant 3.200000e+01 : f32
    %10 = vector.broadcast %cst_7 : f32 to vector<32x1xf32>
    %11 = arith.divf %9, %10 : vector<32x1xf32>
    %12 = vector.broadcast %11 : vector<32x1xf32> to vector<32x32xf32>
    %13 = arith.subf %7, %12 : vector<32x32xf32>
    %14 = arith.mulf %13, %13 : vector<32x32xf32>
    %cst_8 = arith.constant dense<0.000000e+00> : vector<32xf32>
    %15 = vector.multi_reduction <add>, %14, %cst_8 [1] : vector<32x32xf32> to vector<32xf32>
    %16 = vector.shape_cast %15 : vector<32xf32> to vector<32x1xf32>
    %cst_9 = arith.constant 3.200000e+01 : f32
    %17 = vector.broadcast %cst_9 : f32 to vector<32x1xf32>
    %18 = arith.divf %16, %17 : vector<32x1xf32>
    %19 = vector.broadcast %11 : vector<32x1xf32> to vector<32x32xf32>
    %20 = arith.subf %7, %19 : vector<32x32xf32>
    %cst_10 = arith.constant 9.99999974E-6 : f32
    %21 = vector.broadcast %cst_10 : f32 to vector<32x1xf32>
    %22 = arith.addf %18, %21 : vector<32x1xf32>
    %23 = math.rsqrt %22 : vector<32x1xf32>
    %24 = vector.broadcast %23 : vector<32x1xf32> to vector<32x32xf32>
    %25 = arith.mulf %20, %24 : vector<32x32xf32>
    %c0_11 = arith.constant 0 : index
    %c0_12 = arith.constant 0 : index
    %26 = vector.load %arg3[%c0_11, %c0_12] : memref<32x1xf32, #tpu.memory_space<vmem>>, vector<32x1xf32>
    %27 = vector.broadcast %26 : vector<32x1xf32> to vector<32x32xf32>
    %28 = arith.mulf %25, %27 : vector<32x32xf32>
    %c0_13 = arith.constant 0 : index
    %c0_14 = arith.constant 0 : index
    %29 = vector.load %arg4[%c0_13, %c0_14] : memref<32x1xf32, #tpu.memory_space<vmem>>, vector<32x1xf32>
    %30 = vector.broadcast %29 : vector<32x1xf32> to vector<32x32xf32>
    %31 = arith.addf %28, %30 : vector<32x32xf32>
    %cst_15 = arith.constant 0.000000e+00 : f32
    %32 = vector.broadcast %cst_15 : f32 to vector<32x32xf32>
    %33 = arith.maximumf %31, %32 : vector<32x32xf32>
    %c0_16 = arith.constant 0 : index
    %c0_17 = arith.constant 0 : index
    %34 = vector.load %arg5[%c0_16, %c0_17] : memref<32x32xf32, #tpu.memory_space<vmem>>, vector<32x32xf32>
    tpu.vector_store %arg5[%c0_16, %c0_17], %33 {strides = array<i32>} : memref<32x32xf32, #tpu.memory_space<vmem>>, vector<32x32xf32>,
    return
  }
}

module attributes {stable_mosaic.version = 11 : i64} {
  func.func @_conv_kernel(%arg0: memref<144x32xbf16, #tpu.memory_space<vmem>>, %arg1: memref<32x144xbf16, #tpu.memory_space<vmem>>, %arg2: memref<32x1xf32, #tpu.memory_space<vmem>>, %arg3: memref<32x32xf32, #tpu.memory_space<vmem>>) attributes {dimension_semantics = [], scalar_prefetch = 0 : i64, scratch_operands = 0 : i64, tpu.core_type = #tpu.core_type<tc>} {
    %c0 = arith.constant 0 : index
    %c0_0 = arith.constant 0 : index
    %0 = vector.load %arg0[%c0, %c0_0] : memref<144x32xbf16, #tpu.memory_space<vmem>>, vector<144x32xbf16>
    %c0_1 = arith.constant 0 : index
    %c0_2 = arith.constant 0 : index
    %1 = vector.load %arg1[%c0_1, %c0_2] : memref<32x144xbf16, #tpu.memory_space<vmem>>, vector<32x144xbf16>
    %cst = arith.constant dense<0.000000e+00> : vector<32x32xf32>
    %2 = tpu.matmul %1, %0, %cst {dimension_numbers = #tpu.dot_dimension_numbers<[1], [0], [0], [1], [0, 0, 1, 1], [], []>} : vector<32x144xbf16>, vector<144x32xbf16>, vector<32x32xf32> -> vector<32x32xf32>
    %c0_3 = arith.constant 0 : index
    %c0_4 = arith.constant 0 : index
    %3 = vector.load %arg2[%c0_3, %c0_4] : memref<32x1xf32, #tpu.memory_space<vmem>>, vector<32x1xf32>
    %4 = vector.broadcast %3 : vector<32x1xf32> to vector<32x32xf32>
    %5 = arith.addf %2, %4 : vector<32x32xf32>
    %cst_5 = arith.constant 0.000000e+00 : f32
    %6 = vector.broadcast %cst_5 : f32 to vector<32x32xf32>
    %7 = arith.maximumf %5, %6 : vector<32x32xf32>
    %c0_6 = arith.constant 0 : index
    %c0_7 = arith.constant 0 : index
    %8 = vector.load %arg3[%c0_6, %c0_7] : memref<32x32xf32, #tpu.memory_space<vmem>>, vector<32x32xf32>
    tpu.vector_store %arg3[%c0_6, %c0_7], %7 {strides = array<i32>} : memref<32x32xf32, #tpu.memory_space<vmem>>, vector<32x32xf32>,
    return
  }
}

module attributes {stable_mosaic.version = 11 : i64} {
  func.func @_conv_kernel(%arg0: memref<72x128xbf16, #tpu.memory_space<vmem>>, %arg1: memref<16x72xbf16, #tpu.memory_space<vmem>>, %arg2: memref<16x1xf32, #tpu.memory_space<vmem>>, %arg3: memref<16x128xf32, #tpu.memory_space<vmem>>) attributes {dimension_semantics = [], scalar_prefetch = 0 : i64, scratch_operands = 0 : i64, tpu.core_type = #tpu.core_type<tc>} {
    %c0 = arith.constant 0 : index
    %c0_0 = arith.constant 0 : index
    %0 = vector.load %arg0[%c0, %c0_0] : memref<72x128xbf16, #tpu.memory_space<vmem>>, vector<72x128xbf16>
    %c0_1 = arith.constant 0 : index
    %c0_2 = arith.constant 0 : index
    %1 = vector.load %arg1[%c0_1, %c0_2] : memref<16x72xbf16, #tpu.memory_space<vmem>>, vector<16x72xbf16>
    %cst = arith.constant dense<0.000000e+00> : vector<16x128xf32>
    %2 = tpu.matmul %1, %0, %cst {dimension_numbers = #tpu.dot_dimension_numbers<[1], [0], [0], [1], [0, 0, 1, 1], [], []>} : vector<16x72xbf16>, vector<72x128xbf16>, vector<16x128xf32> -> vector<16x128xf32>
    %c0_3 = arith.constant 0 : index
    %c0_4 = arith.constant 0 : index
    %3 = vector.load %arg2[%c0_3, %c0_4] : memref<16x1xf32, #tpu.memory_space<vmem>>, vector<16x1xf32>
    %4 = vector.broadcast %3 : vector<16x1xf32> to vector<16x128xf32>
    %5 = arith.addf %2, %4 : vector<16x128xf32>
    %cst_5 = arith.constant 0.000000e+00 : f32
    %6 = vector.broadcast %cst_5 : f32 to vector<16x128xf32>
    %7 = arith.maximumf %5, %6 : vector<16x128xf32>
    %c0_6 = arith.constant 0 : index
    %c0_7 = arith.constant 0 : index
    %8 = vector.load %arg3[%c0_6, %c0_7] : memref<16x128xf32, #tpu.memory_space<vmem>>, vector<16x128xf32>
    tpu.vector_store %arg3[%c0_6, %c0_7], %7 {strides = array<i32>} : memref<16x128xf32, #tpu.memory_space<vmem>>, vector<16x128xf32>,
    return
  }
}

module attributes {stable_mosaic.version = 11 : i64} {
  func.func @_conv_kernel(%arg0: memref<36x512xbf16, #tpu.memory_space<vmem>>, %arg1: memref<16x36xbf16, #tpu.memory_space<vmem>>, %arg2: memref<16x1xf32, #tpu.memory_space<vmem>>, %arg3: memref<16x512xf32, #tpu.memory_space<vmem>>) attributes {dimension_semantics = [], scalar_prefetch = 0 : i64, scratch_operands = 0 : i64, tpu.core_type = #tpu.core_type<tc>} {
    %c0 = arith.constant 0 : index
    %c0_0 = arith.constant 0 : index
    %0 = vector.load %arg0[%c0, %c0_0] : memref<36x512xbf16, #tpu.memory_space<vmem>>, vector<36x512xbf16>
    %c0_1 = arith.constant 0 : index
    %c0_2 = arith.constant 0 : index
    %1 = vector.load %arg1[%c0_1, %c0_2] : memref<16x36xbf16, #tpu.memory_space<vmem>>, vector<16x36xbf16>
    %cst = arith.constant dense<0.000000e+00> : vector<16x512xf32>
    %2 = tpu.matmul %1, %0, %cst {dimension_numbers = #tpu.dot_dimension_numbers<[1], [0], [0], [1], [0, 0, 1, 1], [], []>} : vector<16x36xbf16>, vector<36x512xbf16>, vector<16x512xf32> -> vector<16x512xf32>
    %c0_3 = arith.constant 0 : index
    %c0_4 = arith.constant 0 : index
    %3 = vector.load %arg2[%c0_3, %c0_4] : memref<16x1xf32, #tpu.memory_space<vmem>>, vector<16x1xf32>
    %4 = vector.broadcast %3 : vector<16x1xf32> to vector<16x512xf32>
    %5 = arith.addf %2, %4 : vector<16x512xf32>
    %cst_5 = arith.constant 0.000000e+00 : f32
    %6 = vector.broadcast %cst_5 : f32 to vector<16x512xf32>
    %7 = arith.maximumf %5, %6 : vector<16x512xf32>
    %c0_6 = arith.constant 0 : index
    %c0_7 = arith.constant 0 : index
    %8 = vector.load %arg3[%c0_6, %c0_7] : memref<16x512xf32, #tpu.memory_space<vmem>>, vector<16x512xf32>
    tpu.vector_store %arg3[%c0_6, %c0_7], %7 {strides = array<i32>} : memref<16x512xf32, #tpu.memory_space<vmem>>, vector<16x512xf32>,
    return
  }
}

module attributes {stable_mosaic.version = 11 : i64} {
  func.func @_conv_loss_kernel(%arg0: memref<4x2048xbf16, #tpu.memory_space<vmem>>, %arg1: memref<2x4xbf16, #tpu.memory_space<vmem>>, %arg2: memref<2x1xf32, #tpu.memory_space<vmem>>, %arg3: memref<2x2048xf32, #tpu.memory_space<vmem>>, %arg4: memref<2x2048xf32, #tpu.memory_space<vmem>>, %arg5: memref<2x1xf32, #tpu.memory_space<vmem>>, %arg6: memref<2x2048xf32, #tpu.memory_space<vmem>>, %arg7: memref<1x1xf32, #tpu.memory_space<vmem>>) attributes {dimension_semantics = [], scalar_prefetch = 0 : i64, scratch_operands = 0 : i64, tpu.core_type = #tpu.core_type<tc>} {
    %c0 = arith.constant 0 : index
    %c0_0 = arith.constant 0 : index
    %0 = vector.load %arg1[%c0, %c0_0] : memref<2x4xbf16, #tpu.memory_space<vmem>>, vector<2x4xbf16>
    %c0_1 = arith.constant 0 : index
    %c0_2 = arith.constant 0 : index
    %1 = vector.load %arg0[%c0_1, %c0_2] : memref<4x2048xbf16, #tpu.memory_space<vmem>>, vector<4x2048xbf16>
    %cst = arith.constant dense<0.000000e+00> : vector<2x2048xf32>
    %2 = tpu.matmul %0, %1, %cst {dimension_numbers = #tpu.dot_dimension_numbers<[1], [0], [0], [1], [0, 0, 1, 1], [], []>} : vector<2x4xbf16>, vector<4x2048xbf16>, vector<2x2048xf32> -> vector<2x2048xf32>
    %c0_3 = arith.constant 0 : index
    %c0_4 = arith.constant 0 : index
    %3 = vector.load %arg2[%c0_3, %c0_4] : memref<2x1xf32, #tpu.memory_space<vmem>>, vector<2x1xf32>
    %4 = vector.broadcast %3 : vector<2x1xf32> to vector<2x2048xf32>
    %5 = arith.addf %2, %4 : vector<2x2048xf32>
    %c0_5 = arith.constant 0 : index
    %c0_6 = arith.constant 0 : index
    %6 = vector.load %arg6[%c0_5, %c0_6] : memref<2x2048xf32, #tpu.memory_space<vmem>>, vector<2x2048xf32>
    tpu.vector_store %arg6[%c0_5, %c0_6], %5 {strides = array<i32>} : memref<2x2048xf32, #tpu.memory_space<vmem>>, vector<2x2048xf32>,
    %c0_7 = arith.constant 0 : index
    %c0_8 = arith.constant 0 : index
    %7 = vector.load %arg3[%c0_7, %c0_8] : memref<2x2048xf32, #tpu.memory_space<vmem>>, vector<2x2048xf32>
    %8 = arith.subf %5, %7 : vector<2x2048xf32>
    %c0_9 = arith.constant 0 : index
    %c0_10 = arith.constant 0 : index
    %9 = vector.load %arg4[%c0_9, %c0_10] : memref<2x2048xf32, #tpu.memory_space<vmem>>, vector<2x2048xf32>
    %10 = arith.mulf %8, %9 : vector<2x2048xf32>
    %11 = arith.mulf %10, %10 : vector<2x2048xf32>
    %c0_11 = arith.constant 0 : index
    %c0_12 = arith.constant 0 : index
    %12 = vector.load %arg5[%c0_11, %c0_12] : memref<2x1xf32, #tpu.memory_space<vmem>>, vector<2x1xf32>
    %13 = vector.broadcast %12 : vector<2x1xf32> to vector<2x2048xf32>
    %14 = arith.mulf %11, %13 : vector<2x2048xf32>
    %cst_13 = arith.constant dense<0.000000e+00> : vector<2xf32>
    %15 = vector.multi_reduction <add>, %14, %cst_13 [1] : vector<2x2048xf32> to vector<2xf32>
    %16 = vector.shape_cast %15 : vector<2xf32> to vector<2x1xf32>
    %cst_14 = arith.constant dense<0.000000e+00> : vector<1xf32>
    %17 = vector.multi_reduction <add>, %16, %cst_14 [0] : vector<2x1xf32> to vector<1xf32>
    %18 = vector.shape_cast %17 : vector<1xf32> to vector<1x1xf32>
    %c0_15 = arith.constant 0 : index
    %c0_16 = arith.constant 0 : index
    %19 = vector.load %arg7[%c0_15, %c0_16] : memref<1x1xf32, #tpu.memory_space<vmem>>, vector<1x1xf32>
    tpu.vector_store %arg7[%c0_15, %c0_16], %18 {strides = array<i32>} : memref<1x1xf32, #tpu.memory_space<vmem>>, vector<1x1xf32>,
    return
  }
}

</mosaic_0001>

<bundles_post_ra>
// kernel: aae_forward.13
= control target key start
LH: loop header
LB: loop body
LE: loop exit
PB: predicated region body
PF: predicated region fallthrough
CT: control target
= control target key end

     0   :  { %v30_v0 = vlaneseq  ;;  %v546_v1 = vmov 1966171168   ;;  %v547_v3 = vmov 0   ;;  %vm128_vm0 = vcmask 1040384   ;;  %s661_s0 = inlined_call_operand.vmem [shape: bf16[2,2048], index: 0, kind: input, shape index: {}]   ;;  %s662_s2 = inlined_call_operand.vmem [shape: f32[8,1], index: 2, kind: input, shape index: {}]   ;;  %s663_s1 = inlined_call_operand.vmem [shape: bf16[8,2], index: 1, kind: input, shape index: {}]   ;;  %s664_s3 = inlined_call_operand.vmem [shape: f32[8,2048], index: 3, kind: output, shape index: {}]  }
   0x1   :  { %v28_v2 = vunpack.c.l.s4 %v546_v1  ;;  %209 = vmatprep.mubr.bf16.mxu0 %v547_v3  ;;  %250 = vmatprep.mubr.bf16.mxu1 %v547_v3  ;;  %v15_v4 = vld [vmem:[%s661_s0] sm:$0xff]  ;;  %v16_v9 = vld [vmem:[%s661_s0 + $0x8] sm:$0xff]  ;;  %vm124_vm1 = vcmask 15360  }
   0x2   :  { %v31_v5 = vshrl.u32 %v30_v0, 7  ;;  %543 = vset.pattern.permute.xlu0 %v547_v3  ;;  %v18_v6 = vld [vmem:[%s662_s2] sm:$0xff]  ;;  %v26_v7 = vcombine.high %v15_v4, %v15_v4  ;;  %v75_v14 = vcombine.high %v16_v9, %v16_v9 }
   0x3   :  { %v29_v8 = vunpack.c.0.s8 %v28_v2  ;;  %21 = vperm.xlu0 %543, %v18_v6   ;;  %v17_v30 = vld [vmem:[%s663_s1] sm:$0xf] }
   0x5   :  { %v32_v10 = vsub.s32 %v29_v8, %v31_v5 }
   0x7   :  { %v33_v11 = vrot.slane %v15_v4, %v32_v10  ;;  %v40_v12 = vrot.slane %v26_v7, %v32_v10  ;;  %v82_v13 = vrot.slane %v16_v9, %v32_v10  ;;  %v89_v25 = vrot.slane %v75_v14, %v32_v10 }
   0x9   :  { %v41_v15 = vcombine.high %v33_v11, %v33_v11  ;;  %v49_v16 = vrot.slane %v33_v11, %v32_v10  ;;  %v42_v17 = vcombine.high %v40_v12, %v40_v12  ;;  %v56_v18 = vrot.slane %v40_v12, %v32_v10 }
   0xa   :  { %v90_v19 = vcombine.high %v82_v13, %v82_v13  ;;  %v98_v34 = vrot.slane %v82_v13, %v32_v10  ;;  %v91_v35 = vcombine.high %v89_v25, %v89_v25  ;;  %v105_v41 = vrot.slane %v89_v25, %v32_v10 }
   0xb   :  { %v63_v20 = vrot.slane %v41_v15, %v32_v10  ;;  %v130_v21 = vsel %vm128_vm0, %v49_v16, 0  ;;  %v71_v22 = vcombine.high %v49_v16, %v49_v16  ;;  %v70_v23 = vrot.slane %v42_v17, %v32_v10 }
   0xc   :  { %v72_v24 = vcombine.high %v56_v18, %v56_v18  ;;  %v112_v29 = vrot.slane %v90_v19, %v32_v10  ;;  %v142_v31 = vsel %vm128_vm0, %v56_v18, 0  ;;  %v120_v36 = vcombine.high %v98_v34, %v98_v34 }
   0xd   :  { %525 = vmatprep.subr.msk.bf16.mxu0 %vm128_vm0, %v63_v20  ;;  %v73_v26 = vcombine.high %v63_v20, %v63_v20  ;;  %v136_v27 = vsel %vm128_vm0, %v71_v22, 0  ;;  %v74_v28 = vcombine.high %v70_v23, %v70_v23  ;;  %v119_v37 = vrot.slane %v91_v35, %v32_v10 }
   0xe   :  { %178 = vmatpush1.bf16.msra.mxu0 %v130_v21  ;;  %v148_v32 = vsel %vm128_vm0, %v72_v24, 0  ;;  %v122_v33 = vcombine.high %v112_v29, %v112_v29  ;;  %v154_v38 = vsel %vm128_vm0, %v98_v34, 0  ;;  %v160_v39 = vsel %vm128_vm0, %v120_v36, 0 }
   0xf   :  { %527 = vmatprep.subr.msk.bf16.mxu1 %vm128_vm0, %v73_v26  ;;  %529 = vmatprep.subr.msk.bf16.mxu0 %vm128_vm0, %v70_v23  ;;  %v123_v40 = vcombine.high %v119_v37, %v119_v37  ;;  %v121_v42 = vcombine.high %v105_v41, %v105_v41  ;;  %v166_v43 = vsel %vm128_vm0, %v105_v41, 0 }
  0x10   :  { %219 = vmatpush1.bf16.msra.mxu1 %v136_v27 }
  0x11   :  { %526 = vmatmul.mubr.msk.bf16.vlgmr.msra.gmra.mrb[0].mxu0 %vm124_vm1, %v17_v30  ;;  %531 = vmatprep.subr.msk.bf16.mxu1 %vm128_vm0, %v74_v28  ;;  %v172_v44 = vsel %vm128_vm0, %v121_v42, 0 }
  0x12   :  { %260 = vmatpush1.bf16.msra.mxu0 %v142_v31  ;;  %291 = vmatprep.mubr.bf16.mxu0 %v547_v3 }
  0x13   :  { %528 = vmatmul.mubr.msk.bf16.vlgmr.msra.gmra.mrb[0].mxu1 %vm124_vm1, %v17_v30  ;;  %533 = vmatprep.subr.msk.bf16.mxu0 %vm128_vm0, %v112_v29 }
  0x14   :  { %301 = vmatpush1.bf16.msra.mxu1 %v148_v32  ;;  %332 = vmatprep.mubr.bf16.mxu1 %v547_v3 }
  0x15   :  { %535 = vmatprep.subr.msk.bf16.mxu1 %vm128_vm0, %v122_v33 }
  0x19   :  { %530 = vmatmul.mubr.msk.bf16.vlgmr.msra.gmra.mrb[4].mxu0 %vm124_vm1, %v17_v30 }
  0x1a   :  { %342 = vmatpush1.bf16.msra.mxu0 %v154_v38  ;;  %373 = vmatprep.mubr.bf16.mxu0 %v547_v3 }
  0x1b   :  { %532 = vmatmul.mubr.msk.bf16.vlgmr.msra.gmra.mrb[4].mxu1 %vm124_vm1, %v17_v30  ;;  %537 = vmatprep.subr.msk.bf16.mxu0 %vm128_vm0, %v119_v37 }
  0x1c   :  { %383 = vmatpush1.bf16.msra.mxu1 %v160_v39  ;;  %414 = vmatprep.mubr.bf16.mxu1 %v547_v3 }
  0x1d   :  { %539 = vmatprep.subr.msk.bf16.mxu1 %vm128_vm0, %v123_v40 }
  0x21   :  { %534 = vmatmul.mubr.msk.bf16.vlgmr.msra.gmra.mrb[8].mxu0 %vm124_vm1, %v17_v30 }
  0x22   :  { %424 = vmatpush1.bf16.msra.mxu0 %v166_v43  ;;  %455 = vmatprep.mubr.bf16.mxu0 %v547_v3 }
  0x23   :  { %536 = vmatmul.mubr.msk.bf16.vlgmr.msra.gmra.mrb[8].mxu1 %vm124_vm1, %v17_v30 }
  0x24   :  { %465 = vmatpush1.bf16.msra.mxu1 %v172_v44  ;;  %496 = vmatprep.mubr.bf16.mxu1 %v547_v3 }
  0x29   :  { %538 = vmatmul.mubr.msk.bf16.vlgmr.msra.gmra.mrb[12].mxu0 %vm124_vm1, %v17_v30 }
  0x2b   :  { %540 = vmatmul.mubr.msk.bf16.vlgmr.msra.gmra.mrb[12].mxu1 %vm124_vm1, %v17_v30 }
  0x82   :  { %v22_v45 = vpop.permute.xlu0 %21 }
  0xe4   :  { %v211_v46 = vpop.f32.mrb[0].mxu0 }
  0xe5   :  { %v213_v47 = vpop.f32.mrb[1].mxu0  ;;  %v212_v48 = vadd.f32 %v211_v46, %v22_v45 }
  0xe6   :  { %v215_v49 = vpop.f32.mrb[2].mxu0  ;;  %v252_v50 = vpop.f32.mrb[0].mxu1  ;;  %v214_v51 = vadd.f32 %v213_v47, %v22_v45 }
  0xe7   :  { %v253_v52 = vadd.f32 %v252_v50, %v22_v45  ;;  %505 = vst [vmem:[%s664_s3] sm:$0xff] %v212_v48  ;;  %v216_v53 = vpop.f32.mrb[3].mxu0  ;;  %v254_v54 = vpop.f32.mrb[1].mxu1 }
  0xe8   :  { %506 = vst [vmem:[%s664_s3 + $0x8] sm:$0xff] %v214_v51  ;;  %v255_v55 = vadd.f32 %v254_v54, %v22_v45  ;;  %v256_v56 = vpop.f32.mrb[2].mxu1 }
  0xe9   :  { %507 = vst [vmem:[%s664_s3 + $0x10] sm:$0xff] %v253_v52  ;;  %v257_v57 = vpop.f32.mrb[3].mxu1 }
  0xea   :  { %508 = vst [vmem:[%s664_s3 + $0x18] sm:$0xff] %v255_v55 }
  0xec   :  { %v293_v58 = vpop.f32.mrb[4].mxu0 }
  0xed   :  { %v294_v59 = vadd.f32 %v293_v58, %v22_v45  ;;  %v295_v60 = vpop.f32.mrb[5].mxu0 }
  0xee   :  { %v296_v61 = vadd.f32 %v295_v60, %v22_v45  ;;  %v297_v62 = vpop.f32.mrb[6].mxu0  ;;  %v334_v63 = vpop.f32.mrb[4].mxu1 }
  0xef   :  { %509 = vst [vmem:[%s664_s3 + $0x20] sm:$0xff] %v294_v59  ;;  %v335_v0 = vadd.f32 %v334_v63, %v22_v45  ;;  %v298_v1 = vpop.f32.mrb[7].mxu0  ;;  %v336_v2 = vpop.f32.mrb[5].mxu1 }
  0xf0   :  { %510 = vst [vmem:[%s664_s3 + $0x28] sm:$0xff] %v296_v61  ;;  %v337_v3 = vadd.f32 %v336_v2, %v22_v45  ;;  %v338_v4 = vpop.f32.mrb[6].mxu1 }
  0xf1   :  { %511 = vst [vmem:[%s664_s3 + $0x30] sm:$0xff] %v335_v0  ;;  %v339_v5 = vpop.f32.mrb[7].mxu1 }
  0xf2   :  { %512 = vst [vmem:[%s664_s3 + $0x38] sm:$0xff] %v337_v3 }
  0xf4   :  { %v375_v6 = vpop.f32.mrb[8].mxu0 }
  0xf5   :  { %v376_v7 = vadd.f32 %v375_v6, %v22_v45  ;;  %v377_v8 = vpop.f32.mrb[9].mxu0 }
  0xf6   :  { %v378_v9 = vadd.f32 %v377_v8, %v22_v45  ;;  %v379_v10 = vpop.f32.mrb[10].mxu0  ;;  %v416_v11 = vpop.f32.mrb[8].mxu1 }
  0xf7   :  { %513 = vst [vmem:[%s664_s3 + $0x40] sm:$0xff] %v376_v7  ;;  %v417_v12 = vadd.f32 %v416_v11, %v22_v45  ;;  %v380_v13 = vpop.f32.mrb[11].mxu0  ;;  %v418_v14 = vpop.f32.mrb[9].mxu1 }
  0xf8   :  { %514 = vst [vmem:[%s664_s3 + $0x48] sm:$0xff] %v378_v9  ;;  %v419_v15 = vadd.f32 %v418_v14, %v22_v45  ;;  %v420_v16 = vpop.f32.mrb[10].mxu1 }
  0xf9   :  { %515 = vst [vmem:[%s664_s3 + $0x50] sm:$0xff] %v417_v12  ;;  %v421_v17 = vpop.f32.mrb[11].mxu1 }
  0xfa   :  { %516 = vst [vmem:[%s664_s3 + $0x58] sm:$0xff] %v419_v15 }
  0xfc   :  { %v457_v18 = vpop.f32.mrb[12].mxu0 }
  0xfd   :  { %v458_v19 = vadd.f32 %v457_v18, %v22_v45  ;;  %v459_v20 = vpop.f32.mrb[13].mxu0 }
  0xfe   :  { %v460_v21 = vadd.f32 %v459_v20, %v22_v45  ;;  %v461_v22 = vpop.f32.mrb[14].mxu0  ;;  %v498_v23 = vpop.f32.mrb[12].mxu1 }
  0xff   :  { %517 = vst [vmem:[%s664_s3 + $0x60] sm:$0xff] %v458_v19  ;;  %v499_v24 = vadd.f32 %v498_v23, %v22_v45  ;;  %v462_v25 = vpop.f32.mrb[15].mxu0  ;;  %v500_v26 = vpop.f32.mrb[13].mxu1 }
 0x100   :  { %518 = vst [vmem:[%s664_s3 + $0x68] sm:$0xff] %v460_v21  ;;  %v501_v27 = vadd.f32 %v500_v26, %v22_v45  ;;  %v502_v28 = vpop.f32.mrb[14].mxu1 }
 0x101   :  { %519 = vst [vmem:[%s664_s3 + $0x70] sm:$0xff] %v499_v24  ;;  %v503_v29 = vpop.f32.mrb[15].mxu1 }
 0x102   :  { %520 = vst [vmem:[%s664_s3 + $0x78] sm:$0xff] %v501_v27 }

// kernel: aae_forward.14
= control target key start
LH: loop header
LB: loop body
LE: loop exit
PB: predicated region body
PF: predicated region fallthrough
CT: control target
= control target key end

     0   :  { %v446_v1 = vmov 0   ;;  %s597_s0 = inlined_call_operand.vmem [shape: bf16[128,512], index: 0, kind: input, shape index: {}]   ;;  %s598_s2 = inlined_call_operand.vmem [shape: f32[8,1], index: 2, kind: input, shape index: {}]   ;;  %s599_s1 = inlined_call_operand.vmem [shape: bf16[8,128], index: 1, kind: input, shape index: {}]   ;;  %s600_s3 = inlined_call_operand.vmem [shape: f32[8,1], index: 3, kind: input, shape index: {}]   ;;  %s601_s4 = inlined_call_operand.vmem [shape: f32[8,1], index: 4, kind: input, shape index: {}]   ;;  %s602_s5 = inlined_call_operand.vmem [shape: f32[8,512], index: 5, kind: output, shape index: {}]  }
   0x1   :  { %v396_v0 = vld [vmem:[%s597_s0 + $0x4] ss:$16 sps:$4 sm:$0xff]   ;;  %252 = vmatprep.mubr.bf16.mxu0 %v446_v1  ;;  %293 = vmatprep.mubr.bf16.mxu1 %v446_v1  ;;  %v398_v2 = vld [vmem:[%s597_s0 + $0xc] ss:$16 sps:$4 sm:$0xff]   ;;  %v400_v3 = vld [vmem:[%s597_s0] ss:$16 sps:$4 sm:$0xff]  }
   0x2   :  { %394 = vset.pattern.permute.xlu0 %v446_v1  ;;  %395 = vset.pattern.permute.xlu1 %v446_v1  ;;  %v401_v4 = vld [vmem:[%s597_s0 + $0x8] ss:$16 sps:$4 sm:$0xff]   ;;  %v402_v5 = vld [vmem:[%s597_s0 + $0x24] ss:$16 sps:$4 sm:$0xff]   ;;  %v404_v6 = vld [vmem:[%s597_s0 + $0x2c] ss:$16 sps:$4 sm:$0xff]  }
   0x3   :  { %220 = vmatprep.subr.bf16.mxu0 %v396_v0  ;;  %261 = vmatprep.subr.bf16.mxu1 %v398_v2  ;;  %v406_v7 = vld [vmem:[%s597_s0 + $0x20] ss:$16 sps:$4 sm:$0xff]   ;;  %v407_v8 = vld [vmem:[%s597_s0 + $0x28] ss:$16 sps:$4 sm:$0xff]   ;;  %v408_v9 = vld [vmem:[%s597_s0 + $0x44] ss:$16 sps:$4 sm:$0xff]  }
   0x4   :  { %221 = vmatpush1.bf16.msra.mxu0 %v400_v3  ;;  %262 = vmatpush1.bf16.msra.mxu1 %v401_v4  ;;  %v410_v10 = vld [vmem:[%s597_s0 + $0x4c] ss:$16 sps:$4 sm:$0xff]   ;;  %v412_v11 = vld [vmem:[%s597_s0 + $0x40] ss:$16 sps:$4 sm:$0xff]   ;;  %v413_v12 = vld [vmem:[%s597_s0 + $0x48] ss:$16 sps:$4 sm:$0xff]  }
   0x5   :  { %222 = vmatprep.subr.bf16.mxu0 %v402_v5  ;;  %263 = vmatprep.subr.bf16.mxu1 %v404_v6  ;;  %v414_v13 = vld [vmem:[%s597_s0 + $0x64] ss:$16 sps:$4 sm:$0xff]   ;;  %v416_v14 = vld [vmem:[%s597_s0 + $0x6c] ss:$16 sps:$4 sm:$0xff]   ;;  %v418_v15 = vld [vmem:[%s597_s0 + $0x60] ss:$16 sps:$4 sm:$0xff]  }
   0x6   :  { %v419_v16 = vld [vmem:[%s597_s0 + $0x68] ss:$16 sps:$4 sm:$0xff]   ;;  %v420_v17 = vld [vmem:[%s597_s0 + $0x84] ss:$16 sps:$4 sm:$0xff]   ;;  %v422_v18 = vld [vmem:[%s597_s0 + $0x8c] ss:$16 sps:$4 sm:$0xff]  }
   0x7   :  { %v424_v19 = vld [vmem:[%s597_s0 + $0x80] ss:$16 sps:$4 sm:$0xff]   ;;  %v425_v20 = vld [vmem:[%s597_s0 + $0x88] ss:$16 sps:$4 sm:$0xff]   ;;  %v426_v21 = vld [vmem:[%s597_s0 + $0xa4] ss:$16 sps:$4 sm:$0xff]  }
   0x8   :  { %223 = vmatpush1.bf16.msra.mxu0 %v406_v7  ;;  %264 = vmatpush1.bf16.msra.mxu1 %v407_v8  ;;  %v428_v22 = vld [vmem:[%s597_s0 + $0xac] ss:$16 sps:$4 sm:$0xff]   ;;  %v430_v23 = vld [vmem:[%s597_s0 + $0xa0] ss:$16 sps:$4 sm:$0xff]   ;;  %v431_v24 = vld [vmem:[%s597_s0 + $0xa8] ss:$16 sps:$4 sm:$0xff]  }
   0x9   :  { %224 = vmatprep.subr.bf16.mxu0 %v408_v9  ;;  %265 = vmatprep.subr.bf16.mxu1 %v410_v10  ;;  %v432_v25 = vld [vmem:[%s597_s0 + $0xc4] ss:$16 sps:$4 sm:$0xff]   ;;  %v434_v26 = vld [vmem:[%s597_s0 + $0xcc] ss:$16 sps:$4 sm:$0xff]   ;;  %v436_v28 = vld [vmem:[%s597_s0 + $0xc0] ss:$16 sps:$4 sm:$0xff]  }
   0xa   :  { %v54_v27 = vld [vmem:[%s598_s2] sm:$0xff]  ;;  %v437_v29 = vld [vmem:[%s597_s0 + $0xc8] ss:$16 sps:$4 sm:$0xff]   ;;  %v440_v31 = vld [vmem:[%s597_s0 + $0xec] ss:$16 sps:$4 sm:$0xff]  }
   0xb   :  { %57 = vperm.xlu0 %394, %v54_v27   ;;  %v438_v30 = vld [vmem:[%s597_s0 + $0xe4] ss:$16 sps:$4 sm:$0xff]   ;;  %v442_v32 = vld [vmem:[%s597_s0 + $0xe0] ss:$16 sps:$4 sm:$0xff]   ;;  %v443_v33 = vld [vmem:[%s597_s0 + $0xe8] ss:$16 sps:$4 sm:$0xff]  }
   0xc   :  { %225 = vmatpush1.bf16.msra.mxu0 %v412_v11  ;;  %266 = vmatpush1.bf16.msra.mxu1 %v413_v12  ;;  %v53_v34 = vld [vmem:[%s599_s1] sm:$0xf] }
   0xd   :  { %226 = vmatprep.subr.bf16.mxu0 %v414_v13  ;;  %267 = vmatprep.subr.bf16.mxu1 %v416_v14  ;;  %v329_v35 = vld [vmem:[%s600_s3] sm:$0xff] }
   0xe   :  { %332 = vperm.xlu1 %395, %v329_v35   ;;  %v339_v1 = vld [vmem:[%s601_s4] sm:$0xff] }
  0x10   :  { %227 = vmatpush1.bf16.msra.mxu0 %v418_v15  ;;  %268 = vmatpush1.bf16.msra.mxu1 %v419_v16 }
  0x11   :  { %228 = vmatprep.subr.bf16.mxu0 %v420_v17  ;;  %269 = vmatprep.subr.bf16.mxu1 %v422_v18 }
  0x14   :  { %229 = vmatpush1.bf16.msra.mxu0 %v424_v19  ;;  %270 = vmatpush1.bf16.msra.mxu1 %v425_v20 }
  0x15   :  { %230 = vmatprep.subr.bf16.mxu0 %v426_v21  ;;  %271 = vmatprep.subr.bf16.mxu1 %v428_v22 }
  0x18   :  { %231 = vmatpush1.bf16.msra.mxu0 %v430_v23  ;;  %272 = vmatpush1.bf16.msra.mxu1 %v431_v24 }
  0x19   :  { %232 = vmatprep.subr.bf16.mxu0 %v432_v25  ;;  %273 = vmatprep.subr.bf16.mxu1 %v434_v26 }
  0x1c   :  { %233 = vmatpush1.bf16.msra.mxu0 %v436_v28  ;;  %274 = vmatpush1.bf16.msra.mxu1 %v437_v29 }
  0x1d   :  { %234 = vmatprep.subr.bf16.mxu0 %v438_v30  ;;  %275 = vmatprep.subr.bf16.mxu1 %v440_v31 }
  0x20   :  { %235 = vmatpush1.bf16.msra.mxu0 %v442_v32  ;;  %276 = vmatpush1.bf16.msra.mxu1 %v443_v33 }
  0x23   :  { %253 = vmatmul.mubr.bf16.vlgmr.msra.gmra.mrb[0].mxu0 %v53_v34  ;;  %294 = vmatmul.mubr.bf16.vlgmr.msra.gmra.mrb[0].mxu1 %v53_v34 }
  0x8a   :  { %v58_v36 = vpop.permute.xlu0 %57 }
  0x8d   :  { %v333_v2 = vpop.permute.xlu1 %332 }
  0xf6   :  { %v254_v37 = vpop.f32.mrb[0].mxu0  ;;  %v295_v38 = vpop.f32.mrb[0].mxu1 }
  0xf7   :  { %v255_v39 = vadd.f32 %v254_v37, %v58_v36  ;;  %v256_v40 = vpop.f32.mrb[1].mxu0  ;;  %v297_v41 = vpop.f32.mrb[1].mxu1  ;;  %v296_v47 = vadd.f32 %v295_v38, %v58_v36 }
  0xf8   :  { %v257_v42 = vadd.f32 %v256_v40, %v58_v36  ;;  %v258_v43 = vpop.f32.mrb[2].mxu0  ;;  %v299_v44 = vpop.f32.mrb[2].mxu1  ;;  %v298_v49 = vadd.f32 %v297_v41, %v58_v36 }
  0xf9   :  { %v259_v45 = vpop.f32.mrb[3].mxu0  ;;  %v300_v46 = vpop.f32.mrb[3].mxu1 }
  0xfa   :  { %v302_v48 = vadd.f32 %v257_v42, %v255_v39 }
  0xfc   :  { %v303_v50 = vadd.f32 %v302_v48, %v296_v47 }
  0xfe   :  { %v304_v51 = vadd.f32 %v303_v50, %v298_v49 }
 0x100   :  { %305 = vadd.xlane.f32.xlu0 %v304_v51 }
 0x18d   :  { %v306_v52 = vpop.xlane.xlu0 %305 }
 0x18e   :  { %v308_v53 = vmul.f32 0.001953125, %v306_v52 }
 0x190   :  { %v309_v54 = vsub.f32 %v255_v39, %v308_v53  ;;  %v310_v55 = vsub.f32 %v257_v42, %v308_v53  ;;  %v311_v56 = vsub.f32 %v296_v47, %v308_v53  ;;  %v312_v57 = vsub.f32 %v298_v49, %v308_v53 }
 0x192   :  { %v313_v58 = vmul.f32 %v309_v54, %v309_v54  ;;  %v314_v59 = vmul.f32 %v310_v55, %v310_v55  ;;  %v315_v60 = vmul.f32 %v311_v56, %v311_v56  ;;  %v316_v62 = vmul.f32 %v312_v57, %v312_v57 }
 0x194   :  { %v317_v61 = vadd.f32 %v314_v59, %v313_v58 }
 0x196   :  { %v318_v63 = vadd.f32 %v317_v61, %v315_v60 }
 0x198   :  { %v319_v0 = vadd.f32 %v318_v63, %v316_v62 }
 0x19a   :  { %320 = vadd.xlane.f32.xlu1 %v319_v0 }
 0x1ab   :  { %342 = vperm.xlu1 %395, %v339_v1  }
 0x227   :  { %v321_v3 = vpop.xlane.xlu1 %320 }
 0x228   :  { %v322_v4 = vmul.f32 0.001953125, %v321_v3 }
 0x22a   :  { %v323_v5 = vadd.f32 1e-05, %v322_v4 }
 0x22b   :  { %v343_v15 = vpop.permute.xlu1 %342 }
 0x22c   :  { %444 = vrsqrt.f32 %v323_v5 }
 0x236   :  { %v445_v6 = vpop.eup %444 }
 0x237   :  { %v325_v7 = vmul.f32 %v445_v6, %v309_v54  ;;  %v326_v8 = vmul.f32 %v445_v6, %v310_v55  ;;  %v327_v9 = vmul.f32 %v445_v6, %v311_v56  ;;  %v328_v10 = vmul.f32 %v445_v6, %v312_v57 }
 0x239   :  { %v335_v11 = vmul.f32 %v333_v2, %v325_v7  ;;  %v336_v12 = vmul.f32 %v333_v2, %v326_v8  ;;  %v337_v13 = vmul.f32 %v333_v2, %v327_v9  ;;  %v338_v14 = vmul.f32 %v333_v2, %v328_v10 }
 0x23b   :  { %v345_v16 = vadd.f32 %v343_v15, %v335_v11  ;;  %v346_v17 = vadd.f32 %v343_v15, %v336_v12  ;;  %v347_v18 = vadd.f32 %v343_v15, %v337_v13  ;;  %v348_v19 = vadd.f32 %v343_v15, %v338_v14 }
 0x23d   :  { %v349_v20 = vmax.f32 %v345_v16, 0.0  ;;  %v350_v21 = vmax.f32 %v346_v17, 0.0  ;;  %v351_v22 = vmax.f32 %v347_v18, 0.0  ;;  %v352_v23 = vmax.f32 %v348_v19, 0.0 }
 0x23f   :  { %353 = vst [vmem:[%s602_s5] sm:$0xff] %v349_v20  ;;  %354 = vst [vmem:[%s602_s5 + $0x8] sm:$0xff] %v350_v21 }
 0x240   :  { %355 = vst [vmem:[%s602_s5 + $0x10] sm:$0xff] %v351_v22  ;;  %356 = vst [vmem:[%s602_s5 + $0x18] sm:$0xff] %v352_v23 }

// kernel: aae_forward.15
= control target key start
LH: loop header
LB: loop body
LE: loop exit
PB: predicated region body
PF: predicated region fallthrough
CT: control target
= control target key end

     0   :  { %v261_v0 = vmov 0.0   ;;  %vm262_vm0 = vmmov 0   ;;  %v263_v2 = vmov 0   ;;  %s345_s0 = inlined_call_operand.vmem [shape: bf16[128,128], index: 0, kind: input, shape index: {}]   ;;  %s346_s2 = inlined_call_operand.vmem [shape: f32[16,1], index: 2, kind: input, shape index: {}]   ;;  %s347_s1 = inlined_call_operand.vmem [shape: bf16[16,128], index: 1, kind: input, shape index: {}]   ;;  %s348_s3 = inlined_call_operand.vmem [shape: f32[16,1], index: 3, kind: input, shape index: {}]   ;;  %s349_s4 = inlined_call_operand.vmem [shape: f32[16,1], index: 4, kind: input, shape index: {}]   ;;  %s350_s5 = inlined_call_operand.vmem [shape: f32[16,128], index: 5, kind: output, shape index: {}]  }
   0x1   :  { %223 = vmatprep.subr.bf16.mxu0 %v261_v0  ;;  %v248_v1 = vld [vmem:[%s345_s0] sm:$0xff]   ;;  %239 = vmatprep.mubr.msk.bf16.mxu0 %vm262_vm0, %v261_v0  ;;  %v249_v3 = vld [vmem:[%s345_s0 + $0x8] sm:$0xff]   ;;  %v250_v4 = vld [vmem:[%s345_s0 + $0x10] sm:$0xff]  }
   0x2   :  { %246 = vset.pattern.permute.xlu0 %v263_v2  ;;  %247 = vset.pattern.permute.xlu1 %v263_v2  ;;  %v39_v5 = vld [vmem:[%s346_s2] sm:$0xff]  ;;  %v251_v6 = vld [vmem:[%s345_s0 + $0x18] sm:$0xff]   ;;  %v40_v7 = vld [vmem:[%s346_s2 + $0x8] sm:$0xff] }
   0x3   :  { %224 = vmatpush3.bf16.msra.mxu0 %v248_v1  ;;  %43 = vperm.xlu0 %246, %v39_v5   ;;  %v252_v8 = vld [vmem:[%s345_s0 + $0x20] sm:$0xff]   ;;  %v253_v9 = vld [vmem:[%s345_s0 + $0x28] sm:$0xff]   ;;  %v254_v10 = vld [vmem:[%s345_s0 + $0x30] sm:$0xff]  }
   0x4   :  { %225 = vmatprep.subr.bf16.mxu0 %v261_v0  ;;  %v255_v11 = vld [vmem:[%s345_s0 + $0x38] sm:$0xff]   ;;  %v256_v12 = vld [vmem:[%s347_s1] sm:$0xff]   ;;  %v170_v22 = vld [vmem:[%s348_s3 + $0x8] sm:$0xff] }
   0x5   :  { %v169_v21 = vld [vmem:[%s348_s3] sm:$0xff]  ;;  %v184_v32 = vld [vmem:[%s349_s4 + $0x8] sm:$0xff] }
   0x6   :  { %v183_v23 = vld [vmem:[%s349_s4] sm:$0xff] }
   0x7   :  { %226 = vmatpush3.bf16.msra.mxu0 %v249_v3  ;;  %48 = vperm.xlu0 %246, %v40_v7  }
   0x8   :  { %227 = vmatprep.subr.bf16.mxu0 %v261_v0 }
   0xb   :  { %228 = vmatpush3.bf16.msra.mxu0 %v250_v4 }
   0xc   :  { %229 = vmatprep.subr.bf16.mxu0 %v261_v0 }
   0xf   :  { %230 = vmatpush3.bf16.msra.mxu0 %v251_v6 }
  0x10   :  { %231 = vmatprep.subr.bf16.mxu0 %v261_v0 }
  0x13   :  { %232 = vmatpush3.bf16.msra.mxu0 %v252_v8 }
  0x14   :  { %233 = vmatprep.subr.bf16.mxu0 %v261_v0 }
  0x17   :  { %234 = vmatpush3.bf16.msra.mxu0 %v253_v9 }
  0x18   :  { %235 = vmatprep.subr.bf16.mxu0 %v261_v0 }
  0x1b   :  { %236 = vmatpush3.bf16.msra.mxu0 %v254_v10 }
  0x1c   :  { %237 = vmatprep.subr.bf16.mxu0 %v261_v0 }
  0x1f   :  { %238 = vmatpush3.bf16.msra.mxu0 %v255_v11 }
  0x22   :  { %240 = vmatmul.mubr.bf16.vlgmr.msra.gmra.mrb[0].mxu0 %v256_v12 }
  0x82   :  { %v44_v13 = vpop.permute.xlu0 %43 }
  0x86   :  { %v49_v19 = vpop.permute.xlu0 %48 }
  0xf5   :  { %v139_v14 = vpop.f32.mrb[0].mxu0 }
  0xf6   :  { %v140_v15 = vadd.f32 %v139_v14, %v44_v13  ;;  %v241_v16 = vpop.f32.mrb[1].mxu0 }
  0xf7   :  { %v142_v17 = vpop.f32.mrb[2].mxu0 }
  0xf8   :  { %146 = vadd.xlane.f32.xlu1 %v140_v15  ;;  %v242_v18 = vpop.f32.mrb[3].mxu0  ;;  %v143_v20 = vadd.f32 %v142_v17, %v49_v19 }
  0xfc   :  { %148 = vadd.xlane.f32.xlu1 %v143_v20 }
 0x10d   :  { %173 = vperm.xlu1 %247, %v169_v21  }
 0x111   :  { %178 = vperm.xlu1 %247, %v170_v22  }
 0x115   :  { %187 = vperm.xlu1 %247, %v183_v23  }
 0x185   :  { %v147_v24 = vpop.xlane.xlu1 %146 }
 0x186   :  { %v151_v25 = vmul.f32 0.0078125, %v147_v24 }
 0x188   :  { %v153_v26 = vsub.f32 %v140_v15, %v151_v25 }
 0x189   :  { %v149_v27 = vpop.xlane.xlu1 %148 }
 0x18a   :  { %v152_v28 = vmul.f32 0.0078125, %v149_v27  ;;  %v155_v29 = vmul.f32 %v153_v26, %v153_v26 }
 0x18c   :  { %v154_v30 = vsub.f32 %v143_v20, %v152_v28  ;;  %157 = vadd.xlane.f32.xlu0 %v155_v29 }
 0x18d   :  { %v174_v33 = vpop.permute.xlu1 %173 }
 0x18e   :  { %v156_v31 = vmul.f32 %v154_v30, %v154_v30 }
 0x190   :  { %159 = vadd.xlane.f32.xlu1 %v156_v31 }
 0x191   :  { %v179_v34 = vpop.permute.xlu1 %178 }
 0x195   :  { %v188_v35 = vpop.permute.xlu1 %187 }
 0x1a1   :  { %192 = vperm.xlu1 %247, %v184_v32  }
 0x219   :  { %v158_v36 = vpop.xlane.xlu0 %157 }
 0x21a   :  { %v161_v37 = vmul.f32 0.0078125, %v158_v36 }
 0x21c   :  { %v163_v38 = vadd.f32 1e-05, %v161_v37 }
 0x21d   :  { %v160_v39 = vpop.xlane.xlu1 %159 }
 0x21e   :  { %257 = vrsqrt.f32 %v163_v38  ;;  %v162_v40 = vmul.f32 0.0078125, %v160_v39 }
 0x220   :  { %v164_v41 = vadd.f32 1e-05, %v162_v40 }
 0x221   :  { %v193_v50 = vpop.permute.xlu1 %192 }
 0x222   :  { %259 = vrsqrt.f32 %v164_v41 }
 0x228   :  { %v258_v42 = vpop.eup %257 }
 0x229   :  { %v167_v43 = vmul.f32 %v258_v42, %v153_v26 }
 0x22b   :  { %v181_v44 = vmul.f32 %v174_v33, %v167_v43 }
 0x22c   :  { %v260_v45 = vpop.eup %259 }
 0x22d   :  { %v168_v46 = vmul.f32 %v260_v45, %v154_v30  ;;  %v195_v47 = vadd.f32 %v188_v35, %v181_v44 }
 0x22f   :  { %v182_v48 = vmul.f32 %v179_v34, %v168_v46  ;;  %v197_v49 = vmax.f32 %v195_v47, 0.0 }
 0x231   :  { %199 = vst [vmem:[%s350_s5] sm:$0xff] %v197_v49  ;;  %v196_v51 = vadd.f32 %v193_v50, %v182_v48 }
 0x233   :  { %v198_v52 = vmax.f32 %v196_v51, 0.0 }
 0x235   :  { %200 = vst [vmem:[%s350_s5 + $0x8] sm:$0xff] %v198_v52 }

// kernel: aae_forward.16
= control target key start
LH: loop header
LB: loop body
LE: loop exit
PB: predicated region body
PF: predicated region fallthrough
CT: control target
= control target key end

     0   :  { %v344_v1 = vmov 0   ;;  %vm214_vm0 = vcmask 261120   ;;  %s459_s0 = inlined_call_operand.vmem [shape: bf16[256,32], index: 0, kind: input, shape index: {}]   ;;  %s460_s1 = inlined_call_operand.vmem [shape: bf16[16,256], index: 1, kind: input, shape index: {}]   ;;  %s461_s2 = inlined_call_operand.vmem [shape: f32[16,1], index: 2, kind: input, shape index: {}]   ;;  %s462_s3 = inlined_call_operand.vmem [shape: f32[16,1], index: 3, kind: input, shape index: {}]   ;;  %s463_s4 = inlined_call_operand.vmem [shape: f32[16,1], index: 4, kind: input, shape index: {}]   ;;  %s464_s5 = inlined_call_operand.vmem [shape: f32[16,32], index: 5, kind: output, shape index: {}]  }
   0x1   :  { %v321_v0 = vld [vmem:[%s459_s0 + $0x40] sm:$0xff]   ;;  %319 = vset.pattern.permute.xlu0 %v344_v1  ;;  %320 = vset.pattern.permute.xlu1 %v344_v1  ;;  %v323_v3 = vld [vmem:[%s459_s0 + $0x48] sm:$0xff]   ;;  %v325_v5 = vld [vmem:[%s459_s0 + $0x50] sm:$0xff]  }
   0x2   :  { %v322_v2 = vld [vmem:[%s459_s0] sm:$0xff]   ;;  %296 = vmatprep.subr.bf16.mxu0 %v321_v0  ;;  %v324_v4 = vld [vmem:[%s459_s0 + $0x8] sm:$0xff]   ;;  %v326_v6 = vld [vmem:[%s459_s0 + $0x10] sm:$0xff]  }
   0x3   :  { %297 = vmatpush3.bf16.msra.mxu0 %v322_v2  ;;  %v327_v7 = vld [vmem:[%s459_s0 + $0x58] sm:$0xff]   ;;  %v329_v9 = vld [vmem:[%s459_s0 + $0x60] sm:$0xff]   ;;  %v331_v11 = vld [vmem:[%s459_s0 + $0x68] sm:$0xff]  }
   0x4   :  { %298 = vmatprep.subr.bf16.mxu0 %v323_v3  ;;  %v328_v8 = vld [vmem:[%s459_s0 + $0x18] sm:$0xff]   ;;  %v330_v10 = vld [vmem:[%s459_s0 + $0x20] sm:$0xff]   ;;  %v332_v14 = vld [vmem:[%s459_s0 + $0x28] sm:$0xff]  }
   0x5   :  { %v339_v12 = vld [vmem:[%s460_s1 + $0x4] ss:$8 sps:$4 sm:$0xff]   ;;  %v333_v16 = vld [vmem:[%s459_s0 + $0x70] sm:$0xff]   ;;  %v335_v18 = vld [vmem:[%s459_s0 + $0x78] sm:$0xff]  }
   0x6   :  { %v55_v13 = vld [vmem:[%s461_s2] sm:$0xff]  ;;  %205 = vmatprep.mubr.bf16.mxu0 %v339_v12  ;;  %v56_v15 = vld [vmem:[%s461_s2 + $0x8] sm:$0xff]  ;;  %v334_v17 = vld [vmem:[%s459_s0 + $0x30] sm:$0xff]  }
   0x7   :  { %299 = vmatpush3.bf16.msra.mxu0 %v324_v4  ;;  %59 = vperm.xlu0 %319, %v55_v13   ;;  %v336_v19 = vld [vmem:[%s459_s0 + $0x38] sm:$0xff]   ;;  %v337_v20 = vld [vmem:[%s460_s1] ss:$8 sps:$4 sm:$0xff]  }
   0x8   :  { %300 = vmatprep.subr.bf16.mxu0 %v325_v5  ;;  %v242_v33 = vld [vmem:[%s462_s3] sm:$0xff]  ;;  %v243_v34 = vld [vmem:[%s462_s3 + $0x8] sm:$0xff] }
   0x9   :  { %v256_v35 = vld [vmem:[%s463_s4] sm:$0xff]  ;;  %v257_v46 = vld [vmem:[%s463_s4 + $0x8] sm:$0xff] }
   0xb   :  { %301 = vmatpush3.bf16.msra.mxu0 %v326_v6  ;;  %64 = vperm.xlu0 %319, %v56_v15  }
   0xc   :  { %302 = vmatprep.subr.bf16.mxu0 %v327_v7 }
   0xf   :  { %303 = vmatpush3.bf16.msra.mxu0 %v328_v8 }
  0x10   :  { %304 = vmatprep.subr.bf16.mxu0 %v329_v9 }
  0x13   :  { %305 = vmatpush3.bf16.msra.mxu0 %v330_v10 }
  0x14   :  { %306 = vmatprep.subr.bf16.mxu0 %v331_v11 }
  0x17   :  { %307 = vmatpush3.bf16.msra.mxu0 %v332_v14 }
  0x18   :  { %308 = vmatprep.subr.bf16.mxu0 %v333_v16 }
  0x1b   :  { %309 = vmatpush3.bf16.msra.mxu0 %v334_v17 }
  0x1c   :  { %310 = vmatprep.subr.bf16.mxu0 %v335_v18 }
  0x1f   :  { %311 = vmatpush3.bf16.msra.mxu0 %v336_v19 }
  0x22   :  { %206 = vmatmul.mubr.bf16.vlgmr.msra.gmra.mrb[0].mxu0 %v337_v20 }
  0x86   :  { %v60_v21 = vpop.permute.xlu0 %59 }
  0x8a   :  { %v65_v29 = vpop.permute.xlu0 %64 }
  0xf5   :  { %v312_v22 = vpop.f32.mrb[0].mxu0 }
  0xf6   :  { %v313_v23 = vpop.f32.mrb[1].mxu0 }
  0xf7   :  { %v314_v24 = vadd.f32 %v313_v23, %v312_v22  ;;  %v315_v25 = vpop.f32.mrb[2].mxu0 }
  0xf8   :  { %v316_v26 = vpop.f32.mrb[3].mxu0 }
  0xf9   :  { %v317_v27 = vadd.f32 %v316_v26, %v315_v25  ;;  %v208_v28 = vadd.f32 %v314_v24, %v60_v21 }
  0xfb   :  { %v215_v30 = vsel %vm214_vm0, %v208_v28, 0.0  ;;  %v211_v31 = vadd.f32 %v317_v27, %v65_v29 }
  0xfc   :  { %216 = vadd.xlane.f32.xlu1 %v215_v30 }
  0xfd   :  { %v218_v32 = vsel %vm214_vm0, %v211_v31, 0.0 }
 0x100   :  { %219 = vadd.xlane.f32.xlu1 %v218_v32 }
 0x111   :  { %246 = vperm.xlu1 %320, %v242_v33  }
 0x115   :  { %251 = vperm.xlu1 %320, %v243_v34  }
 0x119   :  { %260 = vperm.xlu1 %320, %v256_v35  }
 0x189   :  { %v217_v36 = vpop.xlane.xlu1 %216 }
 0x18a   :  { %v222_v37 = vmul.f32 0.03125, %v217_v36 }
 0x18c   :  { %v224_v38 = vsub.f32 %v208_v28, %v222_v37 }
 0x18d   :  { %v220_v39 = vpop.xlane.xlu1 %219 }
 0x18e   :  { %v223_v40 = vmul.f32 0.03125, %v220_v39  ;;  %v226_v41 = vmul.f32 %v224_v38, %v224_v38 }
 0x190   :  { %v225_v42 = vsub.f32 %v211_v31, %v223_v40  ;;  %v228_v43 = vsel %vm214_vm0, %v226_v41, 0.0 }
 0x191   :  { %229 = vadd.xlane.f32.xlu0 %v228_v43  ;;  %v247_v47 = vpop.permute.xlu1 %246 }
 0x192   :  { %v227_v44 = vmul.f32 %v225_v42, %v225_v42 }
 0x194   :  { %v231_v45 = vsel %vm214_vm0, %v227_v44, 0.0 }
 0x195   :  { %232 = vadd.xlane.f32.xlu1 %v231_v45  ;;  %v252_v48 = vpop.permute.xlu1 %251 }
 0x199   :  { %v261_v49 = vpop.permute.xlu1 %260 }
 0x1a6   :  { %265 = vperm.xlu1 %320, %v257_v46  }
 0x21e   :  { %v230_v50 = vpop.xlane.xlu0 %229 }
 0x21f   :  { %v234_v51 = vmul.f32 0.03125, %v230_v50 }
 0x221   :  { %v236_v52 = vadd.f32 1e-05, %v234_v51 }
 0x222   :  { %v233_v53 = vpop.xlane.xlu1 %232 }
 0x223   :  { %340 = vrsqrt.f32 %v236_v52  ;;  %v235_v54 = vmul.f32 0.03125, %v233_v53 }
 0x225   :  { %v237_v55 = vadd.f32 1e-05, %v235_v54 }
 0x226   :  { %v266_v0 = vpop.permute.xlu1 %265 }
 0x227   :  { %342 = vrsqrt.f32 %v237_v55 }
 0x22d   :  { %v341_v56 = vpop.eup %340 }
 0x22e   :  { %v240_v57 = vmul.f32 %v341_v56, %v224_v38 }
 0x230   :  { %v254_v58 = vmul.f32 %v247_v47, %v240_v57 }
 0x231   :  { %v343_v59 = vpop.eup %342 }
 0x232   :  { %v241_v60 = vmul.f32 %v343_v59, %v225_v42  ;;  %v268_v61 = vadd.f32 %v261_v49, %v254_v58 }
 0x234   :  { %v255_v62 = vmul.f32 %v252_v48, %v241_v60  ;;  %v270_v63 = vmax.f32 %v268_v61, 0.0 }
 0x236   :  { %272 = vst.msk [vmem:[%s464_s5] sm:$0xff] %vm214_vm0, %v270_v63  ;;  %v269_v1 = vadd.f32 %v266_v0, %v255_v62 }
 0x238   :  { %v271_v2 = vmax.f32 %v269_v1, 0.0 }
 0x23a   :  { %273 = vst.msk [vmem:[%s464_s5 + $0x8] sm:$0xff] %vm214_vm0, %v271_v2 }

// kernel: aae_forward.17
= control target key start
LH: loop header
LB: loop body
LE: loop exit
PB: predicated region body
PF: predicated region fallthrough
CT: control target
= control target key end

     0   :  { %v254_v0 = vmov 0   ;;  %vm116_vm0 = vcmask 130048   ;;  %vm161_vm1 = vcmask 261120   ;;  %s348_s0 = inlined_call_operand.vmem [shape: bf16[144,32], index: 0, kind: input, shape index: {}]   ;;  %s349_s1 = inlined_call_operand.vmem [shape: bf16[16,144], index: 1, kind: input, shape index: {}]   ;;  %s350_s2 = inlined_call_operand.vmem [shape: f32[16,1], index: 2, kind: input, shape index: {}]   ;;  %s351_s3 = inlined_call_operand.vmem [shape: f32[16,1], index: 3, kind: input, shape index: {}]   ;;  %s352_s4 = inlined_call_operand.vmem [shape: f32[16,1], index: 4, kind: input, shape index: {}]   ;;  %s353_s5 = inlined_call_operand.vmem [shape: f32[16,32], index: 5, kind: output, shape index: {}]  }
   0x1   :  { %120 = vmatprep.subr.bf16.mxu0 %v254_v0  ;;  %v238_v1 = vld [vmem:[%s348_s0] sm:$0xff]   ;;  %236 = vset.pattern.permute.xlu0 %v254_v0  ;;  %v239_v2 = vld [vmem:[%s348_s0 + $0x8] sm:$0xff]   ;;  %v240_v3 = vld [vmem:[%s348_s0 + $0x10] sm:$0xff]  }
   0x2   :  { %237 = vset.pattern.permute.xlu1 %v254_v0  ;;  %121 = vmatpush1.bf16.msra.mxu0 %v238_v1  ;;  %v241_v4 = vld [vmem:[%s348_s0 + $0x18] sm:$0xff]   ;;  %v249_v5 = vld [vmem:[%s349_s1 + $0x4] ss:$8 sps:$4 sm:$0xff]   ;;  %v244_v10 = vld [vmem:[%s348_s0 + $0x30] sm:$0xff]  }
   0x3   :  { %122 = vmatprep.subr.bf16.mxu0 %v254_v0  ;;  %v41_v6 = vld [vmem:[%s350_s2] sm:$0xff]  ;;  %234 = vmatprep.mubr.msk.bf16.mxu0 %vm116_vm0, %v249_v5  ;;  %v42_v7 = vld [vmem:[%s350_s2 + $0x8] sm:$0xff]  ;;  %v245_v11 = vld [vmem:[%s348_s0 + $0x38] sm:$0xff]  }
   0x4   :  { %45 = vperm.xlu0 %236, %v41_v6   ;;  %v242_v8 = vld [vmem:[%s348_s0 + $0x20] sm:$0xff]   ;;  %v243_v9 = vld [vmem:[%s348_s0 + $0x28] sm:$0xff]  }
   0x5   :  { %v246_v12 = vld [vmem:[%s348_s0 + $0x40] sm:$0xff]   ;;  %v190_v25 = vld [vmem:[%s351_s3 + $0x8] sm:$0xff] }
   0x6   :  { %123 = vmatpush1.bf16.msra.mxu0 %v239_v2  ;;  %v247_v13 = vld [vmem:[%s349_s1] ss:$8 sps:$4 sm:$0xff]  }
   0x7   :  { %124 = vmatprep.subr.bf16.mxu0 %v254_v0  ;;  %v189_v24 = vld [vmem:[%s351_s3] sm:$0xff]  ;;  %v204_v37 = vld [vmem:[%s352_s4 + $0x8] sm:$0xff] }
   0x8   :  { %50 = vperm.xlu0 %236, %v42_v7   ;;  %v203_v26 = vld [vmem:[%s352_s4] sm:$0xff] }
   0xa   :  { %125 = vmatpush1.bf16.msra.mxu0 %v240_v3 }
   0xb   :  { %126 = vmatprep.subr.bf16.mxu0 %v254_v0 }
   0xe   :  { %127 = vmatpush1.bf16.msra.mxu0 %v241_v4 }
   0xf   :  { %128 = vmatprep.subr.bf16.mxu0 %v254_v0 }
  0x12   :  { %129 = vmatpush1.bf16.msra.mxu0 %v242_v8 }
  0x13   :  { %130 = vmatprep.subr.bf16.mxu0 %v254_v0 }
  0x16   :  { %131 = vmatpush1.bf16.msra.mxu0 %v243_v9 }
  0x17   :  { %132 = vmatprep.subr.bf16.mxu0 %v254_v0 }
  0x1a   :  { %133 = vmatpush1.bf16.msra.mxu0 %v244_v10 }
  0x1b   :  { %134 = vmatprep.subr.bf16.mxu0 %v254_v0 }
  0x1e   :  { %135 = vmatpush1.bf16.msra.mxu0 %v245_v11 }
  0x1f   :  { %136 = vmatprep.subr.bf16.mxu0 %v254_v0 }
  0x22   :  { %137 = vmatpush1.bf16.msra.mxu0 %v246_v12 }
  0x25   :  { %153 = vmatmul.mubr.bf16.vlgmr.msra.gmra.mrb[0].mxu0 %v247_v13 }
  0x83   :  { %v46_v14 = vpop.permute.xlu0 %45 }
  0x87   :  { %v51_v18 = vpop.permute.xlu0 %50 }
  0xf8   :  { %v154_v15 = vpop.f32.mrb[0].mxu0 }
  0xf9   :  { %v155_v16 = vadd.f32 %v154_v15, %v46_v14  ;;  %v156_v17 = vpop.f32.mrb[1].mxu0 }
  0xfa   :  { %v157_v19 = vpop.f32.mrb[2].mxu0 }
  0xfb   :  { %v158_v20 = vadd.f32 %v157_v19, %v51_v18  ;;  %v159_v21 = vpop.f32.mrb[3].mxu0  ;;  %v162_v22 = vsel %vm161_vm1, %v155_v16, 0.0 }
  0xfc   :  { %163 = vadd.xlane.f32.xlu1 %v162_v22 }
  0xfd   :  { %v165_v23 = vsel %vm161_vm1, %v158_v20, 0.0 }
 0x100   :  { %166 = vadd.xlane.f32.xlu1 %v165_v23 }
 0x111   :  { %193 = vperm.xlu1 %237, %v189_v24  }
 0x115   :  { %198 = vperm.xlu1 %237, %v190_v25  }
 0x119   :  { %207 = vperm.xlu1 %237, %v203_v26  }
 0x189   :  { %v164_v27 = vpop.xlane.xlu1 %163 }
 0x18a   :  { %v169_v28 = vmul.f32 0.03125, %v164_v27 }
 0x18c   :  { %v171_v29 = vsub.f32 %v155_v16, %v169_v28 }
 0x18d   :  { %v167_v30 = vpop.xlane.xlu1 %166 }
 0x18e   :  { %v170_v31 = vmul.f32 0.03125, %v167_v30  ;;  %v173_v32 = vmul.f32 %v171_v29, %v171_v29 }
 0x190   :  { %v172_v33 = vsub.f32 %v158_v20, %v170_v31  ;;  %v175_v34 = vsel %vm161_vm1, %v173_v32, 0.0 }
 0x191   :  { %176 = vadd.xlane.f32.xlu0 %v175_v34  ;;  %v194_v38 = vpop.permute.xlu1 %193 }
 0x192   :  { %v174_v35 = vmul.f32 %v172_v33, %v172_v33 }
 0x194   :  { %v178_v36 = vsel %vm161_vm1, %v174_v35, 0.0 }
 0x195   :  { %179 = vadd.xlane.f32.xlu1 %v178_v36  ;;  %v199_v39 = vpop.permute.xlu1 %198 }
 0x199   :  { %v208_v40 = vpop.permute.xlu1 %207 }
 0x1a6   :  { %212 = vperm.xlu1 %237, %v204_v37  }
 0x21e   :  { %v177_v41 = vpop.xlane.xlu0 %176 }
 0x21f   :  { %v181_v42 = vmul.f32 0.03125, %v177_v41 }
 0x221   :  { %v183_v43 = vadd.f32 1e-05, %v181_v42 }
 0x222   :  { %v180_v44 = vpop.xlane.xlu1 %179 }
 0x223   :  { %250 = vrsqrt.f32 %v183_v43  ;;  %v182_v45 = vmul.f32 0.03125, %v180_v44 }
 0x225   :  { %v184_v46 = vadd.f32 1e-05, %v182_v45 }
 0x226   :  { %v213_v54 = vpop.permute.xlu1 %212 }
 0x227   :  { %252 = vrsqrt.f32 %v184_v46 }
 0x22d   :  { %v251_v47 = vpop.eup %250 }
 0x22e   :  { %v187_v48 = vmul.f32 %v251_v47, %v171_v29 }
 0x230   :  { %v201_v49 = vmul.f32 %v194_v38, %v187_v48 }
 0x231   :  { %v253_v50 = vpop.eup %252 }
 0x232   :  { %v188_v51 = vmul.f32 %v253_v50, %v172_v33  ;;  %v215_v52 = vadd.f32 %v208_v40, %v201_v49 }
 0x234   :  { %v202_v53 = vmul.f32 %v199_v39, %v188_v51  ;;  %217 = vst.msk [vmem:[%s353_s5] sm:$0xff] %vm161_vm1, %v215_v52 }
 0x236   :  { %v216_v55 = vadd.f32 %v213_v54, %v202_v53 }
 0x238   :  { %218 = vst.msk [vmem:[%s353_s5 + $0x8] sm:$0xff] %vm161_vm1, %v216_v55 }

// kernel: aae_forward.19
= control target key start
LH: loop header
LB: loop body
LE: loop exit
PB: predicated region body
PF: predicated region fallthrough
CT: control target
= control target key end

     0   :  { %v196_v0 = vmov 0.0   ;;  %vm197_vm0 = vmmov 0   ;;  %v198_v2 = vmov 0   ;;  %vm59_vm1 = vcmask 261120   ;;  %s280_s0 = inlined_call_operand.vmem [shape: bf16[32,32], index: 0, kind: input, shape index: {}]   ;;  %s281_s2 = inlined_call_operand.vmem [shape: f32[16,1], index: 2, kind: input, shape index: {}]   ;;  %s282_s1 = inlined_call_operand.vmem [shape: bf16[16,32], index: 1, kind: input, shape index: {}]   ;;  %s283_s3 = inlined_call_operand.vmem [shape: f32[16,1], index: 3, kind: input, shape index: {}]   ;;  %s284_s4 = inlined_call_operand.vmem [shape: f32[16,1], index: 4, kind: input, shape index: {}]   ;;  %s285_s5 = inlined_call_operand.vmem [shape: f32[16,32], index: 5, kind: input, shape index: {}]   ;;  %s286_s6 = inlined_call_operand.vmem [shape: f32[16,32], index: 6, kind: output, shape index: {}]  }
   0x1   :  { %176 = vmatprep.subr.bf16.mxu0 %v196_v0  ;;  %v189_v1 = vld [vmem:[%s280_s0] sm:$0xff]   ;;  %180 = vmatprep.mubr.msk.bf16.mxu0 %vm197_vm0, %v196_v0  ;;  %v190_v3 = vld [vmem:[%s280_s0 + $0x8] sm:$0xff]  }
   0x2   :  { %187 = vset.pattern.permute.xlu0 %v198_v2  ;;  %188 = vset.pattern.permute.xlu1 %v198_v2  ;;  %v30_v4 = vld [vmem:[%s281_s2] sm:$0xff]  ;;  %v31_v6 = vld [vmem:[%s281_s2 + $0x8] sm:$0xff] }
   0x3   :  { %177 = vmatpush3.bf16.msra.mxu0 %v189_v1  ;;  %34 = vperm.xlu0 %187, %v30_v4   ;;  %v191_v5 = vld [vmem:[%s282_s1] sm:$0xff]   ;;  %v132_v18 = vld [vmem:[%s283_s3 + $0x8] sm:$0xff] }
   0x4   :  { %178 = vmatprep.subr.bf16.mxu0 %v196_v0  ;;  %v131_v17 = vld [vmem:[%s283_s3] sm:$0xff]  ;;  %v146_v30 = vld [vmem:[%s284_s4 + $0x8] sm:$0xff] }
   0x5   :  { %v145_v19 = vld [vmem:[%s284_s4] sm:$0xff]  ;;  %v160_v49 = vld [vmem:[%s285_s5 + $0x8] sm:$0xff] }
   0x6   :  { %v159_v44 = vld [vmem:[%s285_s5] sm:$0xff] }
   0x7   :  { %179 = vmatpush3.bf16.msra.mxu0 %v190_v3  ;;  %39 = vperm.xlu0 %187, %v31_v6  }
   0xa   :  { %181 = vmatmul.mubr.msk.bf16.vlgmr.msra.gmra.mrb[0].mxu0 %vm59_vm1, %v191_v5 }
  0x82   :  { %v35_v7 = vpop.permute.xlu0 %34 }
  0x86   :  { %v40_v11 = vpop.permute.xlu0 %39 }
  0xdd   :  { %v97_v8 = vpop.f32.mrb[0].mxu0 }
  0xde   :  { %v98_v9 = vadd.f32 %v97_v8, %v35_v7  ;;  %v182_v10 = vpop.f32.mrb[1].mxu0 }
  0xdf   :  { %v100_v12 = vpop.f32.mrb[2].mxu0 }
  0xe0   :  { %v101_v13 = vadd.f32 %v100_v12, %v40_v11  ;;  %v183_v14 = vpop.f32.mrb[3].mxu0  ;;  %v104_v15 = vsel %vm59_vm1, %v98_v9, 0.0 }
  0xe1   :  { %105 = vadd.xlane.f32.xlu1 %v104_v15 }
  0xe2   :  { %v107_v16 = vsel %vm59_vm1, %v101_v13, 0.0 }
  0xe5   :  { %108 = vadd.xlane.f32.xlu1 %v107_v16 }
  0xf6   :  { %135 = vperm.xlu1 %188, %v131_v17  }
  0xfa   :  { %140 = vperm.xlu1 %188, %v132_v18  }
  0xfe   :  { %149 = vperm.xlu1 %188, %v145_v19  }
 0x16e   :  { %v106_v20 = vpop.xlane.xlu1 %105 }
 0x16f   :  { %v111_v21 = vmul.f32 0.03125, %v106_v20 }
 0x171   :  { %v113_v22 = vsub.f32 %v98_v9, %v111_v21 }
 0x172   :  { %v109_v23 = vpop.xlane.xlu1 %108 }
 0x173   :  { %v112_v24 = vmul.f32 0.03125, %v109_v23  ;;  %v115_v25 = vmul.f32 %v113_v22, %v113_v22 }
 0x175   :  { %v114_v26 = vsub.f32 %v101_v13, %v112_v24  ;;  %v117_v27 = vsel %vm59_vm1, %v115_v25, 0.0 }
 0x176   :  { %118 = vadd.xlane.f32.xlu0 %v117_v27  ;;  %v136_v31 = vpop.permute.xlu1 %135 }
 0x177   :  { %v116_v28 = vmul.f32 %v114_v26, %v114_v26 }
 0x179   :  { %v120_v29 = vsel %vm59_vm1, %v116_v28, 0.0 }
 0x17a   :  { %121 = vadd.xlane.f32.xlu1 %v120_v29  ;;  %v141_v32 = vpop.permute.xlu1 %140 }
 0x17e   :  { %v150_v33 = vpop.permute.xlu1 %149 }
 0x18b   :  { %154 = vperm.xlu1 %188, %v146_v30  }
 0x203   :  { %v119_v34 = vpop.xlane.xlu0 %118 }
 0x204   :  { %v123_v35 = vmul.f32 0.03125, %v119_v34 }
 0x206   :  { %v125_v36 = vadd.f32 1e-05, %v123_v35 }
 0x207   :  { %v122_v37 = vpop.xlane.xlu1 %121 }
 0x208   :  { %192 = vrsqrt.f32 %v125_v36  ;;  %v124_v38 = vmul.f32 0.03125, %v122_v37 }
 0x20a   :  { %v126_v39 = vadd.f32 1e-05, %v124_v38 }
 0x20b   :  { %v155_v50 = vpop.permute.xlu1 %154 }
 0x20c   :  { %194 = vrsqrt.f32 %v126_v39 }
 0x212   :  { %v193_v40 = vpop.eup %192 }
 0x213   :  { %v129_v41 = vmul.f32 %v193_v40, %v113_v22 }
 0x215   :  { %v143_v42 = vmul.f32 %v136_v31, %v129_v41 }
 0x216   :  { %v195_v43 = vpop.eup %194 }
 0x217   :  { %v130_v45 = vmul.f32 %v195_v43, %v114_v26  ;;  %v157_v46 = vadd.f32 %v150_v33, %v143_v42 }
 0x219   :  { %v144_v47 = vmul.f32 %v141_v32, %v130_v45  ;;  %v161_v48 = vadd.f32 %v159_v44, %v157_v46 }
 0x21b   :  { %163 = vst.msk [vmem:[%s286_s6] sm:$0xff] %vm59_vm1, %v161_v48  ;;  %v158_v51 = vadd.f32 %v155_v50, %v144_v47 }
 0x21d   :  { %v162_v52 = vadd.f32 %v160_v49, %v158_v51 }
 0x21f   :  { %164 = vst.msk [vmem:[%s286_s6 + $0x8] sm:$0xff] %vm59_vm1, %v162_v52 }

// kernel: aae_forward.18
= control target key start
LH: loop header
LB: loop body
LE: loop exit
PB: predicated region body
PF: predicated region fallthrough
CT: control target
= control target key end

     0   :  { %v385_v0 = vmov 0   ;;  %vm157_vm0 = vcmask 130048   ;;  %vm213_vm1 = vcmask 261120   ;;  %s580_s0 = inlined_call_operand.vmem [shape: bf16[144,32], index: 0, kind: input, shape index: {}]   ;;  %s581_s1 = inlined_call_operand.vmem [shape: bf16[32,144], index: 1, kind: input, shape index: {}]   ;;  %s582_s2 = inlined_call_operand.vmem [shape: f32[32,1], index: 2, kind: input, shape index: {}]   ;;  %s583_s3 = inlined_call_operand.vmem [shape: f32[32,1], index: 3, kind: input, shape index: {}]   ;;  %s584_s4 = inlined_call_operand.vmem [shape: f32[32,1], index: 4, kind: input, shape index: {}]   ;;  %s585_s5 = inlined_call_operand.vmem [shape: f32[32,32], index: 5, kind: output, shape index: {}]  }
   0x1   :  { %164 = vmatprep.subr.bf16.mxu0 %v385_v0  ;;  %350 = vmatprep.subr.bf16.mxu1 %v385_v0  ;;  %v21_v1 = vld [vmem:[%s580_s0] sm:$0xf]  ;;  %v22_v2 = vld [vmem:[%s580_s0 + $0x4] sm:$0xf]  ;;  %v23_v3 = vld [vmem:[%s580_s0 + $0x8] sm:$0xf] }
   0x2   :  { %v39_v4 = vmax.bf16 %v385_v0, %v21_v1  ;;  %v40_v5 = vmax.bf16 %v385_v0, %v22_v2  ;;  %v24_v6 = vld [vmem:[%s580_s0 + $0xc] sm:$0xf]  ;;  %v41_v7 = vmax.bf16 %v385_v0, %v23_v3  ;;  %369 = vset.pattern.permute.xlu0 %v385_v0  ;;  %370 = vset.pattern.permute.xlu1 %v385_v0  ;;  %v25_v9 = vld [vmem:[%s580_s0 + $0x10] sm:$0xf]  ;;  %v26_v10 = vld [vmem:[%s580_s0 + $0x14] sm:$0xf] }
   0x3   :  { %v42_v8 = vmax.bf16 %v385_v0, %v24_v6  ;;  %v43_v13 = vmax.bf16 %v385_v0, %v25_v9  ;;  %v44_v14 = vmax.bf16 %v385_v0, %v26_v10  ;;  %v27_v15 = vld [vmem:[%s580_s0 + $0x18] sm:$0xf]  ;;  %v28_v16 = vld [vmem:[%s580_s0 + $0x1c] sm:$0xf]  ;;  %v373_v17 = vld [vmem:[%s581_s1 + $0x4] ss:$8 sps:$4 sm:$0xff]  }
   0x4   :  { %v339_v11 = vcombine.low %v39_v4, %v40_v5  ;;  %v376_v18 = vld [vmem:[%s581_s1 + $0x14] ss:$8 sps:$4 sm:$0xff]   ;;  %v45_v20 = vmax.bf16 %v385_v0, %v27_v15  ;;  %v46_v21 = vmax.bf16 %v385_v0, %v28_v16  ;;  %v61_v22 = vld [vmem:[%s582_s2] sm:$0xff]  ;;  %348 = vmatprep.mubr.msk.bf16.mxu0 %vm157_vm0, %v373_v17  ;;  %v62_v29 = vld [vmem:[%s582_s2 + $0x8] sm:$0xff] }
   0x5   :  { %v340_v12 = vcombine.low %v41_v7, %v42_v8  ;;  %v341_v19 = vcombine.low %v43_v13, %v44_v14  ;;  %v63_v23 = vld [vmem:[%s582_s2 + $0x10] sm:$0xff]  ;;  %v29_v24 = vld [vmem:[%s580_s0 + $0x20] sm:$0xf]  ;;  %v30_v25 = vld [vmem:[%s580_s0 + $0x24] sm:$0xf]  ;;  %349 = vmatprep.mubr.msk.bf16.mxu1 %vm157_vm0, %v376_v18  ;;  %67 = vperm.xlu0 %369, %v61_v22  }
   0x6   :  { %165 = vmatpush1.bf16.msra.mxu0 %v339_v11  ;;  %359 = vmatpush1.bf16.msra.mxu1 %v339_v11  ;;  %v342_v26 = vcombine.low %v45_v20, %v46_v21  ;;  %v47_v27 = vmax.bf16 %v385_v0, %v29_v24  ;;  %v48_v28 = vmax.bf16 %v385_v0, %v30_v25  ;;  %v64_v30 = vld [vmem:[%s582_s2 + $0x18] sm:$0xff]  ;;  %v31_v31 = vld [vmem:[%s580_s0 + $0x28] sm:$0xf]  ;;  %v32_v32 = vld [vmem:[%s580_s0 + $0x2c] sm:$0xf] }
   0x7   :  { %166 = vmatprep.subr.bf16.mxu0 %v385_v0  ;;  %351 = vmatprep.subr.bf16.mxu1 %v385_v0  ;;  %v49_v34 = vmax.bf16 %v385_v0, %v31_v31  ;;  %v50_v35 = vmax.bf16 %v385_v0, %v32_v32  ;;  %v33_v36 = vld [vmem:[%s580_s0 + $0x30] sm:$0xf]  ;;  %v34_v37 = vld [vmem:[%s580_s0 + $0x34] sm:$0xf]  ;;  %v35_v41 = vld [vmem:[%s580_s0 + $0x38] sm:$0xf] }
   0x8   :  { %77 = vperm.xlu1 %370, %v63_v23   ;;  %v343_v33 = vcombine.low %v47_v27, %v48_v28  ;;  %v51_v39 = vmax.bf16 %v385_v0, %v33_v36  ;;  %v52_v40 = vmax.bf16 %v385_v0, %v34_v37  ;;  %v36_v42 = vld [vmem:[%s580_s0 + $0x3c] sm:$0xf]  ;;  %v53_v44 = vmax.bf16 %v385_v0, %v35_v41  ;;  %v37_v46 = vld [vmem:[%s580_s0 + $0x40] sm:$0xf]  ;;  %v38_v47 = vld [vmem:[%s580_s0 + $0x44] sm:$0xf] }
   0x9   :  { %72 = vperm.xlu0 %369, %v62_v29   ;;  %v344_v38 = vcombine.low %v49_v34, %v50_v35  ;;  %v54_v45 = vmax.bf16 %v385_v0, %v36_v42  ;;  %v55_v49 = vmax.bf16 %v385_v0, %v37_v46  ;;  %v56_v50 = vmax.bf16 %v385_v0, %v38_v47  ;;  %v371_v52 = vld [vmem:[%s581_s1] ss:$8 sps:$4 sm:$0xff]   ;;  %v374_v53 = vld [vmem:[%s581_s1 + $0x10] ss:$8 sps:$4 sm:$0xff]  }
   0xa   :  { %167 = vmatpush1.bf16.msra.mxu0 %v340_v12  ;;  %360 = vmatpush1.bf16.msra.mxu1 %v340_v12  ;;  %v345_v43 = vcombine.low %v51_v39, %v52_v40  ;;  %v267_v10 = vld [vmem:[%s583_s3] sm:$0xff]  ;;  %v269_v11 = vld [vmem:[%s583_s3 + $0x10] sm:$0xff]  ;;  %v270_v12 = vld [vmem:[%s583_s3 + $0x18] sm:$0xff] }
   0xb   :  { %168 = vmatprep.subr.bf16.mxu0 %v385_v0  ;;  %352 = vmatprep.subr.bf16.mxu1 %v385_v0  ;;  %v346_v48 = vcombine.low %v53_v44, %v54_v45  ;;  %v347_v51 = vcombine.low %v55_v49, %v56_v50  ;;  %v268_v13 = vld [vmem:[%s583_s3 + $0x8] sm:$0xff]  ;;  %v295_v15 = vld [vmem:[%s584_s4] sm:$0xff]  ;;  %v298_v36 = vld [vmem:[%s584_s4 + $0x18] sm:$0xff] }
   0xc   :  { %82 = vperm.xlu1 %370, %v64_v30   ;;  %v296_v14 = vld [vmem:[%s584_s4 + $0x8] sm:$0xff]  ;;  %v297_v37 = vld [vmem:[%s584_s4 + $0x10] sm:$0xff] }
   0xe   :  { %169 = vmatpush1.bf16.msra.mxu0 %v341_v19  ;;  %361 = vmatpush1.bf16.msra.mxu1 %v341_v19 }
   0xf   :  { %170 = vmatprep.subr.bf16.mxu0 %v385_v0  ;;  %353 = vmatprep.subr.bf16.mxu1 %v385_v0 }
  0x12   :  { %171 = vmatpush1.bf16.msra.mxu0 %v342_v26  ;;  %362 = vmatpush1.bf16.msra.mxu1 %v342_v26 }
  0x13   :  { %172 = vmatprep.subr.bf16.mxu0 %v385_v0  ;;  %354 = vmatprep.subr.bf16.mxu1 %v385_v0 }
  0x16   :  { %173 = vmatpush1.bf16.msra.mxu0 %v343_v33  ;;  %363 = vmatpush1.bf16.msra.mxu1 %v343_v33 }
  0x17   :  { %174 = vmatprep.subr.bf16.mxu0 %v385_v0  ;;  %355 = vmatprep.subr.bf16.mxu1 %v385_v0 }
  0x1a   :  { %175 = vmatpush1.bf16.msra.mxu0 %v344_v38  ;;  %364 = vmatpush1.bf16.msra.mxu1 %v344_v38 }
  0x1b   :  { %176 = vmatprep.subr.bf16.mxu0 %v385_v0  ;;  %356 = vmatprep.subr.bf16.mxu1 %v385_v0 }
  0x1e   :  { %177 = vmatpush1.bf16.msra.mxu0 %v345_v43  ;;  %365 = vmatpush1.bf16.msra.mxu1 %v345_v43 }
  0x1f   :  { %178 = vmatprep.subr.bf16.mxu0 %v385_v0  ;;  %357 = vmatprep.subr.bf16.mxu1 %v385_v0 }
  0x22   :  { %179 = vmatpush1.bf16.msra.mxu0 %v346_v48  ;;  %366 = vmatpush1.bf16.msra.mxu1 %v346_v48 }
  0x23   :  { %180 = vmatprep.subr.bf16.mxu0 %v385_v0  ;;  %358 = vmatprep.subr.bf16.mxu1 %v385_v0 }
  0x26   :  { %181 = vmatpush1.bf16.msra.mxu0 %v347_v51  ;;  %367 = vmatpush1.bf16.msra.mxu1 %v347_v51 }
  0x29   :  { %197 = vmatmul.mubr.bf16.vlgmr.msra.gmra.mrb[0].mxu0 %v371_v52  ;;  %205 = vmatmul.mubr.bf16.vlgmr.msra.gmra.mrb[0].mxu1 %v374_v53 }
  0x84   :  { %v68_v54 = vpop.permute.xlu0 %67 }
  0x87   :  { %v78_v55 = vpop.permute.xlu1 %77 }
  0x88   :  { %v73_v56 = vpop.permute.xlu0 %72 }
  0x8b   :  { %v83_v5 = vpop.permute.xlu1 %82 }
  0xfc   :  { %v198_v57 = vpop.f32.mrb[0].mxu0  ;;  %v206_v58 = vpop.f32.mrb[0].mxu1 }
  0xfd   :  { %v199_v59 = vadd.f32 %v198_v57, %v68_v54  ;;  %v200_v60 = vpop.f32.mrb[1].mxu0  ;;  %v207_v61 = vadd.f32 %v206_v58, %v78_v55  ;;  %v208_v62 = vpop.f32.mrb[1].mxu1 }
  0xfe   :  { %v201_v63 = vpop.f32.mrb[2].mxu0  ;;  %v209_v0 = vpop.f32.mrb[2].mxu1 }
  0xff   :  { %v202_v1 = vadd.f32 %v201_v63, %v73_v56  ;;  %v203_v2 = vpop.f32.mrb[3].mxu0  ;;  %v211_v3 = vpop.f32.mrb[3].mxu1  ;;  %v214_v4 = vsel %vm213_vm1, %v199_v59, 0.0  ;;  %v220_v7 = vsel %vm213_vm1, %v207_v61, 0.0  ;;  %v210_v8 = vadd.f32 %v209_v0, %v83_v5 }
 0x100   :  { %215 = vadd.xlane.f32.xlu0 %v214_v4 }
 0x101   :  { %v217_v6 = vsel %vm213_vm1, %v202_v1, 0.0  ;;  %v223_v9 = vsel %vm213_vm1, %v210_v8, 0.0 }
 0x102   :  { %218 = vadd.xlane.f32.xlu1 %v217_v6 }
 0x104   :  { %221 = vadd.xlane.f32.xlu0 %v220_v7 }
 0x108   :  { %224 = vadd.xlane.f32.xlu0 %v223_v9 }
 0x113   :  { %273 = vperm.xlu1 %370, %v267_v10  }
 0x117   :  { %283 = vperm.xlu1 %370, %v269_v11  }
 0x11b   :  { %288 = vperm.xlu1 %370, %v270_v12  }
 0x11e   :  { %278 = vperm.xlu0 %369, %v268_v13  }
 0x11f   :  { %306 = vperm.xlu1 %370, %v296_v14  }
 0x122   :  { %301 = vperm.xlu0 %369, %v295_v15  }
 0x18d   :  { %v216_v16 = vpop.xlane.xlu0 %215 }
 0x18e   :  { %v227_v17 = vmul.f32 0.03125, %v216_v16 }
 0x18f   :  { %v219_v18 = vpop.xlane.xlu1 %218 }
 0x190   :  { %v231_v19 = vsub.f32 %v199_v59, %v227_v17  ;;  %v228_v20 = vmul.f32 0.03125, %v219_v18 }
 0x191   :  { %v222_v21 = vpop.xlane.xlu0 %221 }
 0x192   :  { %v232_v22 = vsub.f32 %v202_v1, %v228_v20  ;;  %v229_v23 = vmul.f32 0.03125, %v222_v21  ;;  %v235_v24 = vmul.f32 %v231_v19, %v231_v19 }
 0x193   :  { %v274_v38 = vpop.permute.xlu1 %273 }
 0x194   :  { %v233_v25 = vsub.f32 %v207_v61, %v229_v23  ;;  %v239_v26 = vsel %vm213_vm1, %v235_v24, 0.0  ;;  %v236_v27 = vmul.f32 %v232_v22, %v232_v22 }
 0x195   :  { %240 = vadd.xlane.f32.xlu1 %v239_v26  ;;  %v225_v28 = vpop.xlane.xlu0 %224 }
 0x196   :  { %v230_v29 = vmul.f32 0.03125, %v225_v28  ;;  %v242_v30 = vsel %vm213_vm1, %v236_v27, 0.0  ;;  %v237_v31 = vmul.f32 %v233_v25, %v233_v25 }
 0x197   :  { %243 = vadd.xlane.f32.xlu0 %v242_v30  ;;  %v284_v39 = vpop.permute.xlu1 %283 }
 0x198   :  { %v234_v32 = vsub.f32 %v210_v8, %v230_v29  ;;  %v245_v33 = vsel %vm213_vm1, %v237_v31, 0.0 }
 0x199   :  { %246 = vadd.xlane.f32.xlu1 %v245_v33 }
 0x19a   :  { %v238_v34 = vmul.f32 %v234_v32, %v234_v32 }
 0x19b   :  { %v289_v40 = vpop.permute.xlu1 %288 }
 0x19c   :  { %v248_v35 = vsel %vm213_vm1, %v238_v34, 0.0 }
 0x19d   :  { %249 = vadd.xlane.f32.xlu0 %v248_v35  ;;  %v279_v41 = vpop.permute.xlu0 %278 }
 0x19f   :  { %v307_v42 = vpop.permute.xlu1 %306 }
 0x1a1   :  { %v302_v43 = vpop.permute.xlu0 %301 }
 0x1aa   :  { %316 = vperm.xlu1 %370, %v298_v36  }
 0x1b3   :  { %311 = vperm.xlu0 %369, %v297_v37  }
 0x222   :  { %v241_v44 = vpop.xlane.xlu1 %240 }
 0x223   :  { %v251_v45 = vmul.f32 0.03125, %v241_v44 }
 0x224   :  { %v244_v46 = vpop.xlane.xlu0 %243 }
 0x225   :  { %v255_v47 = vadd.f32 1e-05, %v251_v45  ;;  %v252_v48 = vmul.f32 0.03125, %v244_v46 }
 0x226   :  { %v247_v49 = vpop.xlane.xlu1 %246 }
 0x227   :  { %377 = vrsqrt.f32 %v255_v47  ;;  %v256_v50 = vadd.f32 1e-05, %v252_v48  ;;  %v253_v51 = vmul.f32 0.03125, %v247_v49 }
 0x229   :  { %379 = vrsqrt.f32 %v256_v50  ;;  %v257_v52 = vadd.f32 1e-05, %v253_v51 }
 0x22a   :  { %v250_v53 = vpop.xlane.xlu0 %249  ;;  %v317_v11 = vpop.permute.xlu1 %316 }
 0x22b   :  { %381 = vrsqrt.f32 %v257_v52  ;;  %v254_v54 = vmul.f32 0.03125, %v250_v53 }
 0x22d   :  { %v258_v55 = vadd.f32 1e-05, %v254_v54 }
 0x22f   :  { %383 = vrsqrt.f32 %v258_v55 }
 0x231   :  { %v378_v56 = vpop.eup %377 }
 0x232   :  { %v263_v57 = vmul.f32 %v378_v56, %v231_v19  ;;  %v312_v5 = vpop.permute.xlu0 %311 }
 0x233   :  { %v380_v58 = vpop.eup %379 }
 0x234   :  { %v291_v59 = vmul.f32 %v274_v38, %v263_v57  ;;  %v264_v60 = vmul.f32 %v380_v58, %v232_v22 }
 0x235   :  { %v382_v61 = vpop.eup %381 }
 0x236   :  { %v319_v62 = vadd.f32 %v302_v43, %v291_v59  ;;  %v292_v63 = vmul.f32 %v279_v41, %v264_v60  ;;  %v265_v0 = vmul.f32 %v382_v61, %v233_v25 }
 0x238   :  { %v323_v1 = vmax.f32 %v319_v62, 0.0  ;;  %v320_v2 = vadd.f32 %v307_v42, %v292_v63  ;;  %v293_v3 = vmul.f32 %v284_v39, %v265_v0 }
 0x239   :  { %v384_v4 = vpop.eup %383 }
 0x23a   :  { %v324_v6 = vmax.f32 %v320_v2, 0.0  ;;  %v266_v7 = vmul.f32 %v384_v4, %v234_v32  ;;  %327 = vst.msk [vmem:[%s585_s5] sm:$0xff] %vm213_vm1, %v323_v1  ;;  %v321_v8 = vadd.f32 %v312_v5, %v293_v3 }
 0x23c   :  { %v294_v9 = vmul.f32 %v289_v40, %v266_v7  ;;  %328 = vst.msk [vmem:[%s585_s5 + $0x8] sm:$0xff] %vm213_vm1, %v324_v6  ;;  %v325_v10 = vmax.f32 %v321_v8, 0.0 }
 0x23e   :  { %v322_v12 = vadd.f32 %v317_v11, %v294_v9  ;;  %329 = vst.msk [vmem:[%s585_s5 + $0x10] sm:$0xff] %vm213_vm1, %v325_v10 }
 0x240   :  { %v326_v13 = vmax.f32 %v322_v12, 0.0 }
 0x242   :  { %330 = vst.msk [vmem:[%s585_s5 + $0x18] sm:$0xff] %vm213_vm1, %v326_v13 }

// kernel: tile.18
= control target key start
LH: loop header
LB: loop body
LE: loop exit
PB: predicated region body
PF: predicated region fallthrough
CT: control target
= control target key end

     0   :  { %s22_s0 = inlined_call_operand.vmem [shape: f32[8], index: 0, kind: input, shape index: {}]   ;;  %s23_s1 = inlined_call_operand.vmem [shape: f32[4,8], index: 1, kind: output, shape index: {}]  }
   0x1   :  { %v4_v0 = vld [vmem:[%s22_s0] ss:$0 sm:$0xff] }
   0x2   :  { %5 = vst [vmem:[%s23_s1] sm:$0xf] %v4_v0 }

// kernel: tile.0
= control target key start
LH: loop header
LB: loop body
LE: loop exit
PB: predicated region body
PF: predicated region fallthrough
CT: control target
= control target key end

     0   :  { %s66_s8 = smov 125   ;;  %vm7_vm0 = vcmask 7168   ;;  %s67_s11 = smov 126   ;;  %s117_s0 = inlined_call_operand.vmem [shape: f32[4,8], index: 0, kind: input, shape index: {}]   ;;  %s118_s1 = inlined_call_operand.vmem [shape: f32[32,1], index: 1, kind: output, shape index: {}]  }
   0x1   :  { %v4_v0 = vld [vmem:[%s117_s0] sm:$0xf]  ;;  %s65_s0 = smov 127   ;;  %s68_s12 = smov 124  }
   0x2   :  { %5 = vst [vmem:[#allocation0] sm:$0xf] %v4_v0  ;;  %s69_s13 = smov 123   ;;  %s70_s14 = smov 122  }
   0x3   :  { %s71_s15 = smov 121  }
   0x9   :  { %v9_v1 = vld [vmem:[#allocation0] sm:$0xf]  }
   0xa   :  { %v21_v2 = vld [vmem:[#allocation0] sm:$0xf]   ;;  %10 = vrot.lane.b32.xlu0 %v9_v1, %s65_s0 }
   0xb   :  { %22 = vrot.lane.b32.xlu1 %v21_v2, %s66_s8  ;;  %v15_v3 = vld [vmem:[#allocation0] sm:$0xf]  }
   0xc   :  { %v27_v4 = vld [vmem:[#allocation0] sm:$0xf]  }
   0xd   :  { %v6_v5 = vld [vmem:[#allocation0] sm:$0xf]  }
   0xe   :  { %8 = vst.msk [vmem:[%s118_s1] ss:$8 sm:$0xf] %vm7_vm0, %v6_v5   ;;  %16 = vrot.lane.b32.xlu0 %v15_v3, %s67_s11  ;;  %v33_v6 = vld [vmem:[#allocation0] sm:$0xf]  }
   0xf   :  { %28 = vrot.lane.b32.xlu1 %v27_v4, %s68_s12  ;;  %v39_v7 = vld [vmem:[#allocation0] sm:$0xf]  }
  0x10   :  { %v45_v8 = vld [vmem:[#allocation0] sm:$0xf]  }
  0x12   :  { %34 = vrot.lane.b32.xlu0 %v33_v6, %s69_s13 }
  0x13   :  { %40 = vrot.lane.b32.xlu1 %v39_v7, %s70_s14 }
  0x16   :  { %46 = vrot.lane.b32.xlu0 %v45_v8, %s71_s15 }
  0x7c   :  { %v11_v9 = vpop.permute.xlu0 %10  }
  0x7d   :  { %v23_v10 = vpop.permute.xlu1 %22   ;;  %51 = vst.msk [vmem:[%s118_s1 + $0x1] ss:$8 sm:$0xf] %vm7_vm0, %v11_v9  }
  0x7e   :  { %53 = vst.msk [vmem:[%s118_s1 + $0x3] ss:$8 sm:$0xf] %vm7_vm0, %v23_v10  }
  0x80   :  { %v17_v11 = vpop.permute.xlu0 %16  }
  0x81   :  { %v29_v12 = vpop.permute.xlu1 %28   ;;  %52 = vst.msk [vmem:[%s118_s1 + $0x2] ss:$8 sm:$0xf] %vm7_vm0, %v17_v11  }
  0x82   :  { %54 = vst.msk [vmem:[%s118_s1 + $0x4] ss:$8 sm:$0xf] %vm7_vm0, %v29_v12  }
  0x84   :  { %v35_v13 = vpop.permute.xlu0 %34  }
  0x85   :  { %v41_v14 = vpop.permute.xlu1 %40   ;;  %55 = vst.msk [vmem:[%s118_s1 + $0x5] ss:$8 sm:$0xf] %vm7_vm0, %v35_v13  }
  0x86   :  { %56 = vst.msk [vmem:[%s118_s1 + $0x6] ss:$8 sm:$0xf] %vm7_vm0, %v41_v14  }
  0x88   :  { %v47_v15 = vpop.permute.xlu0 %46  }
  0x89   :  { %57 = vst.msk [vmem:[%s118_s1 + $0x7] ss:$8 sm:$0xf] %vm7_vm0, %v47_v15  }

// kernel: aae_forward.22
= control target key start
LH: loop header
LB: loop body
LE: loop exit
PB: predicated region body
PF: predicated region fallthrough
CT: control target
= control target key end

     0   :  { %v253_v0 = vmov 0   ;;  %vm133_vm0 = vcmask 130048   ;;  %vm193_vm1 = vcmask 261120   ;;  %s337_s0 = inlined_call_operand.vmem [shape: bf16[144,32], index: 0, kind: input, shape index: {}]   ;;  %s338_s1 = inlined_call_operand.vmem [shape: bf16[32,144], index: 1, kind: input, shape index: {}]   ;;  %s339_s2 = inlined_call_operand.vmem [shape: f32[32,1], index: 2, kind: input, shape index: {}]   ;;  %s340_s3 = inlined_call_operand.vmem [shape: f32[32,32], index: 3, kind: output, shape index: {}]  }
   0x1   :  { %140 = vmatprep.subr.bf16.mxu0 %v253_v0  ;;  %217 = vmatprep.subr.bf16.mxu1 %v253_v0  ;;  %v238_v1 = vld [vmem:[%s337_s0] sm:$0xff]   ;;  %v239_v2 = vld [vmem:[%s337_s0 + $0x8] sm:$0xff]   ;;  %v240_v3 = vld [vmem:[%s337_s0 + $0x10] sm:$0xff]  }
   0x2   :  { %237 = vset.pattern.permute.xlu1 %v253_v0  ;;  %236 = vset.pattern.permute.xlu0 %v253_v0  ;;  %v241_v4 = vld [vmem:[%s337_s0 + $0x18] sm:$0xff]   ;;  %v249_v5 = vld [vmem:[%s338_s1 + $0x4] ss:$8 sps:$4 sm:$0xff]   ;;  %v39_v7 = vld [vmem:[%s339_s2 + $0x10] sm:$0xff] }
   0x3   :  { %141 = vmatpush1.bf16.msra.mxu0 %v238_v1  ;;  %226 = vmatpush1.bf16.msra.mxu1 %v238_v1  ;;  %v252_v6 = vld [vmem:[%s338_s1 + $0x14] ss:$8 sps:$4 sm:$0xff]   ;;  %v37_v8 = vld [vmem:[%s339_s2] sm:$0xff]  ;;  %v38_v11 = vld [vmem:[%s339_s2 + $0x8] sm:$0xff] }
   0x4   :  { %142 = vmatprep.subr.bf16.mxu0 %v253_v0  ;;  %218 = vmatprep.subr.bf16.mxu1 %v253_v0  ;;  %v40_v9 = vld [vmem:[%s339_s2 + $0x18] sm:$0xff]  ;;  %v242_v10 = vld [vmem:[%s337_s0 + $0x20] sm:$0xff]   ;;  %v243_v12 = vld [vmem:[%s337_s0 + $0x28] sm:$0xff]  }
   0x5   :  { %215 = vmatprep.mubr.msk.bf16.mxu0 %vm133_vm0, %v249_v5  ;;  %53 = vperm.xlu1 %237, %v39_v7   ;;  %v244_v13 = vld [vmem:[%s337_s0 + $0x30] sm:$0xff]   ;;  %v245_v14 = vld [vmem:[%s337_s0 + $0x38] sm:$0xff]   ;;  %v246_v15 = vld [vmem:[%s337_s0 + $0x40] sm:$0xff]  }
   0x6   :  { %216 = vmatprep.mubr.msk.bf16.mxu1 %vm133_vm0, %v252_v6  ;;  %43 = vperm.xlu0 %236, %v37_v8   ;;  %v247_v16 = vld [vmem:[%s338_s1] ss:$8 sps:$4 sm:$0xff]   ;;  %v250_v17 = vld [vmem:[%s338_s1 + $0x10] ss:$8 sps:$4 sm:$0xff]  }
   0x7   :  { %143 = vmatpush1.bf16.msra.mxu0 %v239_v2  ;;  %227 = vmatpush1.bf16.msra.mxu1 %v239_v2 }
   0x8   :  { %144 = vmatprep.subr.bf16.mxu0 %v253_v0  ;;  %219 = vmatprep.subr.bf16.mxu1 %v253_v0 }
   0x9   :  { %58 = vperm.xlu1 %237, %v40_v9  }
   0xa   :  { %48 = vperm.xlu0 %236, %v38_v11  }
   0xb   :  { %145 = vmatpush1.bf16.msra.mxu0 %v240_v3  ;;  %228 = vmatpush1.bf16.msra.mxu1 %v240_v3 }
   0xc   :  { %146 = vmatprep.subr.bf16.mxu0 %v253_v0  ;;  %220 = vmatprep.subr.bf16.mxu1 %v253_v0 }
   0xf   :  { %147 = vmatpush1.bf16.msra.mxu0 %v241_v4  ;;  %229 = vmatpush1.bf16.msra.mxu1 %v241_v4 }
  0x10   :  { %148 = vmatprep.subr.bf16.mxu0 %v253_v0  ;;  %221 = vmatprep.subr.bf16.mxu1 %v253_v0 }
  0x13   :  { %149 = vmatpush1.bf16.msra.mxu0 %v242_v10  ;;  %230 = vmatpush1.bf16.msra.mxu1 %v242_v10 }
  0x14   :  { %150 = vmatprep.subr.bf16.mxu0 %v253_v0  ;;  %222 = vmatprep.subr.bf16.mxu1 %v253_v0 }
  0x17   :  { %151 = vmatpush1.bf16.msra.mxu0 %v243_v12  ;;  %231 = vmatpush1.bf16.msra.mxu1 %v243_v12 }
  0x18   :  { %152 = vmatprep.subr.bf16.mxu0 %v253_v0  ;;  %223 = vmatprep.subr.bf16.mxu1 %v253_v0 }
  0x1b   :  { %153 = vmatpush1.bf16.msra.mxu0 %v244_v13  ;;  %232 = vmatpush1.bf16.msra.mxu1 %v244_v13 }
  0x1c   :  { %154 = vmatprep.subr.bf16.mxu0 %v253_v0  ;;  %224 = vmatprep.subr.bf16.mxu1 %v253_v0 }
  0x1f   :  { %155 = vmatpush1.bf16.msra.mxu0 %v245_v14  ;;  %233 = vmatpush1.bf16.msra.mxu1 %v245_v14 }
  0x20   :  { %156 = vmatprep.subr.bf16.mxu0 %v253_v0  ;;  %225 = vmatprep.subr.bf16.mxu1 %v253_v0 }
  0x23   :  { %157 = vmatpush1.bf16.msra.mxu0 %v246_v15  ;;  %234 = vmatpush1.bf16.msra.mxu1 %v246_v15 }
  0x26   :  { %173 = vmatmul.mubr.bf16.vlgmr.msra.gmra.mrb[0].mxu0 %v247_v16  ;;  %181 = vmatmul.mubr.bf16.vlgmr.msra.gmra.mrb[0].mxu1 %v250_v17 }
  0x84   :  { %v54_v18 = vpop.permute.xlu1 %53 }
  0x85   :  { %v44_v19 = vpop.permute.xlu0 %43 }
  0x88   :  { %v59_v20 = vpop.permute.xlu1 %58 }
  0x89   :  { %v49_v21 = vpop.permute.xlu0 %48 }
  0xf9   :  { %v174_v22 = vpop.f32.mrb[0].mxu0  ;;  %v182_v23 = vpop.f32.mrb[0].mxu1 }
  0xfa   :  { %v175_v24 = vadd.f32 %v174_v22, %v44_v19  ;;  %v183_v25 = vadd.f32 %v182_v23, %v54_v18  ;;  %v176_v26 = vpop.f32.mrb[1].mxu0  ;;  %v184_v27 = vpop.f32.mrb[1].mxu1 }
  0xfb   :  { %v177_v28 = vpop.f32.mrb[2].mxu0  ;;  %v185_v29 = vpop.f32.mrb[2].mxu1 }
  0xfc   :  { %v189_v30 = vmax.f32 %v175_v24, 0.0  ;;  %v191_v31 = vmax.f32 %v183_v25, 0.0  ;;  %v178_v32 = vadd.f32 %v177_v28, %v49_v21  ;;  %v186_v33 = vadd.f32 %v185_v29, %v59_v20  ;;  %v179_v34 = vpop.f32.mrb[3].mxu0  ;;  %v187_v35 = vpop.f32.mrb[3].mxu1 }
  0xfe   :  { %194 = vst.msk [vmem:[%s340_s3] sm:$0xff] %vm193_vm1, %v189_v30  ;;  %196 = vst.msk [vmem:[%s340_s3 + $0x10] sm:$0xff] %vm193_vm1, %v191_v31  ;;  %v190_v36 = vmax.f32 %v178_v32, 0.0  ;;  %v192_v37 = vmax.f32 %v186_v33, 0.0 }
 0x100   :  { %195 = vst.msk [vmem:[%s340_s3 + $0x8] sm:$0xff] %vm193_vm1, %v190_v36  ;;  %197 = vst.msk [vmem:[%s340_s3 + $0x18] sm:$0xff] %vm193_vm1, %v192_v37 }

// kernel: tile.23
= control target key start
LH: loop header
LB: loop body
LE: loop exit
PB: predicated region body
PF: predicated region fallthrough
CT: control target
= control target key end

     0   :  { %s22_s0 = inlined_call_operand.vmem [shape: f32[4], index: 0, kind: input, shape index: {}]   ;;  %s23_s1 = inlined_call_operand.vmem [shape: f32[4,4], index: 1, kind: output, shape index: {}]  }
   0x1   :  { %v4_v0 = vld [vmem:[%s22_s0] ss:$0 sm:$0xff] }
   0x2   :  { %5 = vst [vmem:[%s23_s1] sm:$0xf] %v4_v0 }

// kernel: tile.1
= control target key start
LH: loop header
LB: loop body
LE: loop exit
PB: predicated region body
PF: predicated region fallthrough
CT: control target
= control target key end

     0   :  { %s34_s8 = smov 125   ;;  %vm7_vm0 = vcmask 7168   ;;  %s35_s11 = smov 126   ;;  %s61_s0 = inlined_call_operand.vmem [shape: f32[4,4], index: 0, kind: input, shape index: {}]   ;;  %s62_s1 = inlined_call_operand.vmem [shape: f32[16,1], index: 1, kind: output, shape index: {}]  }
   0x1   :  { %v4_v0 = vld [vmem:[%s61_s0] sm:$0xf]  ;;  %s33_s0 = smov 127  }
   0x2   :  { %5 = vst [vmem:[#allocation0] sm:$0xf] %v4_v0 }
   0x9   :  { %v9_v1 = vld [vmem:[#allocation0] sm:$0xf]  }
   0xa   :  { %v21_v2 = vld [vmem:[#allocation0] sm:$0xf]   ;;  %10 = vrot.lane.b32.xlu0 %v9_v1, %s33_s0 }
   0xb   :  { %22 = vrot.lane.b32.xlu1 %v21_v2, %s34_s8  ;;  %v6_v3 = vld [vmem:[#allocation0] sm:$0xf]  }
   0xc   :  { %v15_v4 = vld [vmem:[#allocation0] sm:$0xf]   ;;  %8 = vst.msk [vmem:[%s62_s1] ss:$4 sm:$0xf] %vm7_vm0, %v6_v3  }
   0xe   :  { %16 = vrot.lane.b32.xlu0 %v15_v4, %s35_s11 }
  0x7c   :  { %v11_v5 = vpop.permute.xlu0 %10  }
  0x7d   :  { %v23_v6 = vpop.permute.xlu1 %22   ;;  %27 = vst.msk [vmem:[%s62_s1 + $0x1] ss:$4 sm:$0xf] %vm7_vm0, %v11_v5  }
  0x7e   :  { %29 = vst.msk [vmem:[%s62_s1 + $0x3] ss:$4 sm:$0xf] %vm7_vm0, %v23_v6  }
  0x80   :  { %v17_v7 = vpop.permute.xlu0 %16  }
  0x81   :  { %28 = vst.msk [vmem:[%s62_s1 + $0x2] ss:$4 sm:$0xf] %vm7_vm0, %v17_v7  }

// kernel: aae_forward.23
= control target key start
LH: loop header
LB: loop body
LE: loop exit
PB: predicated region body
PF: predicated region fallthrough
CT: control target
= control target key end

     0   :  { %v164_v0 = vmov 0.0   ;;  %vm165_vm0 = vmmov 0   ;;  %v166_v2 = vmov 0   ;;  %vm74_vm1 = vcmask 1043456   ;;  %s217_s0 = inlined_call_operand.vmem [shape: bf16[72,128], index: 0, kind: input, shape index: {}]   ;;  %s218_s2 = inlined_call_operand.vmem [shape: f32[16,1], index: 2, kind: input, shape index: {}]   ;;  %s219_s1 = inlined_call_operand.vmem [shape: bf16[16,72], index: 1, kind: input, shape index: {}]   ;;  %s220_s3 = inlined_call_operand.vmem [shape: f32[16,128], index: 3, kind: output, shape index: {}]  }
   0x1   :  { %140 = vmatprep.subr.bf16.mxu0 %v164_v0  ;;  %v158_v1 = vld [vmem:[%s217_s0] sm:$0xff]   ;;  %150 = vmatprep.mubr.msk.bf16.mxu0 %vm165_vm0, %v164_v0  ;;  %v159_v3 = vld [vmem:[%s217_s0 + $0x8] sm:$0xff]   ;;  %v160_v5 = vld [vmem:[%s217_s0 + $0x10] sm:$0xff]   ;;  %vm70_vm2 = vcmask 588800  }
   0x2   :  { %157 = vset.pattern.permute.xlu0 %v166_v2  ;;  %141 = vmatpush3.bf16.msra.mxu0 %v158_v1  ;;  %v26_v4 = vld [vmem:[%s218_s2] sm:$0xff]  ;;  %v27_v6 = vld [vmem:[%s218_s2 + $0x8] sm:$0xff]  ;;  %v161_v7 = vld [vmem:[%s217_s0 + $0x18] sm:$0xff]  }
   0x3   :  { %142 = vmatprep.subr.bf16.mxu0 %v164_v0  ;;  %30 = vperm.xlu0 %157, %v26_v4   ;;  %v162_v8 = vld [vmem:[%s217_s0 + $0x20] ss:$0 sps:$4 sm:$0xff]  }
   0x4   :  { %v76_v9 = vsel %vm74_vm1, %v162_v8, 0  ;;  %v163_v10 = vld [vmem:[%s219_s1] sm:$0xff]  }
   0x6   :  { %143 = vmatpush3.bf16.msra.mxu0 %v159_v3 }
   0x7   :  { %144 = vmatprep.subr.bf16.mxu0 %v164_v0  ;;  %35 = vperm.xlu0 %157, %v27_v6  }
   0xa   :  { %145 = vmatpush3.bf16.msra.mxu0 %v160_v5 }
   0xb   :  { %146 = vmatprep.subr.bf16.mxu0 %v164_v0 }
   0xe   :  { %147 = vmatpush3.bf16.msra.mxu0 %v161_v7 }
   0xf   :  { %148 = vmatprep.subr.bf16.mxu0 %v164_v0 }
  0x12   :  { %149 = vmatpush3.bf16.msra.mxu0 %v76_v9 }
  0x15   :  { %151 = vmatmul.mubr.msk.bf16.vlgmr.msra.gmra.mrb[0].mxu0 %vm70_vm2, %v163_v10 }
  0x82   :  { %v31_v11 = vpop.permute.xlu0 %30 }
  0x86   :  { %v36_v15 = vpop.permute.xlu0 %35 }
  0xe8   :  { %v112_v12 = vpop.f32.mrb[0].mxu0 }
  0xe9   :  { %v113_v13 = vadd.f32 %v112_v12, %v31_v11  ;;  %v152_v14 = vpop.f32.mrb[1].mxu0 }
  0xea   :  { %v115_v16 = vpop.f32.mrb[2].mxu0 }
  0xeb   :  { %v119_v17 = vmax.f32 %v113_v13, 0.0  ;;  %v116_v18 = vadd.f32 %v115_v16, %v36_v15  ;;  %v153_v19 = vpop.f32.mrb[3].mxu0 }
  0xed   :  { %121 = vst [vmem:[%s220_s3] sm:$0xff] %v119_v17  ;;  %v120_v20 = vmax.f32 %v116_v18, 0.0 }
  0xef   :  { %122 = vst [vmem:[%s220_s3 + $0x8] sm:$0xff] %v120_v20 }

// kernel: aae_forward.24
= control target key start
LH: loop header
LB: loop body
LE: loop exit
PB: predicated region body
PF: predicated region fallthrough
CT: control target
= control target key end

     0   :  { %v253_v1 = vmov 0   ;;  %vm98_vm0 = vcmask 1041408   ;;  %vm94_vm1 = vcmask 293888   ;;  %s341_s0 = inlined_call_operand.vmem [shape: bf16[36,512], index: 0, kind: input, shape index: {}]   ;;  %s342_s2 = inlined_call_operand.vmem [shape: f32[16,1], index: 2, kind: input, shape index: {}]   ;;  %s343_s1 = inlined_call_operand.vmem [shape: bf16[16,36], index: 1, kind: input, shape index: {}]   ;;  %s344_s3 = inlined_call_operand.vmem [shape: f32[16,512], index: 3, kind: output, shape index: {}]  }
   0x1   :  { %v236_v0 = vld [vmem:[%s341_s0 + $0x4] ss:$16 sps:$4 sm:$0xff]   ;;  %143 = vmatprep.mubr.bf16.mxu0 %v253_v1  ;;  %186 = vmatprep.mubr.bf16.mxu1 %v253_v1  ;;  %v238_v2 = vld [vmem:[%s341_s0 + $0xc] ss:$16 sps:$4 sm:$0xff]   ;;  %v240_v3 = vld [vmem:[%s341_s0] ss:$16 sps:$4 sm:$0xff]  }
   0x2   :  { %235 = vset.pattern.permute.xlu0 %v253_v1  ;;  %111 = vmatprep.subr.bf16.mxu0 %v236_v0  ;;  %v241_v4 = vld [vmem:[%s341_s0 + $0x8] ss:$16 sps:$4 sm:$0xff]   ;;  %v242_v5 = vld [vmem:[%s341_s0 + $0x24] ss:$16 sps:$4 sm:$0xff]   ;;  %v244_v6 = vld [vmem:[%s341_s0 + $0x2c] ss:$16 sps:$4 sm:$0xff]  }
   0x3   :  { %154 = vmatprep.subr.bf16.mxu1 %v238_v2  ;;  %112 = vmatpush1.bf16.msra.mxu0 %v240_v3  ;;  %v246_v7 = vld [vmem:[%s341_s0 + $0x20] ss:$16 sps:$4 sm:$0xff]   ;;  %v247_v8 = vld [vmem:[%s341_s0 + $0x28] ss:$16 sps:$4 sm:$0xff]  }
   0x4   :  { %155 = vmatpush1.bf16.msra.mxu1 %v241_v4  ;;  %113 = vmatprep.subr.bf16.mxu0 %v242_v5  ;;  %v23_v9 = vld [vmem:[%s341_s0 + $0x40] sm:$0x33]  ;;  %v24_v10 = vld [vmem:[%s341_s0 + $0x48] sm:$0x33] }
   0x5   :  { %156 = vmatprep.subr.bf16.mxu1 %v244_v6  ;;  %v227_v11 = vcombine.high %v23_v9, %v23_v9  ;;  %v229_v12 = vcombine.high %v24_v10, %v24_v10  ;;  %v226_v13 = vcombine.low %v23_v9, %v23_v9  ;;  %v228_v14 = vcombine.low %v24_v10, %v24_v10  ;;  %v27_v15 = vld [vmem:[%s342_s2] sm:$0xff]  ;;  %v28_v19 = vld [vmem:[%s342_s2 + $0x8] sm:$0xff] }
   0x6   :  { %31 = vperm.xlu0 %235, %v27_v15   ;;  %v252_v18 = vld [vmem:[%s343_s1] sm:$0xff]  }
   0x7   :  { %114 = vmatpush1.bf16.msra.mxu0 %v246_v7  ;;  %v100_v16 = vsel %vm98_vm0, %v226_v13, 0  ;;  %v106_v17 = vsel %vm98_vm0, %v228_v14, 0 }
   0x8   :  { %157 = vmatpush1.bf16.msra.mxu1 %v247_v8  ;;  %230 = vmatprep.subr.msk.bf16.mxu0 %vm98_vm0, %v227_v11 }
   0x9   :  { %232 = vmatprep.subr.msk.bf16.mxu1 %vm98_vm0, %v229_v12 }
   0xa   :  { %36 = vperm.xlu0 %235, %v28_v19  }
   0xb   :  { %116 = vmatpush1.bf16.msra.mxu0 %v100_v16 }
   0xc   :  { %159 = vmatpush1.bf16.msra.mxu1 %v106_v17 }
   0xe   :  { %231 = vmatmul.mubr.msk.bf16.vlgmr.msra.gmra.mrb[0].mxu0 %vm94_vm1, %v252_v18 }
   0xf   :  { %233 = vmatmul.mubr.msk.bf16.vlgmr.msra.gmra.mrb[0].mxu1 %vm94_vm1, %v252_v18 }
  0x85   :  { %v32_v20 = vpop.permute.xlu0 %31 }
  0x89   :  { %v37_v21 = vpop.permute.xlu0 %36 }
  0xe1   :  { %v145_v22 = vpop.f32.mrb[0].mxu0 }
  0xe2   :  { %v188_v23 = vpop.f32.mrb[0].mxu1  ;;  %v146_v24 = vadd.f32 %v145_v22, %v32_v20  ;;  %v147_v26 = vpop.f32.mrb[1].mxu0 }
  0xe3   :  { %v189_v25 = vadd.f32 %v188_v23, %v32_v20  ;;  %v190_v27 = vpop.f32.mrb[1].mxu1  ;;  %v148_v28 = vadd.f32 %v147_v26, %v32_v20  ;;  %v149_v30 = vpop.f32.mrb[2].mxu0 }
  0xe4   :  { %v191_v29 = vadd.f32 %v190_v27, %v32_v20  ;;  %v192_v31 = vpop.f32.mrb[2].mxu1  ;;  %v197_v32 = vmax.f32 %v146_v24, 0.0  ;;  %v150_v34 = vadd.f32 %v149_v30, %v37_v21  ;;  %v151_v36 = vpop.f32.mrb[3].mxu0 }
  0xe5   :  { %v199_v33 = vmax.f32 %v189_v25, 0.0  ;;  %v193_v35 = vadd.f32 %v192_v31, %v37_v21  ;;  %v194_v37 = vpop.f32.mrb[3].mxu1  ;;  %v198_v38 = vmax.f32 %v148_v28, 0.0  ;;  %v152_v40 = vadd.f32 %v151_v36, %v37_v21 }
  0xe6   :  { %v200_v39 = vmax.f32 %v191_v29, 0.0  ;;  %v195_v41 = vadd.f32 %v194_v37, %v37_v21  ;;  %205 = vst [vmem:[%s344_s3] sm:$0xff] %v197_v32  ;;  %v201_v42 = vmax.f32 %v150_v34, 0.0 }
  0xe7   :  { %207 = vst [vmem:[%s344_s3 + $0x10] sm:$0xff] %v199_v33  ;;  %v203_v43 = vmax.f32 %v193_v35, 0.0  ;;  %206 = vst [vmem:[%s344_s3 + $0x8] sm:$0xff] %v198_v38  ;;  %v202_v44 = vmax.f32 %v152_v40, 0.0 }
  0xe8   :  { %208 = vst [vmem:[%s344_s3 + $0x18] sm:$0xff] %v200_v39  ;;  %v204_v45 = vmax.f32 %v195_v41, 0.0  ;;  %209 = vst [vmem:[%s344_s3 + $0x20] sm:$0xff] %v201_v42 }
  0xe9   :  { %211 = vst [vmem:[%s344_s3 + $0x30] sm:$0xff] %v203_v43  ;;  %210 = vst [vmem:[%s344_s3 + $0x28] sm:$0xff] %v202_v44 }
  0xea   :  { %212 = vst [vmem:[%s344_s3 + $0x38] sm:$0xff] %v204_v45 }

// kernel: aae_forward.25
= control target key start
LH: loop header
LB: loop body
LE: loop exit
PB: predicated region body
PF: predicated region fallthrough
CT: control target
= control target key end

     0   :  { %v46_v1 = vlaneseq  ;;  %v953_v3 = vmov 1983009808   ;;  %v954_v5 = vmov 0   ;;  %s1275_s0 = inlined_call_operand.vmem [shape: bf16[4,2048], index: 0, kind: input, shape index: {}]   ;;  %s1276_s1 = inlined_call_operand.vmem [shape: bf16[2,4], index: 1, kind: input, shape index: {}]   ;;  %s1277_s2 = inlined_call_operand.vmem [shape: f32[2,1], index: 2, kind: input, shape index: {}]   ;;  %s1278_s3 = inlined_call_operand.vmem [shape: f32[2,2048], index: 3, kind: input, shape index: {}]   ;;  %s1279_s4 = inlined_call_operand.vmem [shape: f32[2,2048], index: 4, kind: input, shape index: {}]   ;;  %s1280_s5 = inlined_call_operand.vmem [shape: f32[2,1], index: 5, kind: input, shape index: {}]   ;;  %s1281_s6 = inlined_call_operand.vmem [shape: f32[2,2048], index: 6, kind: output, shape index: {0}]   ;;  %s1282_s7 = inlined_call_operand.hbm [shape: f32[1,1], index: 7, kind: output, shape index: {1}]  }
   0x1   :  { %v28_v0 = vld [vmem:[%s1275_s0] sm:$0xff]  ;;  %v29_v2 = vld [vmem:[%s1275_s0 + $0x8] sm:$0xff]  ;;  %v44_v4 = vunpack.c.l.s4 %v953_v3  ;;  %195 = vmatprep.mubr.bf16.mxu0 %v954_v5  ;;  %236 = vmatprep.mubr.bf16.mxu1 %v954_v5  ;;  %v30_v11 = vld [vmem:[%s1275_s0 + $0x10] sm:$0xff] }
   0x2   :  { %v47_v6 = vshrl.u32 %v46_v1, 7  ;;  %916 = vset.pattern.permute.xlu0 %v954_v5  ;;  %v32_v7 = vld [vmem:[%s1277_s2] sm:$0x3]  ;;  %v42_v9 = vcombine.high %v28_v0, %v28_v0  ;;  %v59_v10 = vcombine.high %v29_v2, %v29_v2 }
   0x3   :  { %v45_v8 = vunpack.c.0.s8 %v44_v4  ;;  %35 = vperm.xlu0 %916, %v32_v7  }
   0x4   :  { %13 = vsyncpa [#allocation3], 0  ;;  %v815_v12 = vld [vmem:[%s1280_s5] sm:$0x3]  ;;  %vm114_vm0 = vcmask 1041408   ;;  %v76_v14 = vcombine.high %v30_v11, %v30_v11  ;;  %v31_v27 = vld [vmem:[%s1275_s0 + $0x18] sm:$0xff] }
   0x5   :  { %v1014_v13 = vsub.s32 %v45_v8, %v47_v6  ;;  %v27_v28 = vld [vmem:[%s1276_s1] sm:$0x1]  ;;  %vm110_vm1 = vcmask 31744   ;;  %v93_v33 = vcombine.high %v31_v27, %v31_v27  ;;  %v584_v44 = vld [vmem:[%s1278_s3 + $0x8] sm:$0xff]  ;;  %v585_v47 = vld [vmem:[%s1278_s3 + $0x10] sm:$0xff]  ;;  %vm877_vm2 = vcmask 0  }
   0x6   :  { %v583_v42 = vld [vmem:[%s1278_s3] sm:$0xff]  ;;  %v692_v45 = vld [vmem:[%s1279_s4 + $0x8] sm:$0xff]  ;;  %v608_v49 = vcombine.high %v584_v44, %v584_v44  ;;  %v693_v51 = vld [vmem:[%s1279_s4 + $0x10] sm:$0xff]  ;;  %v625_v52 = vcombine.high %v585_v47, %v585_v47 }
   0x7   :  { %v49_v15 = vrot.slane %v28_v0, %v1014_v13  ;;  %v56_v16 = vrot.slane %v42_v9, %v1014_v13  ;;  %v66_v17 = vrot.slane %v29_v2, %v1014_v13  ;;  %v73_v18 = vrot.slane %v59_v10, %v1014_v13  ;;  %818 = vperm.xlu0 %916, %v815_v12   ;;  %v691_v43 = vld [vmem:[%s1279_s4] sm:$0xff] }
   0x8   :  { %v83_v25 = vrot.slane %v30_v11, %v1014_v13  ;;  %v90_v26 = vrot.slane %v76_v14, %v1014_v13  ;;  %v100_v34 = vrot.slane %v31_v27, %v1014_v13  ;;  %v107_v35 = vrot.slane %v93_v33, %v1014_v13  ;;  %v586_v11 = vld [vmem:[%s1278_s3 + $0x18] sm:$0xff] }
   0x9   :  { %v57_v19 = vcombine.high %v49_v15, %v49_v15  ;;  %v58_v20 = vcombine.high %v56_v16, %v56_v16  ;;  %v116_v21 = vsel %vm114_vm0, %v49_v15, 0  ;;  %v122_v22 = vsel %vm114_vm0, %v56_v16, 0 }
   0xa   :  { %v74_v23 = vcombine.high %v66_v17, %v66_v17  ;;  %v75_v24 = vcombine.high %v73_v18, %v73_v18  ;;  %v128_v29 = vsel %vm114_vm0, %v66_v17, 0  ;;  %v134_v30 = vsel %vm114_vm0, %v73_v18, 0 }
   0xb   :  { %897 = vmatprep.subr.msk.bf16.mxu0 %vm114_vm0, %v57_v19  ;;  %899 = vmatprep.subr.msk.bf16.mxu1 %vm114_vm0, %v58_v20  ;;  %v91_v31 = vcombine.high %v83_v25, %v83_v25  ;;  %v92_v32 = vcombine.high %v90_v26, %v90_v26  ;;  %v140_v36 = vsel %vm114_vm0, %v83_v25, 0  ;;  %v146_v37 = vsel %vm114_vm0, %v90_v26, 0  ;;  %v694_v25 = vld [vmem:[%s1279_s4 + $0x18] sm:$0xff] }
   0xc   :  { %164 = vmatpush1.bf16.msra.mxu0 %v116_v21  ;;  %205 = vmatpush1.bf16.msra.mxu1 %v122_v22  ;;  %v108_v38 = vcombine.high %v100_v34, %v100_v34  ;;  %v109_v39 = vcombine.high %v107_v35, %v107_v35  ;;  %v152_v40 = vsel %vm114_vm0, %v100_v34, 0  ;;  %v158_v41 = vsel %vm114_vm0, %v107_v35, 0 }
   0xd   :  { %901 = vmatprep.subr.msk.bf16.mxu0 %vm114_vm0, %v74_v23  ;;  %903 = vmatprep.subr.msk.bf16.mxu1 %vm114_vm0, %v75_v24  ;;  %v591_v46 = vcombine.high %v583_v42, %v583_v42  ;;  %v699_v48 = vcombine.high %v691_v43, %v691_v43  ;;  %v716_v50 = vcombine.high %v692_v45, %v692_v45 }
   0xe   :  { %v598_v53 = vrot.slane %v583_v42, %v1014_v13  ;;  %v706_v54 = vrot.slane %v691_v43, %v1014_v13  ;;  %v1083_v57 = vrot.slane %v584_v44, %v1014_v13  ;;  %v1086_v58 = vrot.slane %v692_v45, %v1014_v13 }
   0xf   :  { %898 = vmatmul.mubr.msk.bf16.vlgmr.msra.gmra.mrb[0].mxu0 %vm110_vm1, %v27_v28  ;;  %900 = vmatmul.mubr.msk.bf16.vlgmr.msra.gmra.mrb[0].mxu1 %vm110_vm1, %v27_v28  ;;  %v605_v55 = vrot.slane %v591_v46, %v1014_v13  ;;  %v713_v56 = vrot.slane %v699_v48, %v1014_v13  ;;  %v1089_v59 = vrot.slane %v608_v49, %v1014_v13 }
  0x10   :  { %246 = vmatpush1.bf16.msra.mxu0 %v128_v29  ;;  %287 = vmatpush1.bf16.msra.mxu1 %v134_v30  ;;  %v1092_v60 = vrot.slane %v716_v50, %v1014_v13  ;;  %v733_v61 = vcombine.high %v693_v51, %v693_v51  ;;  %v1095_v62 = vrot.slane %v585_v47, %v1014_v13 }
  0x11   :  { %277 = vmatprep.mubr.bf16.mxu0 %v954_v5  ;;  %318 = vmatprep.mubr.bf16.mxu1 %v954_v5  ;;  %v1098_v63 = vrot.slane %v625_v52, %v1014_v13  ;;  %v606_v1 = vcombine.high %v598_v53, %v598_v53  ;;  %v714_v2 = vcombine.high %v706_v54, %v706_v54 }
  0x12   :  { %905 = vmatprep.subr.msk.bf16.mxu0 %vm114_vm0, %v91_v31  ;;  %907 = vmatprep.subr.msk.bf16.mxu1 %vm114_vm0, %v92_v32  ;;  %v607_v3 = vcombine.high %v605_v55, %v605_v55  ;;  %v1103_v4 = vrot.slane %v693_v51, %v1014_v13  ;;  %v715_v7 = vcombine.high %v713_v56, %v713_v56 }
  0x13   :  { %v623_v8 = vcombine.high %v1083_v57, %v1083_v57  ;;  %v731_v9 = vcombine.high %v1086_v58, %v1086_v58  ;;  %v624_v10 = vcombine.high %v1089_v59, %v1089_v59  ;;  %v732_v17 = vcombine.high %v1092_v60, %v1092_v60 }
  0x14   :  { %v1119_v18 = vrot.slane %v733_v61, %v1014_v13  ;;  %v640_v23 = vcombine.high %v1095_v62, %v1095_v62  ;;  %v641_v24 = vcombine.high %v1098_v63, %v1098_v63  ;;  %v748_v30 = vcombine.high %v1103_v4, %v1103_v4 }
  0x15   :  { %v642_v31 = vcombine.high %v586_v11, %v586_v11  ;;  %v1139_v47 = vrot.slane %v586_v11, %v1014_v13 }
  0x17   :  { %902 = vmatmul.mubr.msk.bf16.vlgmr.msra.gmra.mrb[4].mxu0 %vm110_vm1, %v27_v28  ;;  %904 = vmatmul.mubr.msk.bf16.vlgmr.msra.gmra.mrb[4].mxu1 %vm110_vm1, %v27_v28  ;;  %v1142_v48 = vrot.slane %v642_v31, %v1014_v13 }
  0x18   :  { %328 = vmatpush1.bf16.msra.mxu0 %v140_v36  ;;  %369 = vmatpush1.bf16.msra.mxu1 %v146_v37 }
  0x19   :  { %359 = vmatprep.mubr.bf16.mxu0 %v954_v5  ;;  %400 = vmatprep.mubr.bf16.mxu1 %v954_v5 }
  0x1a   :  { %909 = vmatprep.subr.msk.bf16.mxu0 %vm114_vm0, %v108_v38  ;;  %911 = vmatprep.subr.msk.bf16.mxu1 %vm114_vm0, %v109_v39  ;;  %v749_v38 = vcombine.high %v1119_v18, %v1119_v18  ;;  %v750_v39 = vcombine.high %v694_v25, %v694_v25 }
  0x1f   :  { %906 = vmatmul.mubr.msk.bf16.vlgmr.msra.gmra.mrb[8].mxu0 %vm110_vm1, %v27_v28  ;;  %908 = vmatmul.mubr.msk.bf16.vlgmr.msra.gmra.mrb[8].mxu1 %vm110_vm1, %v27_v28 }
  0x20   :  { %410 = vmatpush1.bf16.msra.mxu0 %v152_v40  ;;  %451 = vmatpush1.bf16.msra.mxu1 %v158_v41 }
  0x21   :  { %441 = vmatprep.mubr.bf16.mxu0 %v954_v5  ;;  %482 = vmatprep.mubr.bf16.mxu1 %v954_v5 }
  0x27   :  { %910 = vmatmul.mubr.msk.bf16.vlgmr.msra.gmra.mrb[12].mxu0 %vm110_vm1, %v27_v28  ;;  %912 = vmatmul.mubr.msk.bf16.vlgmr.msra.gmra.mrb[12].mxu1 %vm110_vm1, %v27_v28 }
  0x82   :  { %v1100_v0 = vpop.permute.xlu0 %35 }
  0x86   :  { %v1136_v46 = vpop.permute.xlu0 %818 }
  0xe2   :  { %v197_v5 = vpop.f32.mrb[0].mxu0  ;;  %v238_v6 = vpop.f32.mrb[0].mxu1 }
  0xe3   :  { %v198_v12 = vadd.f32 %v197_v5, %v1100_v0  ;;  %v239_v14 = vadd.f32 %v238_v6, %v1100_v0  ;;  %v199_v15 = vpop.f32.mrb[1].mxu0  ;;  %v240_v16 = vpop.f32.mrb[1].mxu1 }
  0xe4   :  { %v200_v19 = vadd.f32 %v199_v15, %v1100_v0  ;;  %v241_v20 = vadd.f32 %v240_v16, %v1100_v0  ;;  %v201_v21 = vpop.f32.mrb[2].mxu0  ;;  %v242_v22 = vpop.f32.mrb[2].mxu1 }
  0xe5   :  { %v675_v26 = vsub.f32 %v198_v12, %v598_v53  ;;  %v677_v27 = vsub.f32 %v239_v14, %v605_v55  ;;  %v202_v28 = vpop.f32.mrb[3].mxu0  ;;  %v243_v29 = vpop.f32.mrb[3].mxu1  ;;  %v657_v22 = vcombine.high %v1139_v47, %v1139_v47 }
  0xe6   :  { %v507_v32 = vcombine.low %v198_v12, %v200_v19  ;;  %v676_v33 = vsub.f32 %v200_v19, %v606_v1  ;;  %v508_v34 = vcombine.low %v239_v14, %v241_v20  ;;  %v678_v35 = vsub.f32 %v241_v20, %v607_v3 }
  0xe7   :  { %v783_v36 = vmul.f32 %v706_v54, %v675_v26  ;;  %v785_v37 = vmul.f32 %v713_v56, %v677_v27  ;;  %v1145_v54 = vrot.slane %v694_v25, %v1014_v13  ;;  %v1151_v3 = vrot.slane %v750_v39, %v1014_v13 }
  0xe8   :  { %v515_v40 = vrot.slane %v507_v32, %v1014_v13  ;;  %v784_v41 = vmul.f32 %v714_v2, %v676_v33  ;;  %v522_v42 = vrot.slane %v508_v34, %v1014_v13  ;;  %v786_v43 = vmul.f32 %v715_v7, %v678_v35 }
  0xe9   :  { %v799_v44 = vmul.f32 %v783_v36, %v783_v36  ;;  %v801_v45 = vmul.f32 %v785_v37, %v785_v37 }
  0xea   :  { %v800_v49 = vmul.f32 %v784_v41, %v784_v41  ;;  %v523_v50 = vcombine.low %v515_v40, %v522_v42  ;;  %v802_v51 = vmul.f32 %v786_v43, %v786_v43  ;;  %v279_v52 = vpop.f32.mrb[4].mxu0  ;;  %v320_v53 = vpop.f32.mrb[4].mxu1 }
  0xeb   :  { %v280_v55 = vadd.f32 %v279_v52, %v1100_v0  ;;  %v821_v56 = vmul.f32 %v1136_v46, %v799_v44  ;;  %v321_v61 = vadd.f32 %v320_v53, %v1100_v0  ;;  %v281_v1 = vpop.f32.mrb[5].mxu0  ;;  %v322_v2 = vpop.f32.mrb[5].mxu1  ;;  %v823_v6 = vmul.f32 %v1136_v46, %v801_v45 }
  0xec   :  { %579 = vst [vmem:[%s1281_s6] sm:$0xff] %v523_v50  ;;  %v822_v5 = vmul.f32 %v1136_v46, %v800_v49  ;;  %v282_v7 = vadd.f32 %v281_v1, %v1100_v0  ;;  %v323_v11 = vadd.f32 %v322_v2, %v1100_v0  ;;  %v283_v12 = vpop.f32.mrb[6].mxu0  ;;  %v324_v14 = vpop.f32.mrb[6].mxu1  ;;  %v824_v25 = vmul.f32 %v1136_v46, %v802_v51 }
  0xed   :  { %v679_v15 = vsub.f32 %v280_v55, %v1083_v57  ;;  %v837_v16 = vsel %vm114_vm0, %v821_v56, 0.0  ;;  %v681_v19 = vsub.f32 %v321_v61, %v1089_v59  ;;  %v284_v20 = vpop.f32.mrb[7].mxu0  ;;  %v325_v21 = vpop.f32.mrb[7].mxu1  ;;  %v840_v34 = vsel %vm114_vm0, %v823_v6, 0.0 }
  0xee   :  { %v838_v26 = vsel %vm114_vm0, %v822_v5, 0.0  ;;  %v524_v27 = vcombine.low %v280_v55, %v282_v7  ;;  %v680_v28 = vsub.f32 %v282_v7, %v623_v8  ;;  %v525_v33 = vcombine.low %v321_v61, %v323_v11 }
  0xef   :  { %v787_v29 = vmul.f32 %v1086_v58, %v679_v15  ;;  %v839_v31 = vadd.f32 %v838_v26, %v837_v16  ;;  %v789_v32 = vmul.f32 %v1092_v60, %v681_v19  ;;  %v682_v37 = vsub.f32 %v323_v11, %v624_v10 }
  0xf0   :  { %v532_v35 = vrot.slane %v524_v27, %v1014_v13  ;;  %v788_v36 = vmul.f32 %v731_v9, %v680_v28  ;;  %v539_v40 = vrot.slane %v525_v33, %v1014_v13  ;;  %v842_v41 = vsel %vm114_vm0, %v824_v25, 0.0 }
  0xf1   :  { %v803_v57 = vmul.f32 %v787_v29, %v787_v29  ;;  %v841_v8 = vadd.f32 %v840_v34, %v839_v31  ;;  %v805_v39 = vmul.f32 %v789_v32, %v789_v32  ;;  %v790_v43 = vmul.f32 %v732_v17, %v682_v37 }
  0xf2   :  { %v804_v42 = vmul.f32 %v788_v36, %v788_v36  ;;  %v361_v44 = vpop.f32.mrb[8].mxu0  ;;  %v402_v45 = vpop.f32.mrb[8].mxu1  ;;  %v658_v58 = vcombine.high %v1142_v48, %v1142_v48  ;;  %v540_v49 = vcombine.low %v532_v35, %v539_v40  ;;  %v765_v7 = vcombine.high %v1145_v54, %v1145_v54 }
  0xf3   :  { %v825_v59 = vmul.f32 %v1136_v46, %v803_v57  ;;  %v843_v9 = vadd.f32 %v842_v41, %v841_v8  ;;  %v827_v10 = vmul.f32 %v1136_v46, %v805_v39  ;;  %v363_v50 = vpop.f32.mrb[9].mxu0  ;;  %v404_v51 = vpop.f32.mrb[9].mxu1  ;;  %v806_v53 = vmul.f32 %v790_v43, %v790_v43 }
  0xf4   :  { %v826_v52 = vmul.f32 %v1136_v46, %v804_v42  ;;  %v362_v55 = vadd.f32 %v361_v44, %v1100_v0  ;;  %v403_v60 = vadd.f32 %v402_v45, %v1100_v0  ;;  %v365_v17 = vpop.f32.mrb[10].mxu0  ;;  %v406_v56 = vpop.f32.mrb[10].mxu1  ;;  %580 = vst [vmem:[%s1281_s6 + $0x8] sm:$0xff] %v540_v49  ;;  %v364_v1 = vadd.f32 %v363_v50, %v1100_v0 }
  0xf5   :  { %v844_v61 = vsel %vm114_vm0, %v825_v59, 0.0  ;;  %v405_v2 = vadd.f32 %v404_v51, %v1100_v0  ;;  %v366_v5 = vpop.f32.mrb[11].mxu0  ;;  %v407_v6 = vpop.f32.mrb[11].mxu1  ;;  %v828_v14 = vmul.f32 %v1136_v46, %v806_v53  ;;  %v848_v25 = vsel %vm114_vm0, %v827_v10, 0.0 }
  0xf6   :  { %v845_v11 = vadd.f32 %v844_v61, %v843_v9  ;;  %v846_v12 = vsel %vm114_vm0, %v826_v52, 0.0  ;;  %v683_v15 = vsub.f32 %v362_v55, %v1095_v62  ;;  %v685_v16 = vsub.f32 %v403_v60, %v1098_v63 }
  0xf7   :  { %v541_v19 = vcombine.low %v362_v55, %v364_v1  ;;  %v684_v20 = vsub.f32 %v364_v1, %v640_v23  ;;  %v542_v21 = vcombine.low %v403_v60, %v405_v2  ;;  %v686_v28 = vsub.f32 %v405_v2, %v641_v24 }
  0xf8   :  { %v847_v26 = vadd.f32 %v846_v12, %v845_v11  ;;  %v791_v27 = vmul.f32 %v1103_v4, %v683_v15  ;;  %v793_v29 = vmul.f32 %v1119_v18, %v685_v16  ;;  %v850_v33 = vsel %vm114_vm0, %v828_v14, 0.0 }
  0xf9   :  { %v549_v31 = vrot.slane %v541_v19, %v1014_v13  ;;  %v792_v32 = vmul.f32 %v748_v30, %v684_v20  ;;  %v556_v62 = vrot.slane %v542_v21, %v1014_v13  ;;  %v794_v35 = vmul.f32 %v749_v38, %v686_v28 }
  0xfa   :  { %v849_v23 = vadd.f32 %v848_v25, %v847_v26  ;;  %v807_v34 = vmul.f32 %v791_v27, %v791_v27  ;;  %v443_v63 = vpop.f32.mrb[12].mxu0  ;;  %v484_v24 = vpop.f32.mrb[12].mxu1  ;;  %v809_v36 = vmul.f32 %v793_v29, %v793_v29  ;;  %v766_v52 = vcombine.high %v1151_v3, %v1151_v3 }
  0xfb   :  { %v808_v37 = vmul.f32 %v792_v32, %v792_v32  ;;  %v557_v57 = vcombine.low %v549_v31, %v556_v62  ;;  %v444_v8 = vadd.f32 %v443_v63, %v1100_v0  ;;  %v445_v39 = vpop.f32.mrb[13].mxu0  ;;  %v486_v4 = vpop.f32.mrb[13].mxu1  ;;  %v810_v41 = vmul.f32 %v794_v35, %v794_v35 }
  0xfc   :  { %v851_v30 = vadd.f32 %v850_v33, %v849_v23  ;;  %v829_v40 = vmul.f32 %v1136_v46, %v807_v34  ;;  %v485_v42 = vadd.f32 %v484_v24, %v1100_v0  ;;  %v447_v43 = vpop.f32.mrb[14].mxu0  ;;  %v488_v44 = vpop.f32.mrb[14].mxu1  ;;  %v831_v18 = vmul.f32 %v1136_v46, %v809_v36 }
  0xfd   :  { %v830_v38 = vmul.f32 %v1136_v46, %v808_v37  ;;  %581 = vst [vmem:[%s1281_s6 + $0x10] sm:$0xff] %v557_v57  ;;  %v687_v45 = vsub.f32 %v444_v8, %v1139_v47  ;;  %v446_v59 = vadd.f32 %v445_v39, %v1100_v0  ;;  %v448_v9 = vpop.f32.mrb[15].mxu0  ;;  %v489_v10 = vpop.f32.mrb[15].mxu1  ;;  %v487_v51 = vadd.f32 %v486_v4, %v1100_v0 }
  0xfe   :  { %v852_v49 = vsel %vm114_vm0, %v829_v40, 0.0  ;;  %v689_v50 = vsub.f32 %v485_v42, %v1142_v48  ;;  %v832_v60 = vmul.f32 %v1136_v46, %v810_v41  ;;  %v856_v0 = vsel %vm114_vm0, %v831_v18, 0.0 }
  0xff   :  { %v853_v53 = vadd.f32 %v852_v49, %v851_v30  ;;  %v854_v55 = vsel %vm114_vm0, %v830_v38, 0.0  ;;  %v795_v17 = vmul.f32 %v1145_v54, %v687_v45  ;;  %v558_v61 = vcombine.low %v444_v8, %v446_v59 }
 0x100   :  { %v797_v56 = vmul.f32 %v1151_v3, %v689_v50  ;;  %v688_v1 = vsub.f32 %v446_v59, %v657_v22  ;;  %v559_v2 = vcombine.low %v485_v42, %v487_v51  ;;  %v690_v11 = vsub.f32 %v487_v51, %v658_v58 }
 0x101   :  { %v855_v5 = vadd.f32 %v854_v55, %v853_v53  ;;  %v811_v6 = vmul.f32 %v795_v17, %v795_v17  ;;  %v566_v14 = vrot.slane %v558_v61, %v1014_v13  ;;  %v858_v20 = vsel %vm114_vm0, %v832_v60, 0.0 }
 0x102   :  { %v813_v12 = vmul.f32 %v797_v56, %v797_v56  ;;  %v796_v54 = vmul.f32 %v765_v7, %v688_v1  ;;  %v573_v3 = vrot.slane %v559_v2, %v1014_v13  ;;  %v798_v16 = vmul.f32 %v766_v52, %v690_v11 }
 0x103   :  { %v833_v15 = vmul.f32 %v1136_v46, %v811_v6  ;;  %v857_v47 = vadd.f32 %v856_v0, %v855_v5 }
 0x104   :  { %v812_v22 = vmul.f32 %v796_v54, %v796_v54  ;;  %v574_v19 = vcombine.low %v566_v14, %v573_v3  ;;  %v814_v21 = vmul.f32 %v798_v16, %v798_v16  ;;  %v835_v13 = vmul.f32 %v1136_v46, %v813_v12 }
 0x105   :  { %v859_v25 = vadd.f32 %v858_v20, %v857_v47  ;;  %v860_v26 = vsel %vm114_vm0, %v833_v15, 0.0 }
 0x106   :  { %582 = vst [vmem:[%s1281_s6 + $0x18] sm:$0xff] %v574_v19  ;;  %v834_v48 = vmul.f32 %v1136_v46, %v812_v22  ;;  %v836_v7 = vmul.f32 %v1136_v46, %v814_v21  ;;  %v864_v29 = vsel %vm114_vm0, %v835_v13, 0.0  ;;  %s955_s6 = smov [#allocation2]  }
 0x107   :  { %v861_v58 = vadd.f32 %v860_v26, %v859_v25  ;;  %s887_s10 = sshll.u32 %s955_s6, 4  ;;  %s888_s10 = int_to_ptr.vmem [resolvable:$true] %s887_s10 }
 0x108   :  { %v862_v27 = vsel %vm114_vm0, %v834_v48, 0.0  ;;  %v866_v32 = vsel %vm114_vm0, %v836_v7, 0.0  ;;  %s929_s2 = scalar_lea.vmem %s888_s10, 16  ;;  %s933_s5 = scalar_lea.vmem %s888_s10, 32 }
 0x109   :  { %v863_v28 = vadd.f32 %v862_v27, %v861_v58  ;;  %p930_p0 = scmp.ne.s32.totalorder %s888_s10, %s929_s2  ;;  %p934_p1 = scmp.lt.s32.totalorder %s888_s10, %s888_s10 }
 0x10a   :  { %p935_p2 = scmp.lt.s32.totalorder %s933_s5, %s929_s2 }
 0x10b   :  { %v865_v31 = vadd.f32 %v864_v29, %v863_v28 }
 0x10c   :  { %p936_p3 = por %p935_p2, %p934_p1 }
 0x10d   :  { %v867_v62 = vadd.f32 %v866_v32, %v865_v31 }
 0x10e   :  { %p937_p4 = pnand %p936_p3, %p930_p0 }
 0x10f   :  { %868 = vadd.xlane.f32.xlu1 %v867_v62 }
 0x19c   :  { %v869_v23 = vpop.xlane.xlu1 %868 }
 0x19d   :  { %v870_v33 = vsel %vm114_vm0, %v869_v23, 0.0 }
 0x19e   :  { %v871_v34 = vrot.slane %v870_v33, 4 }
 0x1a0   :  { %v872_v35 = vadd.f32 %v871_v34, %v870_v33 }
 0x1a2   :  { %v873_v63 = vrot.slane %v872_v35, 2 }
 0x1a4   :  { %v874_v24 = vadd.f32 %v873_v63, %v872_v35 }
 0x1a6   :  { %v875_v46 = vrot.slane %v874_v24, 1 }
 0x1a8   :  { %v876_v36 = vadd.f32 %v875_v46, %v874_v24 }
 0x1aa   :  { %878 = vst.msk [vmem:[#allocation2] sm:$0x1] %vm877_vm2, %v876_v36 }
 0x1ab   :  { %940 = shalt.err (!%p937_p4)
}
 0x1ac   :  { %s941_s0 = scalar_lea.hbm %s1282_s7, 16 }
 0x1ad   :  { %p942_p5 = scmp.ne.s32.totalorder %s1282_s7, %s941_s0  ;;  %p945_p6 = scmp.lt.u32.totalorder %s941_s0, %s1282_s7 }
 0x1af   :  { %p947_p7 = pnand %p945_p6, %p942_p5 }
 0x1b1   :  { %950 = shalt.err (!%p947_p7)
}
 0x1b2   :  { %890 = dma.vmem_to_hbm [thread:$0]  %s888_s10, 16, %s1282_s7, [#allocation3]  }
 0x1b3   :  { %951 = dma.done.wait [#allocation3], 16  }
 0x1b4   :  { %952 = vsyncadd [#allocation3], 4294967280 }
 0x1b5   :  { %896 = vsyncpa [#allocation3], 1 }

</bundles_post_ra>
